<compile_context>
chip_gen: v6e
topology: v6e:2x2x1
jax: 0.10.0
libtpu: 0.0.40
codegen_flags: <defaults>
</compile_context>

<pallas_src>
import jax
import jax.numpy as jnp
from jax.experimental import pallas as pl
from jax.experimental.pallas import tpu as pltpu

NEG_SLOPE = 0.01  # torch.nn.LeakyReLU default
N_ACTIONS = 4
N_PARAMS = 6


def _round_up(n, m):
    return ((n + m - 1) // m) * m


def _leaky_relu(v):
    return jnp.where(v > 0, v, NEG_SLOPE * v)


def _mlp_kernel(
    x_ref,
    w1_ref, b1_ref,
    w2_ref, b2_ref,
    w3_ref, b3_ref,
    w4_ref, b4_ref,
    w5_ref, b5_ref,
    wh_ref, bh_ref,
    out_ref,
):
    """One batch tile through the whole network. Weights (bf16) are VMEM-resident."""

    def layer(h_f32, w_ref, b_ref):
        acc = jnp.dot(
            h_f32.astype(jnp.bfloat16), w_ref[...],
            preferred_element_type=jnp.float32,
        )
        return _leaky_relu(acc + b_ref[...])  # bias + activation in f32

    h = x_ref[...]                       # (tb, IN_PAD) f32
    h = layer(h, w1_ref, b1_ref)
    h = layer(h, w2_ref, b2_ref)
    h = layer(h, w3_ref, b3_ref)
    h = layer(h, w4_ref, b4_ref)
    h = layer(h, w5_ref, b5_ref)

    # Fused heads: one lane-dense (tb, 128) store instead of two masked stores.
    out_ref[...] = (
        jnp.dot(h.astype(jnp.bfloat16), wh_ref[...],
                preferred_element_type=jnp.float32)
        + bh_ref[...]
    )


def neural_net2_forward(x, packed_params, *, batch_tile=128):
    """x: (B, input_size) f32. packed_params: output of pack_params()."""
    B, in_dim = x.shape
    in_pad = packed_params[0][0].shape[0]
    assert in_pad >= in_dim

    tb = max(8, _round_up(min(batch_tile, B), 8))
    b_pad = _round_up(B, tb)

    x_p = jnp.zeros((b_pad, in_pad), jnp.float32).at[:B, :in_dim].set(x)

    flat_args = [x_p]
    in_specs = [pl.BlockSpec((tb, in_pad), lambda i: (i, 0))]
    for w, b in packed_params:
        flat_args.extend([w, b])
        # Constant block index -> weights/biases stay resident across grid steps.
        in_specs.append(pl.BlockSpec(w.shape, lambda i: (0, 0)))
        in_specs.append(pl.BlockSpec(b.shape, lambda i: (0, 0)))

    head_pad = packed_params[-1][0].shape[1]

    out = pl.pallas_call(
        _mlp_kernel,
        out_shape=jax.ShapeDtypeStruct((b_pad, head_pad), jnp.float32),
        grid=(b_pad // tb,),
        in_specs=in_specs,
        out_specs=pl.BlockSpec((tb, head_pad), lambda i: (i, 0)),
        compiler_params=pltpu.CompilerParams(
            dimension_semantics=("parallel",),
        ),
    )(*flat_args)

    return out[:B, :N_ACTIONS], out[:B, N_ACTIONS:N_ACTIONS + N_PARAMS]


def _pad2(a, rows, cols):
    out = jnp.zeros((rows, cols), a.dtype)
    return out.at[: a.shape[0], : a.shape[1]].set(a)


def pack_params(params):
    """Pad all dims to multiples of 128, cast weights to bf16, fuse the two heads.

    params: 7 logical (W, b) pairs, W:(in,out) f32, b:(1,out) f32.
    Padded rows/cols and padded bias lanes are zero, so sliced outputs are
    identical to the unpadded computation.
    """
    packed = []
    for w, b in params[:5]:
        rp = _round_up(w.shape[0], 128)
        cp = _round_up(w.shape[1], 128)
        packed.append((
            _pad2(w, rp, cp).astype(jnp.bfloat16),   # bf16 weights (halve HBM bytes)
            _pad2(b, 1, cp),                          # f32 bias
        ))

    (w_act, b_act), (w_par, b_par) = params[5], params[6]
    wh = jnp.concatenate([w_act, w_par], axis=1)      # (64, 10)
    bh = jnp.concatenate([b_act, b_par], axis=1)      # (1, 10)
    rp = _round_up(wh.shape[0], 128)
    cp = _round_up(wh.shape[1], 128)                  # 10 -> 128 (lane dense)
    packed.append((
        _pad2(wh, rp, cp).astype(jnp.bfloat16),
        _pad2(bh, 1, cp),
    ))
    return packed


def init_params(key, input_size):
    """Deterministic init mimicking nn.Linear's uniform(-1/sqrt(fan_in), 1/sqrt(fan_in))."""
    dims = [
        (input_size, 1000),
        (1000, 750),
        (750, 512),
        (512, 200),
        (200, 64),
        (64, N_ACTIONS),   # output_actions head
        (64, N_PARAMS),    # output_parameters head
    ]
    params = []
    for (fan_in, fan_out) in dims:
        key, kw, kb = jax.random.split(key, 3)
        bound = 1.0 / jnp.sqrt(jnp.float32(fan_in))
        w = jax.random.uniform(kw, (fan_in, fan_out), jnp.float32, -bound, bound)
        b = jax.random.uniform(kb, (1, fan_out), jnp.float32, -bound, bound)
        params.append((w, b))
    return params


def reference_forward(x, params):
    """Pure-JAX reference with the same bf16-weight / f32-accumulate numerics."""
    def dot_bf16(h, w):
        return jnp.dot(h.astype(jnp.bfloat16), w.astype(jnp.bfloat16),
                       preferred_element_type=jnp.float32)

    h = x
    for (w, b) in params[:5]:
        h = _leaky_relu(dot_bf16(h, w) + b)
    out_a = dot_bf16(h, params[5][0]) + params[5][1]
    out_p = dot_bf16(h, params[6][0]) + params[6][1]
    return out_a, out_p


def _check(got, want, name):
    err = float(jnp.max(jnp.abs(got - want)))
    scale = float(jnp.max(jnp.abs(want))) + 1e-6
    assert err <= 1e-2 * scale + 1e-4, f"{name} mismatch: max|diff|={err}, scale={scale}"


if __name__ == "__main__":
    key = jax.random.PRNGKey(0)
    key, kx, kp = jax.random.split(key, 3)

    input_size = 32
    batch = 16
    x = jax.random.normal(kx, (batch, input_size), jnp.float32)

    params = init_params(kp, input_size)
    packed = pack_params(params)

    # batch_tile=8 -> grid of 2 batch chunks; weights stay VMEM-resident across steps.
    out_actions, out_parameters = neural_net2_forward(x, packed, batch_tile=8)
    out_actions = jax.block_until_ready(out_actions)
    out_parameters = jax.block_until_ready(out_parameters)

    ref_a, ref_p = reference_forward(x, params)
    assert out_actions.shape == (batch, N_ACTIONS)
    assert out_parameters.shape == (batch, N_PARAMS)
    _check(out_actions, ref_a, "actions")
    _check(out_parameters, ref_p, "parameters")

    print("KERNEL_OK")
</pallas_src>

<mosaic_0001>
module attributes {stable_mosaic.version = 11 : i64} {
  func.func @_mlp_kernel(%arg0: i32, %arg1: memref<8x128xf32, #tpu.memory_space<vmem>>, %arg2: memref<128x1024xbf16, #tpu.memory_space<vmem>>, %arg3: memref<1x1024xf32, #tpu.memory_space<vmem>>, %arg4: memref<1024x768xbf16, #tpu.memory_space<vmem>>, %arg5: memref<1x768xf32, #tpu.memory_space<vmem>>, %arg6: memref<768x512xbf16, #tpu.memory_space<vmem>>, %arg7: memref<1x512xf32, #tpu.memory_space<vmem>>, %arg8: memref<512x256xbf16, #tpu.memory_space<vmem>>, %arg9: memref<1x256xf32, #tpu.memory_space<vmem>>, %arg10: memref<256x128xbf16, #tpu.memory_space<vmem>>, %arg11: memref<1x128xf32, #tpu.memory_space<vmem>>, %arg12: memref<128x128xbf16, #tpu.memory_space<vmem>>, %arg13: memref<1x128xf32, #tpu.memory_space<vmem>>, %arg14: memref<8x128xf32, #tpu.memory_space<vmem>>) attributes {dimension_semantics = [#tpu.dimension_semantics<parallel>], iteration_bounds = array<i64: 2>, scalar_prefetch = 0 : i64, scratch_operands = 0 : i64, tpu.core_type = #tpu.core_type<tc>, window_params = [{transform_indices = @transform_0, window_bounds = array<i64: 8, 128>}, {pipeline_mode = #tpu.pipeline_mode<synchronous>, transform_indices = @transform_1, window_bounds = array<i64: 128, 1024>}, {pipeline_mode = #tpu.pipeline_mode<synchronous>, transform_indices = @transform_2, window_bounds = array<i64: 1, 1024>}, {pipeline_mode = #tpu.pipeline_mode<synchronous>, transform_indices = @transform_3, window_bounds = array<i64: 1024, 768>}, {pipeline_mode = #tpu.pipeline_mode<synchronous>, transform_indices = @transform_4, window_bounds = array<i64: 1, 768>}, {pipeline_mode = #tpu.pipeline_mode<synchronous>, transform_indices = @transform_5, window_bounds = array<i64: 768, 512>}, {pipeline_mode = #tpu.pipeline_mode<synchronous>, transform_indices = @transform_6, window_bounds = array<i64: 1, 512>}, {pipeline_mode = #tpu.pipeline_mode<synchronous>, transform_indices = @transform_7, window_bounds = array<i64: 512, 256>}, {pipeline_mode = #tpu.pipeline_mode<synchronous>, transform_indices = @transform_8, window_bounds = array<i64: 1, 256>}, {pipeline_mode = #tpu.pipeline_mode<synchronous>, transform_indices = @transform_9, window_bounds = array<i64: 256, 128>}, {pipeline_mode = #tpu.pipeline_mode<synchronous>, transform_indices = @transform_10, window_bounds = array<i64: 1, 128>}, {pipeline_mode = #tpu.pipeline_mode<synchronous>, transform_indices = @transform_11, window_bounds = array<i64: 128, 128>}, {pipeline_mode = #tpu.pipeline_mode<synchronous>, transform_indices = @transform_12, window_bounds = array<i64: 1, 128>}, {transform_indices = @transform_13, window_bounds = array<i64: 8, 128>}]} {
    %c0 = arith.constant 0 : index
    %c0_0 = arith.constant 0 : index
    %0 = vector.load %arg1[%c0, %c0_0] : memref<8x128xf32, #tpu.memory_space<vmem>>, vector<8x128xf32>
    %1 = arith.truncf %0 : vector<8x128xf32> to vector<8x128xbf16>
    %c0_1 = arith.constant 0 : index
    %c0_2 = arith.constant 0 : index
    %2 = vector.load %arg2[%c0_1, %c0_2] : memref<128x1024xbf16, #tpu.memory_space<vmem>>, vector<128x1024xbf16>
    %cst = arith.constant dense<0.000000e+00> : vector<8x1024xf32>
    %3 = tpu.matmul %1, %2, %cst {dimension_numbers = #tpu.dot_dimension_numbers<[1], [0], [0], [1], [0, 0, 1, 1], [], []>} : vector<8x128xbf16>, vector<128x1024xbf16>, vector<8x1024xf32> -> vector<8x1024xf32>
    %c0_3 = arith.constant 0 : index
    %c0_4 = arith.constant 0 : index
    %4 = vector.load %arg3[%c0_3, %c0_4] : memref<1x1024xf32, #tpu.memory_space<vmem>>, vector<1x1024xf32>
    %5 = vector.broadcast %4 : vector<1x1024xf32> to vector<8x1024xf32>
    %6 = arith.addf %3, %5 : vector<8x1024xf32>
    %cst_5 = arith.constant 0.000000e+00 : f32
    %7 = vector.broadcast %cst_5 : f32 to vector<8x1024xf32>
    %8 = arith.cmpf ogt, %6, %7 : vector<8x1024xf32>
    %cst_6 = arith.constant 0.00999999977 : f32
    %9 = vector.broadcast %cst_6 : f32 to vector<8x1024xf32>
    %10 = arith.mulf %9, %6 : vector<8x1024xf32>
    %11 = arith.select %8, %6, %10 : vector<8x1024xi1>, vector<8x1024xf32>
    %12 = arith.truncf %11 : vector<8x1024xf32> to vector<8x1024xbf16>
    %c0_7 = arith.constant 0 : index
    %c0_8 = arith.constant 0 : index
    %13 = vector.load %arg4[%c0_7, %c0_8] : memref<1024x768xbf16, #tpu.memory_space<vmem>>, vector<1024x768xbf16>
    %cst_9 = arith.constant dense<0.000000e+00> : vector<8x768xf32>
    %14 = tpu.matmul %12, %13, %cst_9 {dimension_numbers = #tpu.dot_dimension_numbers<[1], [0], [0], [1], [0, 0, 1, 1], [], []>} : vector<8x1024xbf16>, vector<1024x768xbf16>, vector<8x768xf32> -> vector<8x768xf32>
    %c0_10 = arith.constant 0 : index
    %c0_11 = arith.constant 0 : index
    %15 = vector.load %arg5[%c0_10, %c0_11] : memref<1x768xf32, #tpu.memory_space<vmem>>, vector<1x768xf32>
    %16 = vector.broadcast %15 : vector<1x768xf32> to vector<8x768xf32>
    %17 = arith.addf %14, %16 : vector<8x768xf32>
    %cst_12 = arith.constant 0.000000e+00 : f32
    %18 = vector.broadcast %cst_12 : f32 to vector<8x768xf32>
    %19 = arith.cmpf ogt, %17, %18 : vector<8x768xf32>
    %cst_13 = arith.constant 0.00999999977 : f32
    %20 = vector.broadcast %cst_13 : f32 to vector<8x768xf32>
    %21 = arith.mulf %20, %17 : vector<8x768xf32>
    %22 = arith.select %19, %17, %21 : vector<8x768xi1>, vector<8x768xf32>
    %23 = arith.truncf %22 : vector<8x768xf32> to vector<8x768xbf16>
    %c0_14 = arith.constant 0 : index
    %c0_15 = arith.constant 0 : index
    %24 = vector.load %arg6[%c0_14, %c0_15] : memref<768x512xbf16, #tpu.memory_space<vmem>>, vector<768x512xbf16>
    %cst_16 = arith.constant dense<0.000000e+00> : vector<8x512xf32>
    %25 = tpu.matmul %23, %24, %cst_16 {dimension_numbers = #tpu.dot_dimension_numbers<[1], [0], [0], [1], [0, 0, 1, 1], [], []>} : vector<8x768xbf16>, vector<768x512xbf16>, vector<8x512xf32> -> vector<8x512xf32>
    %c0_17 = arith.constant 0 : index
    %c0_18 = arith.constant 0 : index
    %26 = vector.load %arg7[%c0_17, %c0_18] : memref<1x512xf32, #tpu.memory_space<vmem>>, vector<1x512xf32>
    %27 = vector.broadcast %26 : vector<1x512xf32> to vector<8x512xf32>
    %28 = arith.addf %25, %27 : vector<8x512xf32>
    %cst_19 = arith.constant 0.000000e+00 : f32
    %29 = vector.broadcast %cst_19 : f32 to vector<8x512xf32>
    %30 = arith.cmpf ogt, %28, %29 : vector<8x512xf32>
    %cst_20 = arith.constant 0.00999999977 : f32
    %31 = vector.broadcast %cst_20 : f32 to vector<8x512xf32>
    %32 = arith.mulf %31, %28 : vector<8x512xf32>
    %33 = arith.select %30, %28, %32 : vector<8x512xi1>, vector<8x512xf32>
    %34 = arith.truncf %33 : vector<8x512xf32> to vector<8x512xbf16>
    %c0_21 = arith.constant 0 : index
    %c0_22 = arith.constant 0 : index
    %35 = vector.load %arg8[%c0_21, %c0_22] : memref<512x256xbf16, #tpu.memory_space<vmem>>, vector<512x256xbf16>
    %cst_23 = arith.constant dense<0.000000e+00> : vector<8x256xf32>
    %36 = tpu.matmul %34, %35, %cst_23 {dimension_numbers = #tpu.dot_dimension_numbers<[1], [0], [0], [1], [0, 0, 1, 1], [], []>} : vector<8x512xbf16>, vector<512x256xbf16>, vector<8x256xf32> -> vector<8x256xf32>
    %c0_24 = arith.constant 0 : index
    %c0_25 = arith.constant 0 : index
    %37 = vector.load %arg9[%c0_24, %c0_25] : memref<1x256xf32, #tpu.memory_space<vmem>>, vector<1x256xf32>
    %38 = vector.broadcast %37 : vector<1x256xf32> to vector<8x256xf32>
    %39 = arith.addf %36, %38 : vector<8x256xf32>
    %cst_26 = arith.constant 0.000000e+00 : f32
    %40 = vector.broadcast %cst_26 : f32 to vector<8x256xf32>
    %41 = arith.cmpf ogt, %39, %40 : vector<8x256xf32>
    %cst_27 = arith.constant 0.00999999977 : f32
    %42 = vector.broadcast %cst_27 : f32 to vector<8x256xf32>
    %43 = arith.mulf %42, %39 : vector<8x256xf32>
    %44 = arith.select %41, %39, %43 : vector<8x256xi1>, vector<8x256xf32>
    %45 = arith.truncf %44 : vector<8x256xf32> to vector<8x256xbf16>
    %c0_28 = arith.constant 0 : index
    %c0_29 = arith.constant 0 : index
    %46 = vector.load %arg10[%c0_28, %c0_29] : memref<256x128xbf16, #tpu.memory_space<vmem>>, vector<256x128xbf16>
    %cst_30 = arith.constant dense<0.000000e+00> : vector<8x128xf32>
    %47 = tpu.matmul %45, %46, %cst_30 {dimension_numbers = #tpu.dot_dimension_numbers<[1], [0], [0], [1], [0, 0, 1, 1], [], []>} : vector<8x256xbf16>, vector<256x128xbf16>, vector<8x128xf32> -> vector<8x128xf32>
    %c0_31 = arith.constant 0 : index
    %c0_32 = arith.constant 0 : index
    %48 = vector.load %arg11[%c0_31, %c0_32] : memref<1x128xf32, #tpu.memory_space<vmem>>, vector<1x128xf32>
    %49 = vector.broadcast %48 : vector<1x128xf32> to vector<8x128xf32>
    %50 = arith.addf %47, %49 : vector<8x128xf32>
    %cst_33 = arith.constant 0.000000e+00 : f32
    %51 = vector.broadcast %cst_33 : f32 to vector<8x128xf32>
    %52 = arith.cmpf ogt, %50, %51 : vector<8x128xf32>
    %cst_34 = arith.constant 0.00999999977 : f32
    %53 = vector.broadcast %cst_34 : f32 to vector<8x128xf32>
    %54 = arith.mulf %53, %50 : vector<8x128xf32>
    %55 = arith.select %52, %50, %54 : vector<8x128xi1>, vector<8x128xf32>
    %56 = arith.truncf %55 : vector<8x128xf32> to vector<8x128xbf16>
    %c0_35 = arith.constant 0 : index
    %c0_36 = arith.constant 0 : index
    %57 = vector.load %arg12[%c0_35, %c0_36] : memref<128x128xbf16, #tpu.memory_space<vmem>>, vector<128x128xbf16>
    %cst_37 = arith.constant dense<0.000000e+00> : vector<8x128xf32>
    %58 = tpu.matmul %56, %57, %cst_37 {dimension_numbers = #tpu.dot_dimension_numbers<[1], [0], [0], [1], [0, 0, 1, 1], [], []>} : vector<8x128xbf16>, vector<128x128xbf16>, vector<8x128xf32> -> vector<8x128xf32>
    %c0_38 = arith.constant 0 : index
    %c0_39 = arith.constant 0 : index
    %59 = vector.load %arg13[%c0_38, %c0_39] : memref<1x128xf32, #tpu.memory_space<vmem>>, vector<1x128xf32>
    %60 = vector.broadcast %59 : vector<1x128xf32> to vector<8x128xf32>
    %61 = arith.addf %58, %60 : vector<8x128xf32>
    %c0_40 = arith.constant 0 : index
    %c0_41 = arith.constant 0 : index
    %62 = vector.load %arg14[%c0_40, %c0_41] : memref<8x128xf32, #tpu.memory_space<vmem>>, vector<8x128xf32>
    tpu.vector_store %arg14[%c0_40, %c0_41], %61 {strides = array<i32>} : memref<8x128xf32, #tpu.memory_space<vmem>>, vector<8x128xf32>,
    return
  }
  func.func @transform_0(%arg0: i32) -> (i32, i32) {
    %c0_i32 = arith.constant 0 : i32
    %c0_i32_0 = arith.constant 0 : i32
    return %arg0, %c0_i32 : i32, i32
  }
  func.func @transform_1(%arg0: i32) -> (i32, i32) {
    %c0_i32 = arith.constant 0 : i32
    %c0_i32_0 = arith.constant 0 : i32
    %c0_i32_1 = arith.constant 0 : i32
    return %c0_i32, %c0_i32_0 : i32, i32
  }
  func.func @transform_2(%arg0: i32) -> (i32, i32) {
    %c0_i32 = arith.constant 0 : i32
    %c0_i32_0 = arith.constant 0 : i32
    %c0_i32_1 = arith.constant 0 : i32
    return %c0_i32, %c0_i32_0 : i32, i32
  }
  func.func @transform_3(%arg0: i32) -> (i32, i32) {
    %c0_i32 = arith.constant 0 : i32
    %c0_i32_0 = arith.constant 0 : i32
    %c0_i32_1 = arith.constant 0 : i32
    return %c0_i32, %c0_i32_0 : i32, i32
  }
  func.func @transform_4(%arg0: i32) -> (i32, i32) {
    %c0_i32 = arith.constant 0 : i32
    %c0_i32_0 = arith.constant 0 : i32
    %c0_i32_1 = arith.constant 0 : i32
    return %c0_i32, %c0_i32_0 : i32, i32
  }
  func.func @transform_5(%arg0: i32) -> (i32, i32) {
    %c0_i32 = arith.constant 0 : i32
    %c0_i32_0 = arith.constant 0 : i32
    %c0_i32_1 = arith.constant 0 : i32
    return %c0_i32, %c0_i32_0 : i32, i32
  }
  func.func @transform_6(%arg0: i32) -> (i32, i32) {
    %c0_i32 = arith.constant 0 : i32
    %c0_i32_0 = arith.constant 0 : i32
    %c0_i32_1 = arith.constant 0 : i32
    return %c0_i32, %c0_i32_0 : i32, i32
  }
  func.func @transform_7(%arg0: i32) -> (i32, i32) {
    %c0_i32 = arith.constant 0 : i32
    %c0_i32_0 = arith.constant 0 : i32
    %c0_i32_1 = arith.constant 0 : i32
    return %c0_i32, %c0_i32_0 : i32, i32
  }
  func.func @transform_8(%arg0: i32) -> (i32, i32) {
    %c0_i32 = arith.constant 0 : i32
    %c0_i32_0 = arith.constant 0 : i32
    %c0_i32_1 = arith.constant 0 : i32
    return %c0_i32, %c0_i32_0 : i32, i32
  }
  func.func @transform_9(%arg0: i32) -> (i32, i32) {
    %c0_i32 = arith.constant 0 : i32
    %c0_i32_0 = arith.constant 0 : i32
    %c0_i32_1 = arith.constant 0 : i32
    return %c0_i32, %c0_i32_0 : i32, i32
  }
  func.func @transform_10(%arg0: i32) -> (i32, i32) {
    %c0_i32 = arith.constant 0 : i32
    %c0_i32_0 = arith.constant 0 : i32
    %c0_i32_1 = arith.constant 0 : i32
    return %c0_i32, %c0_i32_0 : i32, i32
  }
  func.func @transform_11(%arg0: i32) -> (i32, i32) {
    %c0_i32 = arith.constant 0 : i32
    %c0_i32_0 = arith.constant 0 : i32
    %c0_i32_1 = arith.constant 0 : i32
    return %c0_i32, %c0_i32_0 : i32, i32
  }
  func.func @transform_12(%arg0: i32) -> (i32, i32) {
    %c0_i32 = arith.constant 0 : i32
    %c0_i32_0 = arith.constant 0 : i32
    %c0_i32_1 = arith.constant 0 : i32
    return %c0_i32, %c0_i32_0 : i32, i32
  }
  func.func @transform_13(%arg0: i32) -> (i32, i32) {
    %c0_i32 = arith.constant 0 : i32
    %c0_i32_0 = arith.constant 0 : i32
    return %arg0, %c0_i32 : i32, i32
  }
}

</mosaic_0001>

<bundles_post_ra>
// kernel: tpu_custom_call.1
= control target key start
LH: loop header
LB: loop body
LE: loop exit
PB: predicated region body
PF: predicated region fallthrough
CT: control target
= control target key end

     0   :  { %s9486_s0 = inlined_call_operand.hbm [shape: f32[16,128], index: 0, kind: input, shape index: {}]   ;;  %s9487_s1 = inlined_call_operand.hbm [shape: bf16[128,1024], index: 1, kind: input, shape index: {}]   ;;  %s9488_s2 = inlined_call_operand.hbm [shape: f32[1,1024], index: 2, kind: input, shape index: {}]   ;;  %s9489_s3 = inlined_call_operand.hbm [shape: bf16[1024,768], index: 3, kind: input, shape index: {}]   ;;  %s9490_s4 = inlined_call_operand.hbm [shape: f32[1,768], index: 4, kind: input, shape index: {}]   ;;  %s9491_s5 = inlined_call_operand.hbm [shape: bf16[768,512], index: 5, kind: input, shape index: {}]   ;;  %s9492_s6 = inlined_call_operand.hbm [shape: f32[1,512], index: 6, kind: input, shape index: {}]   ;;  %s9493_s7 = inlined_call_operand.hbm [shape: bf16[512,256], index: 7, kind: input, shape index: {}]   ;;  %s9494_s8 = inlined_call_operand.hbm [shape: f32[1,256], index: 8, kind: input, shape index: {}]   ;;  %s9495_s9 = inlined_call_operand.hbm [shape: bf16[256,128], index: 9, kind: input, shape index: {}]   ;;  %s9496_s10 = inlined_call_operand.hbm [shape: f32[1,128], index: 10, kind: input, shape index: {}]   ;;  %s9497_s11 = inlined_call_operand.hbm [shape: bf16[128,128], index: 11, kind: input, shape index: {}]   ;;  %s9498_s12 = inlined_call_operand.hbm [shape: f32[1,128], index: 12, kind: input, shape index: {}]   ;;  %s9499_s13 = inlined_call_operand.hbm [shape: f32[16,128], index: 13, kind: output, shape index: {}]  }
   0x1   :  { %9505 = sst [smem:[#allocation32_spill]] %s9487_s1 }
   0x2   :  { %9506 = sst [smem:[#allocation33_spill]] %s9488_s2 }
   0x3   :  { %9507 = sst [smem:[#allocation34_spill]] %s9489_s3 }
   0x4   :  { %9508 = sst [smem:[#allocation35_spill]] %s9490_s4 }
   0x5   :  { %9509 = sst [smem:[#allocation36_spill]] %s9491_s5 }
   0x6   :  { %9510 = sst [smem:[#allocation37_spill]] %s9492_s6 }
   0x7   :  { %9511 = sst [smem:[#allocation38_spill]] %s9493_s7 }
   0x8   :  { %9512 = sst [smem:[#allocation39_spill]] %s9499_s13 }
   0x9   :  { %18 = vsyncpa [#allocation3], 0 }
   0xa   :  { %20 = vsyncpa [#allocation3 + $0x1], 0 }
   0xb   :  { %21 = vsyncpa [#allocation6], 0 }
   0xc   :  { %22 = vsyncpa [#allocation9], 0 }
   0xd   :  { %23 = vsyncpa [#allocation12], 0 }
   0xe   :  { %24 = vsyncpa [#allocation15], 0 }
   0xf   :  { %25 = vsyncpa [#allocation18], 0 }
  0x10   :  { %26 = vsyncpa [#allocation21], 0 }
  0x11   :  { %27 = vsyncpa [#allocation4], 0 }
  0x12   :  { %29 = vsyncpa [#allocation4 + $0x1], 0  ;;  %s9015_s25 = smov 0   ;;  %s9017_s26 = smov 0  }
  0x13   :  { %s9019_s27 = smov 0   ;;  %s9021_s28 = smov 0  }
  0x14 LB: > { %s8918_s29 = smov [#allocation5]   ;;  %s9036_s14 = sadd.s32 4294967295, %s8916_s28   ;;  %s8916_s28 = sphi %s9021_s28, %s9550_s28   ;;  %s8912_s27 = sphi %s9019_s27, %s9549_s27   ;;  %s8908_s26 = sphi %s9017_s26, %s9548_s26   ;;  %s8904_s25 = sphi %s9015_s25, %s9547_s25  }
  0x15   : > { %s356_s30 = sshll.u32 %s8918_s29, 4  ;;  %p6507_p0 = scmp.ge.s32.totalorder %s8916_s28, 1  ;;  %s357_s30 = int_to_ptr.vmem [resolvable:$true] %s356_s30 }
  0x16   : > { %p9501_p1 = scmp.eq.s32.totalorder %s9036_s14, 0  ;;  %p344_p2 = scmp.lt.s32.totalorder %s8916_s28, 3 }
  0x17   : > { %s8919_s16 = smov [#allocation8]   ;;  %s8920_s19 = smov [#allocation11]  }
  0x18   : > { %p9041_p3 = pnand %p6507_p0, %p344_p2  ;;  %s380_s17 = sshll.u32 %s8919_s16, 4  ;;  %s9054_s17 = int_to_ptr.vmem [resolvable:$true] %s380_s17 }
  0x19   : > { %s9056_s20 = sshll.u32 %s8920_s19, 4  ;;  %s8499_s22 = scalar_lea.vmem %s357_s30, 8192  ;;  %s405_s20 = int_to_ptr.vmem [resolvable:$true] %s9056_s20 }
  0x1a   : > { %s9513_s15 = scalar_select %p9041_p3, 1, 0 }
  0x1b   : > { %p7375_p5 = pneg %p9041_p3  ;;  %p8500_p8 = scmp.ne.s32.totalorder %s357_s30, %s8499_s22 }
  0x1c   : > { %p8507_p11 = scmp.lt.s32.totalorder %s357_s30, %s357_s30  ;;  %p8508_p12 = scmp.lt.s32.totalorder %s8499_s22, %s8499_s22 }
  0x1d   : > { %p9050_p6 = pnand %p7375_p5, %p9501_p1 }
  0x1e   : > { %p8509_p13 = por %p8508_p12, %p8507_p11 }
  0x1f   : > { %p9060_p7 = pneg %p9050_p6 }
  0x21   : > { %p8502_p9 = pnand %p8500_p8, %p9060_p7 }
  0x23   : > { %p8503_p10 = pneg %p8502_p9 }
  0x25   : > { %p8510_p0 = pnand %p8509_p13, %p8503_p10 }
  0x27   : > { %8513 = shalt.err (!%p8510_p0)
}
  0x28   : > { %s8921_s23 = smov 512   ;;  %s8922_s24 = smov 32  }
  0x29   : > { %s9516_s1 = sld [smem:[#allocation32_spill]]  ;;  %s8525_s19 = scalar_lea.vmem %s9054_s17, 49152 }
  0x2a   : > { %p8526_p2 = scmp.ne.s32.totalorder %s9054_s17, %s8525_s19  ;;  %p8533_p9 = scmp.lt.s32.totalorder %s9054_s17, %s9054_s17 }
  0x2b   : > { %p8534_p10 = scmp.lt.s32.totalorder %s8525_s19, %s8525_s19 }
  0x2c   : > { %p8528_p5 = pnand %p8526_p2, %p9060_p7 }
  0x2d   : > { %p8535_p11 = por %p8534_p10, %p8533_p9 }
  0x2e   : > { %p8529_p8 = pneg %p8528_p5 }
  0x2f   : > { %7378 = dma.hbm_to_vmem [thread:$0]  (!%p9050_p6), %s9516_s1, 8192, %s357_s30, [#allocation6], %s8921_s23, %s8921_s23, %s8922_s24  }
  0x30   : > { %p8536_p12 = pnand %p8535_p11, %p8529_p8 }
  0x32   : > { %8539 = shalt.err (!%p8536_p12)
}
  0x33   : > { %s8923_s22 = smov 384   ;;  %s8924_s13 = smov 24  }
  0x34   : > { %s9517_s3 = sld [smem:[#allocation34_spill]]  ;;  %s8551_s23 = scalar_lea.vmem %s405_s20, 24576 }
  0x35   : > { %p8552_p13 = scmp.ne.s32.totalorder %s405_s20, %s8551_s23  ;;  %p8559_p5 = scmp.lt.s32.totalorder %s405_s20, %s405_s20 }
  0x36   : > { %p8560_p8 = scmp.lt.s32.totalorder %s8551_s23, %s8551_s23 }
  0x37   : > { %p8554_p0 = pnand %p8552_p13, %p9060_p7 }
  0x38   : > { %p8561_p9 = por %p8560_p8, %p8559_p5 }
  0x39   : > { %p8555_p2 = pneg %p8554_p0 }
  0x3a   : > { %7384 = dma.hbm_to_vmem [thread:$0]  (!%p9050_p6), %s9517_s3, 49152, %s9054_s17, [#allocation9], %s8923_s22, %s8923_s22, %s8924_s13  }
  0x3b   : > { %p8562_p10 = pnand %p8561_p9, %p8555_p2 }
  0x3d   : > { %8565 = shalt.err (!%p8562_p10)
}
  0x3e   : > { %s8925_s24 = smov 256   ;;  %s8926_s16 = smov 16  }
  0x3f   : > { %s9518_s5 = sld [smem:[#allocation36_spill]]  ;;  %s8927_s13 = smov [#allocation14]  }
  0x40   : > { %s428_s17 = sshll.u32 %s8927_s13, 4  ;;  %s429_s17 = int_to_ptr.vmem [resolvable:$true] %s428_s17 }
  0x41   : > { %s8577_s22 = scalar_lea.vmem %s429_s17, 8192  ;;  %p8585_p0 = scmp.lt.s32.totalorder %s429_s17, %s429_s17 }
  0x42   : > { %p8578_p11 = scmp.ne.s32.totalorder %s429_s17, %s8577_s22  ;;  %p8586_p2 = scmp.lt.s32.totalorder %s8577_s22, %s8577_s22 }
  0x44   : > { %p8580_p12 = pnand %p8578_p11, %p9060_p7  ;;  %p8587_p5 = por %p8586_p2, %p8585_p0 }
  0x45   : > { %7390 = dma.hbm_to_vmem [thread:$0]  (!%p9050_p6), %s9518_s5, 24576, %s405_s20, [#allocation12], %s8925_s24, %s8925_s24, %s8926_s16  }
  0x46   : > { %p8581_p13 = pneg %p8580_p12 }
  0x48   : > { %p8588_p8 = pnand %p8587_p5, %p8581_p13 }
  0x4a   : > { %8591 = shalt.err (!%p8588_p8)
}
  0x4b   : > { %s8928_s29 = smov 128   ;;  %s8929_s30 = smov 8  }
  0x4c   : > { %s9519_s7 = sld [smem:[#allocation38_spill]]  ;;  %s8930_s23 = smov [#allocation17]  }
  0x4d   : > { %s452_s24 = sshll.u32 %s8930_s23, 4  ;;  %s453_s24 = int_to_ptr.vmem [resolvable:$true] %s452_s24 }
  0x4e   : > { %s8603_s16 = scalar_lea.vmem %s453_s24, 2048  ;;  %p8611_p12 = scmp.lt.s32.totalorder %s453_s24, %s453_s24 }
  0x4f   : > { %p8604_p9 = scmp.ne.s32.totalorder %s453_s24, %s8603_s16  ;;  %p8612_p13 = scmp.lt.s32.totalorder %s8603_s16, %s8603_s16 }
  0x51   : > { %p8606_p10 = pnand %p8604_p9, %p9060_p7  ;;  %p8613_p0 = por %p8612_p13, %p8611_p12 }
  0x52   : > { %7396 = dma.hbm_to_vmem [thread:$0]  (!%p9050_p6), %s9519_s7, 8192, %s429_s17, [#allocation15], %s8928_s29, %s8928_s29, %s8929_s30  }
  0x53   : > { %p8607_p11 = pneg %p8606_p10 }
  0x55   : > { %p8614_p2 = pnand %p8613_p0, %p8607_p11 }
  0x57   : > { %8617 = shalt.err (!%p8614_p2)
}
  0x58   : > { %s8931_s19 = smov 64   ;;  %s8932_s13 = smov 4  }
  0x59   : > { %7402 = dma.hbm_to_vmem [thread:$0]  (!%p9050_p6), %s9495_s9, 2048, %s453_s24, [#allocation18], %s8931_s19, %s8931_s19, %s8932_s13  }
  0x5a   : > { %s8933_s29 = smov [#allocation20]   ;;  %s8934_s1 = smov [#allocation7]  }
  0x5b   : > { %s476_s30 = sshll.u32 %s8933_s29, 4  ;;  %s370_s20 = sshll.u32 %s8934_s1, 4  ;;  %s477_s30 = int_to_ptr.vmem [resolvable:$true] %s476_s30  ;;  %s371_s20 = int_to_ptr.vmem [resolvable:$true] %s370_s20 }
  0x5c   : > { %s8629_s23 = scalar_lea.vmem %s477_s30, 1024  ;;  %p8637_p10 = scmp.lt.s32.totalorder %s477_s30, %s477_s30 }
  0x5d   : > { %p8630_p5 = scmp.ne.s32.totalorder %s477_s30, %s8629_s23  ;;  %p8638_p11 = scmp.lt.s32.totalorder %s8629_s23, %s8629_s23 }
  0x5f   : > { %p8632_p8 = pnand %p8630_p5, %p9060_p7  ;;  %p8639_p12 = por %p8638_p11, %p8637_p10 }
  0x61   : > { %p8633_p9 = pneg %p8632_p8 }
  0x63   : > { %p8640_p13 = pnand %p8639_p12, %p8633_p9 }
  0x65   : > { %8643 = shalt.err (!%p8640_p13)
}
  0x66   : > { %7408 = dma.hbm_to_vmem [thread:$0]  (!%p9050_p6), %s9497_s11, 1024, %s477_s30, [#allocation21], %s8931_s19, %s8931_s19, %s8932_s13  }
  0x67   : > { %s8655_s24 = scalar_lea.vmem %s371_s20, 128  ;;  %p8663_p5 = scmp.lt.s32.totalorder %s371_s20, %s371_s20 }
  0x68   : > { %p8656_p0 = scmp.ne.s32.totalorder %s371_s20, %s8655_s24  ;;  %p8664_p8 = scmp.lt.s32.totalorder %s8655_s24, %s8655_s24 }
  0x6a   : > { %p8658_p2 = pnand %p8656_p0, %p9060_p7  ;;  %p8665_p1 = por %p8664_p8, %p8663_p5 }
  0x6c   : > { %p8659_p4 = pneg %p8658_p2 }
  0x6e   : > { %p8666_p3 = pnand %p8665_p1, %p8659_p4 }
  0x70   : > { %8669 = shalt.err (!%p8666_p3)
}
  0x71   : > { %s9520_s2 = sld [smem:[#allocation33_spill]]  ;;  %s8935_s1 = smov [#allocation10]  }
  0x72   : > { %s394_s19 = sshll.u32 %s8935_s1, 4  ;;  %s8936_s13 = smov [#allocation13]   ;;  %s395_s19 = int_to_ptr.vmem [resolvable:$true] %s394_s19 }
  0x73   : > { %s418_s30 = sshll.u32 %s8936_s13, 4  ;;  %s8681_s23 = scalar_lea.vmem %s395_s19, 96  ;;  %s419_s30 = int_to_ptr.vmem [resolvable:$true] %s418_s30 }
  0x74   : > { %p8682_p9 = scmp.ne.s32.totalorder %s395_s19, %s8681_s23  ;;  %p8689_p12 = scmp.lt.s32.totalorder %s395_s19, %s395_s19 }
  0x75   : > { %p8690_p1 = scmp.lt.s32.totalorder %s8681_s23, %s8681_s23 }
  0x76   : > { %p8684_p10 = pnand %p8682_p9, %p9060_p7 }
  0x77   : > { %7381 = dma.hbm_to_vmem [thread:$0]  (!%p9050_p6), %s9520_s2, 128, %s371_s20, [#allocation6]  }
  0x78   : > { %p8685_p11 = pneg %p8684_p10  ;;  %p8691_p3 = por %p8690_p1, %p8689_p12 }
  0x7a   : > { %p8692_p4 = pnand %p8691_p3, %p8685_p11 }
  0x7c   : > { %8695 = shalt.err (!%p8692_p4)
}
  0x7d   : > { %s9521_s4 = sld [smem:[#allocation35_spill]]  ;;  %s8707_s20 = scalar_lea.vmem %s419_s30, 64 }
  0x7e   : > { %p8708_p13 = scmp.ne.s32.totalorder %s419_s30, %s8707_s20  ;;  %p8715_p5 = scmp.lt.s32.totalorder %s419_s30, %s419_s30 }
  0x7f   : > { %p8716_p8 = scmp.lt.s32.totalorder %s8707_s20, %s8707_s20 }
  0x80   : > { %p8710_p0 = pnand %p8708_p13, %p9060_p7 }
  0x81   : > { %p8717_p9 = por %p8716_p8, %p8715_p5 }
  0x82   : > { %p8711_p2 = pneg %p8710_p0 }
  0x83   : > { %7387 = dma.hbm_to_vmem [thread:$0]  (!%p9050_p6), %s9521_s4, 96, %s395_s19, [#allocation9]  }
  0x84   : > { %p8718_p10 = pnand %p8717_p9, %p8711_p2 }
  0x86   : > { %8721 = shalt.err (!%p8718_p10)
}
  0x87   : > { %s9522_s6 = sld [smem:[#allocation37_spill]]  ;;  %s8937_s29 = smov [#allocation16]  }
  0x88   : > { %s442_s1 = sshll.u32 %s8937_s29, 4  ;;  %s8938_s19 = smov [#allocation19]   ;;  %s443_s1 = int_to_ptr.vmem [resolvable:$true] %s442_s1 }
  0x89   : > { %s466_s13 = sshll.u32 %s8938_s19, 4  ;;  %s8733_s23 = scalar_lea.vmem %s443_s1, 32  ;;  %s467_s13 = int_to_ptr.vmem [resolvable:$true] %s466_s13 }
  0x8a   : > { %p8734_p11 = scmp.ne.s32.totalorder %s443_s1, %s8733_s23  ;;  %p8741_p3 = scmp.lt.s32.totalorder %s443_s1, %s443_s1 }
  0x8b   : > { %p8742_p4 = scmp.lt.s32.totalorder %s8733_s23, %s8733_s23 }
  0x8c   : > { %p8736_p12 = pnand %p8734_p11, %p9060_p7 }
  0x8d   : > { %7393 = dma.hbm_to_vmem [thread:$0]  (!%p9050_p6), %s9522_s6, 64, %s419_s30, [#allocation12]  }
  0x8e   : > { %p8737_p1 = pneg %p8736_p12  ;;  %p8743_p13 = por %p8742_p4, %p8741_p3 }
  0x90   : > { %p8744_p0 = pnand %p8743_p13, %p8737_p1 }
  0x92   : > { %8747 = shalt.err (!%p8744_p0)
}
  0x93   : > { %7399 = dma.hbm_to_vmem [thread:$0]  (!%p9050_p6), %s9494_s8, 32, %s443_s1, [#allocation15]  }
  0x94   : > { %s8759_s30 = scalar_lea.vmem %s467_s13, 16  ;;  %s8766_s20 = scalar_lea.vmem %s467_s13, 32 }
  0x95   : > { %p8760_p2 = scmp.ne.s32.totalorder %s467_s13, %s8759_s30  ;;  %p8767_p9 = scmp.lt.s32.totalorder %s467_s13, %s467_s13 }
  0x96   : > { %p8768_p10 = scmp.lt.s32.totalorder %s8766_s20, %s8759_s30 }
  0x97   : > { %p8762_p5 = pnand %p8760_p2, %p9060_p7 }
  0x98   : > { %p8769_p11 = por %p8768_p10, %p8767_p9 }
  0x99   : > { %p8763_p8 = pneg %p8762_p5 }
  0x9b   : > { %p8770_p12 = pnand %p8769_p11, %p8763_p8 }
  0x9d   : > { %8773 = shalt.err (!%p8770_p12)
}
  0x9e   : > { %7405 = dma.hbm_to_vmem [thread:$0]  (!%p9050_p6), %s9496_s10, 16, %s467_s13, [#allocation18]  }
  0x9f   : > { %s8939_s29 = smov [#allocation22]  }
  0xa0   : > { %s490_s1 = sshll.u32 %s8939_s29, 4  ;;  %s491_s1 = int_to_ptr.vmem [resolvable:$true] %s490_s1 }
  0xa1   : > { %s8785_s19 = scalar_lea.vmem %s491_s1, 16  ;;  %s8792_s23 = scalar_lea.vmem %s491_s1, 32 }
  0xa2   : > { %p8786_p1 = scmp.ne.s32.totalorder %s491_s1, %s8785_s19  ;;  %p8793_p13 = scmp.lt.s32.totalorder %s491_s1, %s491_s1 }
  0xa3   : > { %p8794_p0 = scmp.lt.s32.totalorder %s8792_s23, %s8785_s19 }
  0xa4   : > { %p8788_p3 = pnand %p8786_p1, %p9060_p7 }
  0xa5   : > { %p8795_p2 = por %p8794_p0, %p8793_p13 }
  0xa6   : > { %p8789_p4 = pneg %p8788_p3 }
  0xa8   : > { %p8796_p5 = pnand %p8795_p2, %p8789_p4 }
  0xaa   : > { %8799 = shalt.err (!%p8796_p5)
}
  0xab   : > { %7411 = dma.hbm_to_vmem [thread:$0]  (!%p9050_p6), %s9498_s12, 16, %s491_s1, [#allocation21]  }
  0xac   : > { %s6506_s21 = sadd.s32 4294967294, %s8916_s28   ;;  %s9156_s18 = sadd.s32 1, %s8916_s28  }
  0xad   : > { %s39_s13 = ssub.s32 %s8916_s28, %s9156_s18  ;;  %s42_s30 = sadd.s32 1, %s8912_s27 }
  0xae   : > { %p40_p7 = scmp.eq.s32.totalorder %s39_s13, 0  ;;  %p49_p8 = scmp.ne.s32.totalorder %s8912_s27, %s8908_s26 }
  0xaf   : > { %p50_p9 = scmp.eq.s32.totalorder %s8916_s28, 0  ;;  %p55_p10 = scmp.ne.s32.totalorder %s8908_s26, %s8904_s25 }
  0xb0   : > { %s9167_s20 = scalar_select %p40_p7, %s8912_s27, %s42_s30  }
  0xb1   : > { %p9169_p11 = por %p50_p9, %p49_p8  ;;  %p9524_p12 = scmp.eq.s32.totalorder %s9036_s14, 0 }
  0xb2   : > { %p331_p1 = scmp.eq.s32.totalorder %s9036_s14, 1  ;;  %p337_p3 = scmp.eq.s32.totalorder %s6506_s21, 1 }
  0xb3   : > { %p9175_p6 = por %p9524_p12, %p55_p10  ;;  %p7432_p4 = scmp.lt.s32.totalorder %s8916_s28, 2 }
  0xb4   : > { %s501_s29 = sand.u32 1, %s8912_s27   ;;  %p9182_p13 = por %p331_p1, %p49_p8 }
  0xb5   : > { %s9525_s17 = scalar_select %p9175_p6, 1, 0 }
  0xb6   : > { %s9526_s1 = scalar_select %p9182_p13, 1, 0 }
  0xb7   : > { %p9186_p0 = por %p337_p3, %p55_p10  ;;  %s6521_s23 = sshll.u32 %s501_s29, 3 }
  0xb8   : > { %s6522_s16 = sshll.u32 %s8916_s28, 7  ;;  %s505_s21 = scalar_lea.vmem [#allocation2], %s6521_s23 }
  0xb9   : > { %s9527_s19 = scalar_select %p9186_p0, 1, 0 }
  0xba   : > { %s9194_s30 = scalar_lea.hbm %s9486_s0, %s6522_s16  ;;  %s512_s2 = sshll.u32 %s505_s21, 4  ;;  %s513_s2 = int_to_ptr.vmem [resolvable:$true] %s512_s2 }
  0xbb   : > { %p9198_p2 = pnand %p7432_p4, %p9169_p11  ;;  %s502_s4 = scalar_lea.sflag [#allocation3], %s501_s29 }
  0xbc   : > { %s8800_s5 = scalar_lea.hbm %s9194_s30, 128  ;;  %s8805_s13 = scalar_lea.hbm %s9486_s0, 256 }
  0xbd   : > { %p8801_p5 = scmp.ne.s32.totalorder %s9194_s30, %s8800_s5  ;;  %p8802_p7 = pneg %p9198_p2 }
  0xbe   : > { %p8806_p10 = scmp.lt.s32.totalorder %s9194_s30, %s9486_s0  ;;  %p8807_p11 = scmp.lt.s32.totalorder %s8805_s13, %s8800_s5 }
  0xbf   : > { %p8803_p8 = pnand %p8802_p7, %p8801_p5 }
  0xc0   : > { %p8808_p12 = por %p8807_p11, %p8806_p10 }
  0xc1   : > { %p8804_p9 = pneg %p8803_p8 }
  0xc3   : > { %p8809_p1 = pnand %p8808_p12, %p8804_p9 }
  0xc5   : > { %8812 = shalt.err (!%p8809_p1)
}
  0xc6   : > { %s8813_s24 = scalar_lea.vmem %s513_s2, 128  ;;  %s8940_s29 = smov [#allocation2]  }
  0xc7   : > { %p8814_p3 = scmp.ne.s32.totalorder %s513_s2, %s8813_s24  ;;  %s8818_s6 = sshll.u32 %s8940_s29, 4  ;;  %s8819_s6 = int_to_ptr.vmem [resolvable:$false] %s8818_s6 }
  0xc8   : > { %s8820_s7 = scalar_lea.vmem %s8819_s6, 256  ;;  %p8821_p5 = scmp.lt.s32.totalorder %s513_s2, %s8819_s6 }
  0xc9   : > { %p8816_p4 = pnand %p8814_p3, %p8802_p7  ;;  %p8822_p8 = scmp.lt.s32.totalorder %s8820_s7, %s8813_s24 }
  0xcb   : > { %p8817_p0 = pneg %p8816_p4  ;;  %p8823_p13 = por %p8822_p8, %p8821_p5 }
  0xcd   : > { %p8824_p6 = pnand %p8823_p13, %p8817_p0 }
  0xcf   : > { %8827 = shalt.err (!%p8824_p6)
}
  0xd0   : > { %7415 = dma.hbm_to_vmem [thread:$0]  (!%p9198_p2), %s9194_s30, 128, %s513_s2, %s502_s4  }
  0xd1   : > { %p9529_p9 = scmp.ne.s32.totalorder %s9513_s15, 0 }
  0xd2   : > { %s9219_s5 = sand.u32 (!%p9529_p9), 1, %s8908_s26   ;;  %p9530_p6 = scmp.ne.s32.totalorder (!%p9529_p9), %s9525_s17, 0 }
  0xd3   : > { %521 = sbr.rel (%p9529_p9) target bundleno = 1885 (0x75d), region = 72  ;;  %s6524_s16 = sshll.u32 (!%p9529_p9), %s9219_s5, 3 }
  0xd4   : > { %s524_s6 = scalar_lea.sflag (!%p9529_p9), [#allocation3], %s9219_s5  ;;  %s9225_s7 = scalar_lea.vmem (!%p9529_p9), [#allocation2], %s6524_s16 }
  0xd8   : > { %8871 = dma.done.wait (%p9530_p6), %s524_s6, 128  }
  0xd9   : > { %8873 = vsyncadd (%p9530_p6), %s524_s6, 4294967168  ;;  %p9531_p13 = scmp.eq.s32.totalorder %s9036_s14, 0 }
  0xdb   : > { %8875 = dma.done.wait (%p9531_p13), [#allocation6], 8320   ;;  %p9532_p0 = pmov %p9531_p13 }
  0xdd   : > { %8877 = vsyncadd (%p9532_p0), [#allocation6], 4294958976  ;;  %p9533_p2 = pmov %p9532_p0 }
  0xde   : > { %p9534_p7 = pmov %p9532_p0 }
  0xdf   : > { %8879 = dma.done.wait (%p9533_p2), [#allocation9], 49248  }
  0xe0   : > { %8881 = vsyncadd (%p9534_p7), [#allocation9], 4294918048  ;;  %p9535_p10 = pmov %p9532_p0 }
  0xe1   : > { %p9536_p11 = pmov %p9532_p0 }
  0xe2   : > { %8883 = dma.done.wait (%p9535_p10), [#allocation12], 24640  }
  0xe3   : > { %8885 = vsyncadd (%p9536_p11), [#allocation12], 4294942656  ;;  %p9537_p12 = pmov %p9532_p0 }
  0xe4   : > { %p9538_p1 = pmov %p9532_p0 }
  0xe5   : > { %8887 = dma.done.wait (%p9537_p12), [#allocation15], 8224  }
  0xe6   : > { %8889 = vsyncadd (%p9538_p1), [#allocation15], 4294959072  ;;  %p9539_p3 = pmov %p9532_p0 }
  0xe7   : > { %p9540_p4 = pmov %p9532_p0 }
  0xe8   : > { %8891 = dma.done.wait (%p9539_p3), [#allocation18], 2064  }
  0xe9   : > { %8893 = vsyncadd (%p9540_p4), [#allocation18], 4294965232  ;;  %p9541_p5 = pmov %p9532_p0 }
  0xea   : > { %p9542_p8 = pmov %p9532_p0 }
  0xeb   : > { %8895 = dma.done.wait (%p9541_p5), [#allocation21], 1040  }
  0xec   : > { %8897 = vsyncadd (%p9542_p8), [#allocation21], 4294966256  ;;  %v8941_v0 = vmov 0   ;;  %v677_v1 = vld [vmem:[#allocation5 + $0x1c0] sm:$0xff]  ;;  %v678_v3 = vld [vmem:[#allocation5 + $0x1c8] sm:$0xff]  ;;  %s7269_s2 = sshll.u32 %s9036_s14, 7 }
  0xed   : > { %1079 = vmatprep.mubr.bf16.mxu0 %v8941_v0  ;;  %1120 = vmatprep.mubr.bf16.mxu1 %v8941_v0  ;;  %v681_v2 = vld [vmem:[#allocation5 + $0x1e0] sm:$0xff]  ;;  %v682_v5 = vld [vmem:[#allocation5 + $0x1e8] sm:$0xff]  ;;  %v679_v62 = vld [vmem:[#allocation5 + $0x1d0] sm:$0xff]  ;;  %s617_s3 = scalar_lea.vmem [#allocation23], %s6524_s16  ;;  %s9543_s30 = sld [smem:[#allocation39_spill]] }
  0xee   : > { %v6595_v4 = vcombine.high %v677_v1, %v681_v2  ;;  %v6594_v6 = vcombine.low %v677_v1, %v681_v2  ;;  %v669_v7 = vld [vmem:[#allocation5 + $0x180] sm:$0xff]  ;;  %v6597_v9 = vcombine.high %v678_v3, %v682_v5  ;;  %v6596_v10 = vcombine.low %v678_v3, %v682_v5  ;;  %v670_v12 = vld [vmem:[#allocation5 + $0x188] sm:$0xff]  ;;  %v683_v1 = vld [vmem:[#allocation5 + $0x1f0] sm:$0xff]  ;;  %s6322_s4 = sshll.u32 %s617_s3, 4  ;;  %s6309_s13 = scalar_lea.sflag [#allocation4], %s9219_s5  ;;  %s9445_s4 = int_to_ptr.vmem [resolvable:$true] %s6322_s4 }
  0xef   : > { %v673_v8 = vld [vmem:[#allocation5 + $0x1a0] sm:$0xff]  ;;  %v674_v13 = vld [vmem:[#allocation5 + $0x1a8] sm:$0xff]  ;;  %v680_v2 = vld [vmem:[#allocation5 + $0x1d8] sm:$0xff]  ;;  %s8828_s14 = scalar_lea.vmem %s9445_s4, 128  ;;  %p9544_p6 = scmp.ne.s32.totalorder %s9526_s1, 0 }
  0xf0   : > { %v6587_v11 = vcombine.high %v669_v7, %v673_v8  ;;  %v661_v14 = vld [vmem:[#allocation5 + $0x140] sm:$0xff]  ;;  %1047 = vmatprep.subr.bf16.mxu0 %v6595_v4  ;;  %v6589_v15 = vcombine.high %v670_v12, %v674_v13  ;;  %v662_v17 = vld [vmem:[#allocation5 + $0x148] sm:$0xff]  ;;  %1088 = vmatprep.subr.bf16.mxu1 %v6597_v9  ;;  %v6586_v19 = vcombine.low %v669_v7, %v673_v8  ;;  %v684_v3 = vld [vmem:[#allocation5 + $0x1f8] sm:$0xff]  ;;  %p8829_p9 = scmp.ne.s32.totalorder %s9445_s4, %s8828_s14  ;;  %s8944_s23 = smov [#allocation23]  }
  0xf1   : > { %v665_v16 = vld [vmem:[#allocation5 + $0x160] sm:$0xff]  ;;  %v666_v18 = vld [vmem:[#allocation5 + $0x168] sm:$0xff]  ;;  %1048 = vmatpush1.bf16.msra.mxu0 %v6594_v6  ;;  %1089 = vmatpush1.bf16.msra.mxu1 %v6596_v10  ;;  %v6588_v20 = vcombine.low %v670_v12, %v674_v13  ;;  %v619_v5 = vld [vmem:[%s9225_s7] sm:$0xff]  ;;  %v6599_v7 = vcombine.high %v679_v62, %v683_v1  ;;  %v6601_v9 = vcombine.high %v680_v2, %v684_v3  ;;  %s8832_s21 = sshll.u32 %s8944_s23, 4  ;;  %s8833_s21 = int_to_ptr.vmem [resolvable:$false] %s8832_s21 }
  0xf2   : > { %1049 = vmatprep.subr.bf16.mxu0 %v6587_v11  ;;  %v6579_v21 = vcombine.high %v661_v14, %v665_v16  ;;  %1090 = vmatprep.subr.bf16.mxu1 %v6589_v15  ;;  %v6581_v22 = vcombine.high %v662_v17, %v666_v18  ;;  %v653_v23 = vld [vmem:[#allocation5 + $0x100] sm:$0xff]  ;;  %v654_v25 = vld [vmem:[#allocation5 + $0x108] sm:$0xff]  ;;  %v6578_v27 = vcombine.low %v661_v14, %v665_v16  ;;  %v671_v8 = vld [vmem:[#allocation5 + $0x190] sm:$0xff]  ;;  %p8830_p13 = pnand %p8829_p9, %p9544_p6  ;;  %s8834_s24 = scalar_lea.vmem %s8833_s21, 256 }
  0xf3   : > { %v657_v24 = vld [vmem:[#allocation5 + $0x120] sm:$0xff]  ;;  %v658_v26 = vld [vmem:[#allocation5 + $0x128] sm:$0xff]  ;;  %v6580_v28 = vcombine.low %v662_v17, %v666_v18  ;;  %v675_v10 = vld [vmem:[#allocation5 + $0x1b0] sm:$0xff]  ;;  %v9258_v12 = vpack.c.bf16 %v619_v5, %v619_v5  ;;  %v6598_v14 = vcombine.low %v679_v62, %v683_v1  ;;  %v6600_v15 = vcombine.low %v680_v2, %v684_v3  ;;  %s9443_s22 = scalar_lea.hbm %s9543_s30, %s7269_s2  ;;  %p8835_p2 = scmp.lt.s32.totalorder %s9445_s4, %s8833_s21 }
  0xf4   : > { %v6571_v29 = vcombine.high %v653_v23, %v657_v24  ;;  %v6573_v30 = vcombine.high %v654_v25, %v658_v26  ;;  %v645_v31 = vld [vmem:[#allocation5 + $0xc0] sm:$0xff]  ;;  %v646_v33 = vld [vmem:[#allocation5 + $0xc8] sm:$0xff]  ;;  %v6570_v35 = vcombine.low %v653_v23, %v657_v24  ;;  %v6572_v36 = vcombine.low %v654_v25, %v658_v26  ;;  %v672_v11 = vld [vmem:[#allocation5 + $0x198] sm:$0xff]  ;;  %p8831_p0 = pneg %p8830_p13  ;;  %p8836_p7 = scmp.lt.s32.totalorder %s8834_s24, %s8828_s14 }
  0xf5   : > { %1050 = vmatpush1.bf16.msra.mxu0 %v6586_v19  ;;  %1091 = vmatpush1.bf16.msra.mxu1 %v6588_v20  ;;  %v649_v32 = vld [vmem:[#allocation5 + $0xe0] sm:$0xff]  ;;  %v650_v34 = vld [vmem:[#allocation5 + $0xe8] sm:$0xff]  ;;  %v676_v13 = vld [vmem:[#allocation5 + $0x1b8] sm:$0xff]  ;;  %v6591_v16 = vcombine.high %v671_v8, %v675_v10 }
  0xf6   : > { %1051 = vmatprep.subr.bf16.mxu0 %v6579_v21  ;;  %1092 = vmatprep.subr.bf16.mxu1 %v6581_v22  ;;  %v6563_v37 = vcombine.high %v645_v31, %v649_v32  ;;  %v6565_v38 = vcombine.high %v646_v33, %v650_v34  ;;  %v637_v39 = vld [vmem:[#allocation5 + $0x80] sm:$0xff]  ;;  %v638_v41 = vld [vmem:[#allocation5 + $0x88] sm:$0xff]  ;;  %v6562_v43 = vcombine.low %v645_v31, %v649_v32  ;;  %v663_v17 = vld [vmem:[#allocation5 + $0x150] sm:$0xff]  ;;  %p8837_p10 = por %p8836_p7, %p8835_p2 }
  0xf7   : > { %v641_v40 = vld [vmem:[#allocation5 + $0xa0] sm:$0xff]  ;;  %v642_v42 = vld [vmem:[#allocation5 + $0xa8] sm:$0xff]  ;;  %v6564_v44 = vcombine.low %v646_v33, %v650_v34  ;;  %v6593_v18 = vcombine.high %v672_v11, %v676_v13  ;;  %v667_v19 = vld [vmem:[#allocation5 + $0x170] sm:$0xff]  ;;  %v6590_v22 = vcombine.low %v671_v8, %v675_v10  ;;  %v6592_v23 = vcombine.low %v672_v11, %v676_v13 }
  0xf8   : > { %v6555_v45 = vcombine.high %v637_v39, %v641_v40  ;;  %v6557_v46 = vcombine.high %v638_v41, %v642_v42  ;;  %v629_v47 = vld [vmem:[#allocation5 + $0x40] sm:$0xff]  ;;  %v630_v49 = vld [vmem:[#allocation5 + $0x48] sm:$0xff]  ;;  %v6554_v51 = vcombine.low %v637_v39, %v641_v40  ;;  %v6556_v52 = vcombine.low %v638_v41, %v642_v42  ;;  %v664_v20 = vld [vmem:[#allocation5 + $0x158] sm:$0xff]  ;;  %p8838_p11 = pnand %p8837_p10, %p8831_p0 }
  0xf9   : > { %1052 = vmatpush1.bf16.msra.mxu0 %v6578_v27  ;;  %1093 = vmatpush1.bf16.msra.mxu1 %v6580_v28  ;;  %v633_v48 = vld [vmem:[#allocation5 + $0x60] sm:$0xff]  ;;  %v634_v50 = vld [vmem:[#allocation5 + $0x68] sm:$0xff]  ;;  %v668_v21 = vld [vmem:[#allocation5 + $0x178] sm:$0xff]  ;;  %v6583_v24 = vcombine.high %v663_v17, %v667_v19 }
  0xfa   : > { %1053 = vmatprep.subr.bf16.mxu0 %v6571_v29  ;;  %1094 = vmatprep.subr.bf16.mxu1 %v6573_v30  ;;  %v6547_v53 = vcombine.high %v629_v47, %v633_v48  ;;  %v621_v54 = vld [vmem:[#allocation5] sm:$0xff]  ;;  %v6549_v55 = vcombine.high %v630_v49, %v634_v50  ;;  %v622_v57 = vld [vmem:[#allocation5 + $0x8] sm:$0xff]  ;;  %v6546_v59 = vcombine.low %v629_v47, %v633_v48  ;;  %v655_v25 = vld [vmem:[#allocation5 + $0x110] sm:$0xff] }
  0xfb   : > { %v625_v56 = vld [vmem:[#allocation5 + $0x20] sm:$0xff]  ;;  %v626_v58 = vld [vmem:[#allocation5 + $0x28] sm:$0xff]  ;;  %v6548_v60 = vcombine.low %v630_v49, %v634_v50  ;;  %v6585_v26 = vcombine.high %v664_v20, %v668_v21  ;;  %v659_v27 = vld [vmem:[#allocation5 + $0x130] sm:$0xff]  ;;  %v6582_v30 = vcombine.low %v663_v17, %v667_v19  ;;  %v6584_v31 = vcombine.low %v664_v20, %v668_v21 }
  0xfc   : > { %v6539_v61 = vcombine.high %v621_v54, %v625_v56  ;;  %v6541_v63 = vcombine.high %v622_v57, %v626_v58  ;;  %v6538_v4 = vcombine.low %v621_v54, %v625_v56  ;;  %v6540_v6 = vcombine.low %v622_v57, %v626_v58  ;;  %v656_v28 = vld [vmem:[#allocation5 + $0x118] sm:$0xff]  ;;  %v647_v33 = vld [vmem:[#allocation5 + $0xd0] sm:$0xff]  ;;  %v7511_v8 = vld [vmem:[#allocation8 + $0x124] ss:$24 sps:$4 sm:$0xff]  }
  0xfd   : > { %1054 = vmatpush1.bf16.msra.mxu0 %v6570_v35  ;;  %1095 = vmatpush1.bf16.msra.mxu1 %v6572_v36  ;;  %v660_v29 = vld [vmem:[#allocation5 + $0x138] sm:$0xff]  ;;  %v6575_v32 = vcombine.high %v655_v25, %v659_v27  ;;  %v651_v35 = vld [vmem:[#allocation5 + $0xf0] sm:$0xff]  ;;  %v7509_v10 = vld [vmem:[#allocation8 + $0x120] ss:$24 sps:$4 sm:$0xff]  }
  0xfe   : > { %1055 = vmatprep.subr.bf16.mxu0 %v6563_v37  ;;  %1096 = vmatprep.subr.bf16.mxu1 %v6565_v38  ;;  %v6577_v34 = vcombine.high %v656_v28, %v660_v29  ;;  %v648_v36 = vld [vmem:[#allocation5 + $0xd8] sm:$0xff]  ;;  %v6574_v38 = vcombine.low %v655_v25, %v659_v27  ;;  %v6576_v39 = vcombine.low %v656_v28, %v660_v29  ;;  %v639_v41 = vld [vmem:[#allocation5 + $0x90] sm:$0xff]  ;;  %v7512_v11 = vld [vmem:[#allocation8 + $0x420] ss:$24 sps:$4 sm:$0xff]  }
  0xff   : > { %v652_v37 = vld [vmem:[#allocation5 + $0xf8] sm:$0xff]  ;;  %v6567_v40 = vcombine.high %v647_v33, %v651_v35  ;;  %v643_v42 = vld [vmem:[#allocation5 + $0xb0] sm:$0xff]  ;;  %v7523_v17 = vld [vmem:[#allocation8 + $0xc4] ss:$24 sps:$4 sm:$0xff]  }
 0x100   : > { %v6559_v47 = vcombine.high %v639_v41, %v643_v42  ;;  %v631_v48 = vld [vmem:[#allocation5 + $0x50] sm:$0xff]  ;;  %v7521_v19 = vld [vmem:[#allocation8 + $0xc0] ss:$24 sps:$4 sm:$0xff]   ;;  %v7538_v25 = vld [vmem:[#allocation8 + $0x364] ss:$24 sps:$4 sm:$0xff]  }
 0x101   : > { %1056 = vmatpush1.bf16.msra.mxu0 %v6562_v43  ;;  %1097 = vmatpush1.bf16.msra.mxu1 %v6564_v44  ;;  %v640_v43 = vld [vmem:[#allocation5 + $0x98] sm:$0xff]  ;;  %v635_v50 = vld [vmem:[#allocation5 + $0x70] sm:$0xff]  ;;  %v7524_v20 = vld [vmem:[#allocation8 + $0x3c0] ss:$24 sps:$4 sm:$0xff]  }
 0x102   : > { %1057 = vmatprep.subr.bf16.mxu0 %v6555_v45  ;;  %1098 = vmatprep.subr.bf16.mxu1 %v6557_v46  ;;  %v644_v44 = vld [vmem:[#allocation5 + $0xb8] sm:$0xff]  ;;  %v6566_v45 = vcombine.low %v647_v33, %v651_v35  ;;  %v6568_v46 = vcombine.low %v648_v36, %v652_v37  ;;  %v623_v56 = vld [vmem:[#allocation5 + $0x10] sm:$0xff]  ;;  %v7536_v27 = vld [vmem:[#allocation8 + $0x360] ss:$24 sps:$4 sm:$0xff]  }
 0x103   : > { %v6561_v49 = vcombine.high %v640_v43, %v644_v44  ;;  %v6560_v54 = vcombine.low %v640_v43, %v644_v44  ;;  %v627_v58 = vld [vmem:[#allocation5 + $0x30] sm:$0xff]  ;;  %v7550_v33 = vld [vmem:[#allocation8 + $0x304] ss:$24 sps:$4 sm:$0xff]   ;;  %v7548_v35 = vld [vmem:[#allocation8 + $0x300] ss:$24 sps:$4 sm:$0xff]  }
 0x104   : > { %v7505_v2 = vld [vmem:[#allocation8 + $0x154] ss:$24 sps:$4 sm:$0xff]   ;;  %v6542_v3 = vcombine.low %v623_v56, %v627_v58 }
 0x105   : > { %1058 = vmatpush1.bf16.msra.mxu0 %v6554_v51  ;;  %1099 = vmatpush1.bf16.msra.mxu1 %v6556_v52  ;;  %v632_v51 = vld [vmem:[#allocation5 + $0x58] sm:$0xff] }
 0x106   : > { %1059 = vmatprep.subr.bf16.mxu0 %v6547_v53  ;;  %1100 = vmatprep.subr.bf16.mxu1 %v6549_v55  ;;  %v636_v52 = vld [vmem:[#allocation5 + $0x78] sm:$0xff]  ;;  %v6558_v53 = vcombine.low %v639_v41, %v643_v42  ;;  %v6551_v55 = vcombine.high %v631_v48, %v635_v50  ;;  %v7562_v41 = vld [vmem:[#allocation8 + $0x5a4] ss:$24 sps:$4 sm:$0xff]   ;;  %v7560_v42 = vld [vmem:[#allocation8 + $0x5a0] ss:$24 sps:$4 sm:$0xff]  }
 0x107   : > { %v6553_v57 = vcombine.high %v632_v51, %v636_v52  ;;  %v6552_v62 = vcombine.low %v632_v51, %v636_v52  ;;  %v7517_v13 = vld [vmem:[#allocation8 + $0xf4] ss:$24 sps:$4 sm:$0xff]  }
 0x108   : > { %v7529_v21 = vld [vmem:[#allocation8 + $0x94] ss:$24 sps:$4 sm:$0xff]  }
 0x109   : > { %1060 = vmatpush1.bf16.msra.mxu0 %v6546_v59  ;;  %1101 = vmatpush1.bf16.msra.mxu1 %v6548_v60  ;;  %v624_v59 = vld [vmem:[#allocation5 + $0x18] sm:$0xff] }
 0x10a   : > { %1061 = vmatprep.subr.bf16.mxu0 %v6539_v61  ;;  %1102 = vmatprep.subr.bf16.mxu1 %v6541_v63  ;;  %v628_v60 = vld [vmem:[#allocation5 + $0x38] sm:$0xff]  ;;  %v6550_v61 = vcombine.low %v631_v48, %v635_v50  ;;  %v6543_v63 = vcombine.high %v623_v56, %v627_v58  ;;  %v7574_v48 = vld [vmem:[#allocation8 + $0x544] ss:$24 sps:$4 sm:$0xff]   ;;  %v7572_v50 = vld [vmem:[#allocation8 + $0x540] ss:$24 sps:$4 sm:$0xff]  }
 0x10b   : > { %v6545_v1 = vcombine.high %v624_v59, %v628_v60  ;;  %v6544_v5 = vcombine.low %v624_v59, %v628_v60  ;;  %v7541_v28 = vld [vmem:[#allocation8 + $0x34] ss:$24 sps:$4 sm:$0xff]   ;;  %v7586_v56 = vld [vmem:[#allocation8 + $0x4e4] ss:$24 sps:$4 sm:$0xff]   ;;  %v7584_v58 = vld [vmem:[#allocation8 + $0x4e0] ss:$24 sps:$4 sm:$0xff]  }
 0x10c   : > { %v7544_v29 = vld [vmem:[#allocation8 + $0x334] ss:$24 sps:$4 sm:$0xff]  }
 0x10d   : > { %1062 = vmatpush1.bf16.msra.mxu0 %v6538_v4  ;;  %1103 = vmatpush1.bf16.msra.mxu1 %v6540_v6  ;;  %v7508_v4 = vld [vmem:[#allocation8 + $0x454] ss:$24 sps:$4 sm:$0xff]   ;;  %v7503_v6 = vld [vmem:[#allocation8 + $0x150] ss:$24 sps:$4 sm:$0xff]  }
 0x10e   : > { %1129 = vmatprep.subr.bf16.mxu0 %v6599_v7  ;;  %1170 = vmatprep.subr.bf16.mxu1 %v6601_v9  ;;  %v7506_v7 = vld [vmem:[#allocation8 + $0x450] ss:$24 sps:$4 sm:$0xff]   ;;  %v7514_v9 = vld [vmem:[#allocation8 + $0x424] ss:$24 sps:$4 sm:$0xff]   ;;  %v7565_v43 = vld [vmem:[#allocation8 + $0x274] ss:$24 sps:$4 sm:$0xff]  }
 0x10f   : > { %v7568_v44 = vld [vmem:[#allocation8 + $0x574] ss:$24 sps:$4 sm:$0xff]  }
 0x110   : > { %1080 = vmatmul.mubr.bf16.vlgmr.msra.gmra.mxu0 %v9258_v12  ;;  %1121 = vmatmul.mubr.bf16.vlgmr.msra.gmra.mxu1 %v9258_v12  ;;  %v7577_v51 = vld [vmem:[#allocation8 + $0x214] ss:$24 sps:$4 sm:$0xff]  }
 0x111   : > { %1130 = vmatpush1.bf16.msra.mxu0 %v6598_v14  ;;  %1171 = vmatpush1.bf16.msra.mxu1 %v6600_v15  ;;  %v7520_v14 = vld [vmem:[#allocation8 + $0x3f4] ss:$24 sps:$4 sm:$0xff]   ;;  %v7515_v15 = vld [vmem:[#allocation8 + $0xf0] ss:$24 sps:$4 sm:$0xff]  }
 0x112   : > { %1131 = vmatprep.subr.bf16.mxu0 %v6591_v16  ;;  %1172 = vmatprep.subr.bf16.mxu1 %v6593_v18  ;;  %v7518_v16 = vld [vmem:[#allocation8 + $0x3f0] ss:$24 sps:$4 sm:$0xff]   ;;  %v7526_v18 = vld [vmem:[#allocation8 + $0x3c4] ss:$24 sps:$4 sm:$0xff]   ;;  %v7580_v52 = vld [vmem:[#allocation8 + $0x514] ss:$24 sps:$4 sm:$0xff]  }
 0x113   : > { %1161 = vmatprep.mubr.bf16.mxu0 %v8941_v0  ;;  %1202 = vmatprep.mubr.bf16.mxu1 %v8941_v0  ;;  %v6569_v0 = vcombine.high %v648_v36, %v652_v37  ;;  %v7553_v36 = vld [vmem:[#allocation8 + $0x2d4] ss:$24 sps:$4 sm:$0xff]  }
 0x114   : > { %v7556_v37 = vld [vmem:[#allocation8 + $0x5d4] ss:$24 sps:$4 sm:$0xff]  }
 0x115   : > { %1132 = vmatpush1.bf16.msra.mxu0 %v6590_v22  ;;  %1173 = vmatpush1.bf16.msra.mxu1 %v6592_v23  ;;  %v7532_v22 = vld [vmem:[#allocation8 + $0x394] ss:$24 sps:$4 sm:$0xff]   ;;  %v7530_v23 = vld [vmem:[#allocation8 + $0x390] ss:$24 sps:$4 sm:$0xff]  }
 0x116   : > { %1133 = vmatprep.subr.bf16.mxu0 %v6583_v24  ;;  %1174 = vmatprep.subr.bf16.mxu1 %v6585_v26  ;;  %v7535_v24 = vld [vmem:[#allocation8 + $0x64] ss:$24 sps:$4 sm:$0xff]   ;;  %v7533_v26 = vld [vmem:[#allocation8 + $0x60] ss:$24 sps:$4 sm:$0xff]   ;;  %v7589_v59 = vld [vmem:[#allocation8 + $0x1b4] ss:$24 sps:$4 sm:$0xff]  }
 0x117   : > { %v7592_v60 = vld [vmem:[#allocation8 + $0x4b4] ss:$24 sps:$4 sm:$0xff]  }
 0x119   : > { %1134 = vmatpush1.bf16.msra.mxu0 %v6582_v30  ;;  %1175 = vmatpush1.bf16.msra.mxu1 %v6584_v31  ;;  %v7539_v30 = vld [vmem:[#allocation8 + $0x30] ss:$24 sps:$4 sm:$0xff]  }
 0x11a   : > { %1135 = vmatprep.subr.bf16.mxu0 %v6575_v32  ;;  %1176 = vmatprep.subr.bf16.mxu1 %v6577_v34  ;;  %v7542_v31 = vld [vmem:[#allocation8 + $0x330] ss:$24 sps:$4 sm:$0xff]   ;;  %v7547_v32 = vld [vmem:[#allocation8 + $0x4] ss:$24 sps:$4 sm:$0xff]   ;;  %v7545_v34 = vld [vmem:[#allocation8] ss:$24 sps:$4 sm:$0xff]  }
 0x11d   : > { %1136 = vmatpush1.bf16.msra.mxu0 %v6574_v38  ;;  %1177 = vmatpush1.bf16.msra.mxu1 %v6576_v39  ;;  %v7551_v38 = vld [vmem:[#allocation8 + $0x2d0] ss:$24 sps:$4 sm:$0xff]  }
 0x11e   : > { %1137 = vmatprep.subr.bf16.mxu0 %v6567_v40  ;;  %1178 = vmatprep.subr.bf16.mxu1 %v6569_v0  ;;  %v7554_v39 = vld [vmem:[#allocation8 + $0x5d0] ss:$24 sps:$4 sm:$0xff]   ;;  %v7559_v40 = vld [vmem:[#allocation8 + $0x2a4] ss:$24 sps:$4 sm:$0xff]   ;;  %v7557_v0 = vld [vmem:[#allocation8 + $0x2a0] ss:$24 sps:$4 sm:$0xff]  }
 0x121   : > { %1138 = vmatpush1.bf16.msra.mxu0 %v6566_v45  ;;  %1179 = vmatpush1.bf16.msra.mxu1 %v6568_v46  ;;  %v7563_v45 = vld [vmem:[#allocation8 + $0x270] ss:$24 sps:$4 sm:$0xff]  }
 0x122   : > { %1139 = vmatprep.subr.bf16.mxu0 %v6559_v47  ;;  %1180 = vmatprep.subr.bf16.mxu1 %v6561_v49  ;;  %v7566_v46 = vld [vmem:[#allocation8 + $0x570] ss:$24 sps:$4 sm:$0xff]   ;;  %v7571_v47 = vld [vmem:[#allocation8 + $0x244] ss:$24 sps:$4 sm:$0xff]   ;;  %v7569_v49 = vld [vmem:[#allocation8 + $0x240] ss:$24 sps:$4 sm:$0xff]  }
 0x125   : > { %1140 = vmatpush1.bf16.msra.mxu0 %v6558_v53  ;;  %1181 = vmatpush1.bf16.msra.mxu1 %v6560_v54  ;;  %v7575_v53 = vld [vmem:[#allocation8 + $0x210] ss:$24 sps:$4 sm:$0xff]  }
 0x126   : > { %1141 = vmatprep.subr.bf16.mxu0 %v6551_v55  ;;  %1182 = vmatprep.subr.bf16.mxu1 %v6553_v57  ;;  %v7578_v54 = vld [vmem:[#allocation8 + $0x510] ss:$24 sps:$4 sm:$0xff]   ;;  %v7583_v55 = vld [vmem:[#allocation8 + $0x1e4] ss:$24 sps:$4 sm:$0xff]   ;;  %v7581_v57 = vld [vmem:[#allocation8 + $0x1e0] ss:$24 sps:$4 sm:$0xff]  }
 0x129   : > { %1142 = vmatpush1.bf16.msra.mxu0 %v6550_v61  ;;  %1183 = vmatpush1.bf16.msra.mxu1 %v6552_v62  ;;  %v7587_v61 = vld [vmem:[#allocation8 + $0x1b0] ss:$24 sps:$4 sm:$0xff]  }
 0x12a   : > { %1143 = vmatprep.subr.bf16.mxu0 %v6543_v63  ;;  %1184 = vmatprep.subr.bf16.mxu1 %v6545_v1  ;;  %v7590_v62 = vld [vmem:[#allocation8 + $0x4b0] ss:$24 sps:$4 sm:$0xff]   ;;  %v7595_v63 = vld [vmem:[#allocation8 + $0x184] ss:$24 sps:$4 sm:$0xff]  }
 0x12b   : > { %v7598_v1 = vld [vmem:[#allocation8 + $0x484] ss:$24 sps:$4 sm:$0xff]  }
 0x12d   : > { %1144 = vmatpush1.bf16.msra.mxu0 %v6542_v3  ;;  %1185 = vmatpush1.bf16.msra.mxu1 %v6544_v5  ;;  %v7596_v3 = vld [vmem:[#allocation8 + $0x480] ss:$24 sps:$4 sm:$0xff]   ;;  %v7604_v5 = vld [vmem:[#allocation8 + $0xa54] ss:$24 sps:$4 sm:$0xff]  }
 0x12e   : > { %3579 = vmatprep.subr.bf16.mxu0 %v7505_v2  ;;  %3620 = vmatprep.subr.bf16.mxu1 %v7508_v4  ;;  %v7593_v2 = vld [vmem:[#allocation8 + $0x180] ss:$24 sps:$4 sm:$0xff]   ;;  %v7601_v4 = vld [vmem:[#allocation8 + $0x754] ss:$24 sps:$4 sm:$0xff]  }
 0x130   : > { %1162 = vmatmul.mubr.bf16.vlgmr.msra.gmra.mxu0 %v9258_v12  ;;  %1203 = vmatmul.mubr.bf16.vlgmr.msra.gmra.mxu1 %v9258_v12  ;;  %v7527_v12 = vld [vmem:[#allocation8 + $0x90] ss:$24 sps:$4 sm:$0xff]  }
 0x131   : > { %3580 = vmatpush1.bf16.msra.mxu0 %v7503_v6  ;;  %3621 = vmatpush1.bf16.msra.mxu1 %v7506_v7  ;;  %v687_v6 = vlaneseq }
 0x132   : > { %3581 = vmatprep.subr.bf16.mxu0 %v7511_v8  ;;  %3622 = vmatprep.subr.bf16.mxu1 %v7514_v9  ;;  %v9271_v9 = vld [vmem:[#allocation7] sm:$0xff] }
 0x133   : > { %v9266_v7 = vshrl.u32 %v687_v6, 7 }
 0x135   : > { %3582 = vmatpush1.bf16.msra.mxu0 %v7509_v10  ;;  %3623 = vmatpush1.bf16.msra.mxu1 %v7512_v11  ;;  %v9269_v8 = vsub.s32 0, %v9266_v7  ;;  %v9274_v10 = vsub.s32 2, %v9266_v7  ;;  %v9277_v11 = vsub.s32 1, %v9266_v7 }
 0x136   : > { %3583 = vmatprep.subr.bf16.mxu0 %v7517_v13  ;;  %3624 = vmatprep.subr.bf16.mxu1 %v7520_v14  ;;  %v9280_v13 = vsub.s32 3, %v9266_v7 }
 0x137   : > { %v690_v14 = vrot.slane %v9271_v9, %v9269_v8 }
 0x139   : > { %3584 = vmatpush1.bf16.msra.mxu0 %v7515_v15  ;;  %3625 = vmatpush1.bf16.msra.mxu1 %v7518_v16  ;;  %v698_v15 = vrot.slane %v9271_v9, %v9274_v10  ;;  %v694_v16 = vrot.slane %v9271_v9, %v9277_v11 }
 0x13a   : > { %3585 = vmatprep.subr.bf16.mxu0 %v7523_v17  ;;  %3626 = vmatprep.subr.bf16.mxu1 %v7526_v18  ;;  %v702_v18 = vrot.slane %v9271_v9, %v9280_v13 }
 0x13d   : > { %3586 = vmatpush1.bf16.msra.mxu0 %v7521_v19  ;;  %3627 = vmatpush1.bf16.msra.mxu1 %v7524_v20 }
 0x13e   : > { %3587 = vmatprep.subr.bf16.mxu0 %v7529_v21  ;;  %3628 = vmatprep.subr.bf16.mxu1 %v7532_v22 }
 0x141   : > { %3588 = vmatpush1.bf16.msra.mxu0 %v7527_v12  ;;  %3629 = vmatpush1.bf16.msra.mxu1 %v7530_v23 }
 0x142   : > { %3589 = vmatprep.subr.bf16.mxu0 %v7535_v24  ;;  %3630 = vmatprep.subr.bf16.mxu1 %v7538_v25 }
 0x145   : > { %3590 = vmatpush1.bf16.msra.mxu0 %v7533_v26  ;;  %3631 = vmatpush1.bf16.msra.mxu1 %v7536_v27 }
 0x146   : > { %3591 = vmatprep.subr.bf16.mxu0 %v7541_v28  ;;  %3632 = vmatprep.subr.bf16.mxu1 %v7544_v29 }
 0x149   : > { %3592 = vmatpush1.bf16.msra.mxu0 %v7539_v30  ;;  %3633 = vmatpush1.bf16.msra.mxu1 %v7542_v31 }
 0x14a   : > { %3593 = vmatprep.subr.bf16.mxu0 %v7547_v32  ;;  %3634 = vmatprep.subr.bf16.mxu1 %v7550_v33  ;;  %v7599_v33 = vld [vmem:[#allocation8 + $0x750] ss:$24 sps:$4 sm:$0xff]  }
 0x14d   : > { %3594 = vmatpush1.bf16.msra.mxu0 %v7545_v34  ;;  %3635 = vmatpush1.bf16.msra.mxu1 %v7548_v35 }
 0x14e   : > { %3595 = vmatprep.subr.bf16.mxu0 %v7553_v36  ;;  %3636 = vmatprep.subr.bf16.mxu1 %v7556_v37  ;;  %v7602_v37 = vld [vmem:[#allocation8 + $0xa50] ss:$24 sps:$4 sm:$0xff]  }
 0x151   : > { %3596 = vmatpush2.bf16.msra.mxu0 %v7551_v38  ;;  %3637 = vmatpush2.bf16.msra.mxu1 %v7554_v39  ;;  %v7607_v38 = vld [vmem:[#allocation8 + $0x724] ss:$24 sps:$4 sm:$0xff]  }
 0x152   : > { %3597 = vmatprep.subr.bf16.mxu0 %v7559_v40  ;;  %3638 = vmatprep.subr.bf16.mxu1 %v7562_v41  ;;  %v7610_v41 = vld [vmem:[#allocation8 + $0xa24] ss:$24 sps:$4 sm:$0xff]  }
 0x155   : > { %3598 = vmatpush2.bf16.msra.mxu0 %v7557_v0  ;;  %3639 = vmatpush2.bf16.msra.mxu1 %v7560_v42 }
 0x156   : > { %3599 = vmatprep.subr.bf16.mxu0 %v7565_v43  ;;  %3640 = vmatprep.subr.bf16.mxu1 %v7568_v44  ;;  %v7605_v44 = vld [vmem:[#allocation8 + $0x720] ss:$24 sps:$4 sm:$0xff]  }
 0x159   : > { %3600 = vmatpush2.bf16.msra.mxu0 %v7563_v45  ;;  %3641 = vmatpush2.bf16.msra.mxu1 %v7566_v46  ;;  %v7608_v45 = vld [vmem:[#allocation8 + $0xa20] ss:$24 sps:$4 sm:$0xff]   ;;  %v7613_v46 = vld [vmem:[#allocation8 + $0x6f4] ss:$24 sps:$4 sm:$0xff]  }
 0x15a   : > { %3601 = vmatprep.subr.bf16.mxu0 %v7571_v47  ;;  %3642 = vmatprep.subr.bf16.mxu1 %v7574_v48  ;;  %v7616_v47 = vld [vmem:[#allocation8 + $0x9f4] ss:$24 sps:$4 sm:$0xff]   ;;  %v7611_v48 = vld [vmem:[#allocation8 + $0x6f0] ss:$24 sps:$4 sm:$0xff]  }
 0x15d   : > { %3602 = vmatpush2.bf16.msra.mxu0 %v7569_v49  ;;  %3643 = vmatpush2.bf16.msra.mxu1 %v7572_v50  ;;  %v7614_v49 = vld [vmem:[#allocation8 + $0x9f0] ss:$24 sps:$4 sm:$0xff]   ;;  %v7619_v50 = vld [vmem:[#allocation8 + $0x6c4] ss:$24 sps:$4 sm:$0xff]  }
 0x15e   : > { %3603 = vmatprep.subr.bf16.mxu0 %v7577_v51  ;;  %3644 = vmatprep.subr.bf16.mxu1 %v7580_v52  ;;  %v7617_v51 = vld [vmem:[#allocation8 + $0x6c0] ss:$24 sps:$4 sm:$0xff]   ;;  %v7622_v52 = vld [vmem:[#allocation8 + $0x9c4] ss:$24 sps:$4 sm:$0xff]  }
 0x161   : > { %3604 = vmatpush2.bf16.msra.mxu0 %v7575_v53  ;;  %3645 = vmatpush2.bf16.msra.mxu1 %v7578_v54  ;;  %v7620_v53 = vld [vmem:[#allocation8 + $0x9c0] ss:$24 sps:$4 sm:$0xff]   ;;  %v7625_v54 = vld [vmem:[#allocation8 + $0x694] ss:$24 sps:$4 sm:$0xff]  }
 0x162   : > { %3605 = vmatprep.subr.bf16.mxu0 %v7583_v55  ;;  %3646 = vmatprep.subr.bf16.mxu1 %v7586_v56  ;;  %v7623_v55 = vld [vmem:[#allocation8 + $0x690] ss:$24 sps:$4 sm:$0xff]   ;;  %v7628_v56 = vld [vmem:[#allocation8 + $0x994] ss:$24 sps:$4 sm:$0xff]  }
 0x165   : > { %3606 = vmatpush2.bf16.msra.mxu0 %v7581_v57  ;;  %3647 = vmatpush2.bf16.msra.mxu1 %v7584_v58  ;;  %v7626_v57 = vld [vmem:[#allocation8 + $0x990] ss:$24 sps:$4 sm:$0xff]   ;;  %v7631_v58 = vld [vmem:[#allocation8 + $0x664] ss:$24 sps:$4 sm:$0xff]  }
 0x166   : > { %3607 = vmatprep.subr.bf16.mxu0 %v7589_v59  ;;  %3648 = vmatprep.subr.bf16.mxu1 %v7592_v60  ;;  %v7629_v59 = vld [vmem:[#allocation8 + $0x660] ss:$24 sps:$4 sm:$0xff]   ;;  %v7634_v60 = vld [vmem:[#allocation8 + $0x964] ss:$24 sps:$4 sm:$0xff]  }
 0x169   : > { %3608 = vmatpush2.bf16.msra.mxu0 %v7587_v61  ;;  %3649 = vmatpush2.bf16.msra.mxu1 %v7590_v62  ;;  %v709_v61 = vsub.s32 5, %v9266_v7  ;;  %v717_v62 = vsub.s32 7, %v9266_v7 }
 0x16a   : > { %3609 = vmatprep.subr.bf16.mxu0 %v7595_v63  ;;  %3650 = vmatprep.subr.bf16.mxu1 %v7598_v1  ;;  %v7632_v63 = vld [vmem:[#allocation8 + $0x960] ss:$24 sps:$4 sm:$0xff]   ;;  %v7637_v1 = vld [vmem:[#allocation8 + $0x634] ss:$24 sps:$4 sm:$0xff]  }
 0x16b   : > { %v718_v6 = vrot.slane %v9271_v9, %v717_v62  ;;  %v7682_v62 = vld [vmem:[#allocation8 + $0xae4] ss:$24 sps:$4 sm:$0xff]  }
 0x16d   : > { %3610 = vmatpush2.bf16.msra.mxu0 %v7593_v2  ;;  %3651 = vmatpush2.bf16.msra.mxu1 %v7596_v3  ;;  %v7635_v2 = vld [vmem:[#allocation8 + $0x630] ss:$24 sps:$4 sm:$0xff]   ;;  %v7640_v3 = vld [vmem:[#allocation8 + $0x934] ss:$24 sps:$4 sm:$0xff]  }
 0x16e   : > { %3661 = vmatprep.subr.bf16.mxu0 %v7601_v4  ;;  %3702 = vmatprep.subr.bf16.mxu1 %v7604_v5  ;;  %v710_v4 = vrot.slane %v9271_v9, %v709_v61 }
 0x1d0   : > { %v1081_v17 = vpop.f32.mrf.mxu0  ;;  %v1122_v20 = vpop.f32.mrf.mxu1 }
 0x1d1   : > { %v1082_v19 = vadd.f32 %v1081_v17, %v690_v14  ;;  %v1123_v21 = vadd.f32 %v1122_v20, %v698_v15  ;;  %v7638_v14 = vld [vmem:[#allocation8 + $0x930] ss:$24 sps:$4 sm:$0xff]   ;;  %v7643_v15 = vld [vmem:[#allocation8 + $0x604] ss:$24 sps:$4 sm:$0xff]   ;;  %v7641_v17 = vld [vmem:[#allocation8 + $0x600] ss:$24 sps:$4 sm:$0xff]  }
 0x1d2   : > { %v1083_v22 = vpop.f32.mrf.mxu0  ;;  %v1124_v24 = vpop.f32.mrf.mxu1  ;;  %v7644_v20 = vld [vmem:[#allocation8 + $0x900] ss:$24 sps:$4 sm:$0xff]  }
 0x1d3   : > { %vm1211_vm0 = vcmp.gt.f32.partialorder %v1082_v19, 0.0  ;;  %v1219_v12 = vmul.f32 0.01, %v1082_v19  ;;  %v1084_v23 = vadd.f32 %v1083_v22, %v694_v16  ;;  %vm1213_vm1 = vcmp.gt.f32.partialorder %v1123_v21, 0.0 }
 0x1d4   : > { %v1221_v25 = vmul.f32 0.01, %v1123_v21  ;;  %v1125_v26 = vadd.f32 %v1124_v24, %v702_v18  ;;  %v1085_v27 = vpop.f32.mrf.mxu0  ;;  %v1126_v29 = vpop.f32.mrf.mxu1  ;;  %v7646_v18 = vld [vmem:[#allocation8 + $0x904] ss:$24 sps:$4 sm:$0xff]   ;;  %v7649_v24 = vld [vmem:[#allocation8 + $0x8d4] ss:$24 sps:$4 sm:$0xff]  }
 0x1d5   : > { %vm1212_vm2 = vcmp.gt.f32.partialorder %v1084_v23, 0.0  ;;  %v1220_v28 = vmul.f32 0.01, %v1084_v23  ;;  %v1227_v30 = vsel %vm1211_vm0, %v1082_v19, %v1219_v12  ;;  %v7652_v27 = vld [vmem:[#allocation8 + $0xbd4] ss:$24 sps:$4 sm:$0xff]  }
 0x1d6   : > { %vm1214_vm3 = vcmp.gt.f32.partialorder %v1125_v26, 0.0  ;;  %v1222_v31 = vmul.f32 0.01, %v1125_v26  ;;  %v1086_v32 = vpop.f32.mrf.mxu0  ;;  %v1229_v34 = vsel %vm1213_vm1, %v1123_v21, %v1221_v25  ;;  %v1127_v35 = vpop.f32.mrf.mxu1  ;;  %v9292_v0 = vpack.c.bf16 %v1227_v30, %v1227_v30  ;;  %v7647_v30 = vld [vmem:[#allocation8 + $0x8d0] ss:$24 sps:$4 sm:$0xff]  }
 0x1d7   : > { %v1228_v36 = vsel %vm1212_vm2, %v1084_v23, %v1220_v28  ;;  %v9296_v43 = vpack.c.bf16 %v1229_v34, %v1229_v34  ;;  %v7650_v35 = vld [vmem:[#allocation8 + $0xbd0] ss:$24 sps:$4 sm:$0xff]  }
 0x1d8   : > { %v9290_v39 = vpack.c.bf16 %v1228_v36, %v1228_v36  ;;  %v1230_v40 = vsel %vm1214_vm3, %v1125_v26, %v1222_v31  ;;  %v7655_v36 = vld [vmem:[#allocation8 + $0x8a4] ss:$24 sps:$4 sm:$0xff]  }
 0x1d9   : > { %v9294_v42 = vpack.c.bf16 %v1230_v40, %v1230_v40  ;;  %v7658_v40 = vld [vmem:[#allocation8 + $0xba4] ss:$24 sps:$4 sm:$0xff]  }
 0x1da   : > { %3611 = vmatprep.mubr.bf16.mxu0 %v9290_v39 }
 0x1db   : > { %3652 = vmatprep.mubr.bf16.mxu1 %v9294_v42  ;;  %3612 = vmatmul.mubr.bf16.vlgmr.msra.gmra.mxu0 %v9292_v0 }
 0x1dc   : > { %3653 = vmatmul.mubr.bf16.vlgmr.msra.gmra.mxu1 %v9296_v43  ;;  %3662 = vmatpush1.bf16.msra.mxu0 %v7599_v33 }
 0x1dd   : > { %3703 = vmatpush1.bf16.msra.mxu1 %v7602_v37  ;;  %3663 = vmatprep.subr.bf16.mxu0 %v7607_v38  ;;  %v7653_v38 = vld [vmem:[#allocation8 + $0x8a0] ss:$24 sps:$4 sm:$0xff]  }
 0x1de   : > { %3704 = vmatprep.subr.bf16.mxu1 %v7610_v41  ;;  %v7656_v41 = vld [vmem:[#allocation8 + $0xba0] ss:$24 sps:$4 sm:$0xff]  }
 0x1e0   : > { %3664 = vmatpush1.bf16.msra.mxu0 %v7605_v44  ;;  %v7661_v44 = vld [vmem:[#allocation8 + $0x874] ss:$24 sps:$4 sm:$0xff]  }
 0x1e1   : > { %3705 = vmatpush1.bf16.msra.mxu1 %v7608_v45  ;;  %3665 = vmatprep.subr.bf16.mxu0 %v7613_v46  ;;  %v7659_v45 = vld [vmem:[#allocation8 + $0x870] ss:$24 sps:$4 sm:$0xff]   ;;  %v7664_v46 = vld [vmem:[#allocation8 + $0xb74] ss:$24 sps:$4 sm:$0xff]  }
 0x1e2   : > { %3706 = vmatprep.subr.bf16.mxu1 %v7616_v47  ;;  %v7662_v47 = vld [vmem:[#allocation8 + $0xb70] ss:$24 sps:$4 sm:$0xff]  }
 0x1e4   : > { %3666 = vmatpush1.bf16.msra.mxu0 %v7611_v48  ;;  %v7667_v48 = vld [vmem:[#allocation8 + $0x844] ss:$24 sps:$4 sm:$0xff]  }
 0x1e5   : > { %3707 = vmatpush1.bf16.msra.mxu1 %v7614_v49  ;;  %3667 = vmatprep.subr.bf16.mxu0 %v7619_v50  ;;  %v7665_v49 = vld [vmem:[#allocation8 + $0x840] ss:$24 sps:$4 sm:$0xff]   ;;  %v7670_v50 = vld [vmem:[#allocation8 + $0xb44] ss:$24 sps:$4 sm:$0xff]  }
 0x1e6   : > { %3708 = vmatprep.subr.bf16.mxu1 %v7622_v52  ;;  %v7673_v52 = vld [vmem:[#allocation8 + $0x814] ss:$24 sps:$4 sm:$0xff]  }
 0x1e8   : > { %3668 = vmatpush1.bf16.msra.mxu0 %v7617_v51  ;;  %v7668_v51 = vld [vmem:[#allocation8 + $0xb40] ss:$24 sps:$4 sm:$0xff]  }
 0x1e9   : > { %3709 = vmatpush1.bf16.msra.mxu1 %v7620_v53  ;;  %3669 = vmatprep.subr.bf16.mxu0 %v7625_v54  ;;  %v705_v53 = vsub.s32 4, %v9266_v7  ;;  %v7671_v54 = vld [vmem:[#allocation8 + $0x810] ss:$24 sps:$4 sm:$0xff]  }
 0x1ea   : > { %3710 = vmatprep.subr.bf16.mxu1 %v7628_v56  ;;  %v713_v56 = vsub.s32 6, %v9266_v7 }
 0x1ec   : > { %3670 = vmatpush1.bf16.msra.mxu0 %v7623_v55  ;;  %v7676_v55 = vld [vmem:[#allocation8 + $0xb14] ss:$24 sps:$4 sm:$0xff]  }
 0x1ed   : > { %3711 = vmatpush1.bf16.msra.mxu1 %v7626_v57  ;;  %3671 = vmatprep.subr.bf16.mxu0 %v7631_v58  ;;  %v7674_v57 = vld [vmem:[#allocation8 + $0xb10] ss:$24 sps:$4 sm:$0xff]   ;;  %v7679_v58 = vld [vmem:[#allocation8 + $0x7e4] ss:$24 sps:$4 sm:$0xff]  }
 0x1ee   : > { %3712 = vmatprep.subr.bf16.mxu1 %v7634_v60  ;;  %v7677_v60 = vld [vmem:[#allocation8 + $0x7e0] ss:$24 sps:$4 sm:$0xff]  }
 0x1f0   : > { %3672 = vmatpush1.bf16.msra.mxu0 %v7629_v59  ;;  %v9307_v5 = vpop.f32.mrf.mxu0  ;;  %v9310_v16 = vpop.f32.mrf.mxu1  ;;  %v706_v59 = vrot.slane %v9271_v9, %v705_v53 }
 0x1f1   : > { %3713 = vmatpush1.bf16.msra.mxu1 %v7632_v63  ;;  %3673 = vmatprep.subr.bf16.mxu0 %v7637_v1  ;;  %v714_v63 = vrot.slane %v9271_v9, %v713_v56  ;;  %v7680_v1 = vld [vmem:[#allocation8 + $0xae0] ss:$24 sps:$4 sm:$0xff]  }
 0x1f2   : > { %3714 = vmatprep.subr.bf16.mxu1 %v7640_v3  ;;  %v1165_v19 = vpop.f32.mrf.mxu0  ;;  %v1206_v22 = vpop.f32.mrf.mxu1  ;;  %v1164_v3 = vadd.f32 %v9307_v5, %v706_v59  ;;  %v7689_v9 = vld [vmem:[#allocation8 + $0x780] ss:$24 sps:$4 sm:$0xff]   ;;  %v7742_v59 = vld [vmem:[#allocation8 + $0x30c] ss:$24 sps:$4 sm:$0xff]  }
 0x1f3   : > { %v1166_v21 = vadd.f32 %v1165_v19, %v710_v4  ;;  %v1207_v23 = vadd.f32 %v1206_v22, %v718_v6  ;;  %v7683_v4 = vld [vmem:[#allocation8 + $0x7b0] ss:$24 sps:$4 sm:$0xff]   ;;  %v7688_v6 = vld [vmem:[#allocation8 + $0xab4] ss:$24 sps:$4 sm:$0xff]   ;;  %v7694_v19 = vld [vmem:[#allocation8 + $0xa84] ss:$24 sps:$4 sm:$0xff]  }
 0x1f4   : > { %3674 = vmatpush1.bf16.msra.mxu0 %v7635_v2  ;;  %v1167_v12 = vpop.f32.mrf.mxu0  ;;  %v1208_v26 = vpop.f32.mrf.mxu1  ;;  %v7685_v2 = vld [vmem:[#allocation8 + $0x7b4] ss:$24 sps:$4 sm:$0xff]   ;;  %vm1215_vm6 = vcmp.gt.f32.partialorder %v1164_v3, 0.0  ;;  %v7692_v5 = vld [vmem:[#allocation8 + $0xa80] ss:$24 sps:$4 sm:$0xff]  }
 0x1f5   : > { %3715 = vmatpush1.bf16.msra.mxu1 %v7638_v14  ;;  %3675 = vmatprep.subr.bf16.mxu0 %v7643_v15  ;;  %vm1216_vm4 = vcmp.gt.f32.partialorder %v1166_v21, 0.0  ;;  %v1224_v25 = vmul.f32 0.01, %v1166_v21  ;;  %vm1218_vm5 = vcmp.gt.f32.partialorder %v1207_v23, 0.0  ;;  %v1226_v28 = vmul.f32 0.01, %v1207_v23 }
 0x1f6   : > { %3716 = vmatprep.subr.bf16.mxu1 %v7646_v18  ;;  %v1168_v29 = vpop.f32.mrf.mxu0  ;;  %v1209_v31 = vpop.f32.mrf.mxu1  ;;  %v1205_v14 = vadd.f32 %v9310_v16, %v714_v63  ;;  %v7686_v15 = vld [vmem:[#allocation8 + $0xab0] ss:$24 sps:$4 sm:$0xff]   ;;  %v1223_v18 = vmul.f32 0.01, %v1164_v3  ;;  %v7700_v22 = vld [vmem:[#allocation8 + $0x45c] ss:$24 sps:$4 sm:$0xff]  }
 0x1f7   : > { %v1232_v32 = vsel %vm1216_vm4, %v1166_v21, %v1224_v25  ;;  %v1234_v34 = vsel %vm1218_vm5, %v1207_v23, %v1226_v28  ;;  %v7697_v21 = vld [vmem:[#allocation8 + $0x15c] ss:$24 sps:$4 sm:$0xff]   ;;  %v7695_v16 = vld [vmem:[#allocation8 + $0x158] ss:$24 sps:$4 sm:$0xff]   ;;  %v7703_v25 = vld [vmem:[#allocation8 + $0x12c] ss:$24 sps:$4 sm:$0xff]  }
 0x1f8   : > { %3676 = vmatpush1.bf16.msra.mxu0 %v7641_v17  ;;  %v9312_v33 = vpack.c.bf16 %v1232_v32, %v1232_v32  ;;  %v9314_v37 = vpack.c.bf16 %v1234_v34, %v1234_v34  ;;  %v7691_v17 = vld [vmem:[#allocation8 + $0x784] ss:$24 sps:$4 sm:$0xff]   ;;  %vm1217_vm7 = vcmp.gt.f32.partialorder %v1205_v14, 0.0  ;;  %v1231_v12 = vsel %vm1215_vm6, %v1164_v3, %v1223_v18  ;;  %v7701_v28 = vld [vmem:[#allocation8 + $0x128] ss:$24 sps:$4 sm:$0xff]  }
 0x1f9   : > { %3717 = vmatpush1.bf16.msra.mxu1 %v7644_v20  ;;  %3677 = vmatprep.subr.bf16.mxu0 %v7649_v24  ;;  %v1225_v20 = vmul.f32 0.01, %v1205_v14  ;;  %v7698_v24 = vld [vmem:[#allocation8 + $0x458] ss:$24 sps:$4 sm:$0xff]   ;;  %v9326_v26 = vpack.c.bf16 %v1231_v12, %v1231_v12  ;;  %v7706_v29 = vld [vmem:[#allocation8 + $0x42c] ss:$24 sps:$4 sm:$0xff]  }
 0x1fa   : > { %3718 = vmatprep.subr.bf16.mxu1 %v7652_v27  ;;  %3693 = vmatprep.mubr.bf16.mxu0 %v9312_v33  ;;  %v7709_v31 = vld [vmem:[#allocation8 + $0xfc] ss:$24 sps:$4 sm:$0xff]   ;;  %v7707_v34 = vld [vmem:[#allocation8 + $0xf8] ss:$24 sps:$4 sm:$0xff]   ;;  %v7751_v3 = vld [vmem:[#allocation8 + $0x2ac] ss:$24 sps:$4 sm:$0xff]  }
 0x1fb   : > { %3734 = vmatprep.mubr.bf16.mxu1 %v9314_v37  ;;  %v1233_v23 = vsel %vm1217_vm7, %v1205_v14, %v1225_v20  ;;  %v7712_v32 = vld [vmem:[#allocation8 + $0x3fc] ss:$24 sps:$4 sm:$0xff]   ;;  %v7734_v56 = vld [vmem:[#allocation8 + $0x338] ss:$24 sps:$4 sm:$0xff]   ;;  %v7752_v14 = vld [vmem:[#allocation8 + $0x5a8] ss:$24 sps:$4 sm:$0xff]  }
 0x1fc   : > { %3678 = vmatpush2.bf16.msra.mxu0 %v7647_v30  ;;  %v9328_v27 = vpack.c.bf16 %v1233_v23, %v1233_v23  ;;  %v7704_v30 = vld [vmem:[#allocation8 + $0x428] ss:$24 sps:$4 sm:$0xff]   ;;  %v7743_v63 = vld [vmem:[#allocation8 + $0x2d8] ss:$24 sps:$4 sm:$0xff]   ;;  %v7760_v18 = vld [vmem:[#allocation8 + $0x57c] ss:$24 sps:$4 sm:$0xff]  }
 0x1fd   : > { %3719 = vmatpush2.bf16.msra.mxu1 %v7650_v35  ;;  %3679 = vmatprep.subr.bf16.mxu0 %v7655_v36  ;;  %v7710_v35 = vld [vmem:[#allocation8 + $0x3f8] ss:$24 sps:$4 sm:$0xff]   ;;  %v7715_v36 = vld [vmem:[#allocation8 + $0xcc] ss:$24 sps:$4 sm:$0xff]   ;;  %v7761_v20 = vld [vmem:[#allocation8 + $0x248] ss:$24 sps:$4 sm:$0xff]  }
 0x1fe   : > { %3720 = vmatprep.subr.bf16.mxu1 %v7658_v40  ;;  %v7713_v40 = vld [vmem:[#allocation8 + $0xc8] ss:$24 sps:$4 sm:$0xff]   ;;  %v7767_v12 = vld [vmem:[#allocation8 + $0x218] ss:$24 sps:$4 sm:$0xff]   ;;  %vm8943_vm4 = vmmov 0  }
 0x1ff   : > { %v7770_v23 = vld [vmem:[#allocation8 + $0x518] ss:$24 sps:$4 sm:$0xff]  }
 0x200   : > { %3680 = vmatpush2.bf16.msra.mxu0 %v7653_v38  ;;  %v7718_v38 = vld [vmem:[#allocation8 + $0x3cc] ss:$24 sps:$4 sm:$0xff]  }
 0x201   : > { %3721 = vmatpush2.bf16.msra.mxu1 %v7656_v41  ;;  %3681 = vmatprep.subr.bf16.mxu0 %v7661_v44  ;;  %v7716_v41 = vld [vmem:[#allocation8 + $0x3c8] ss:$24 sps:$4 sm:$0xff]   ;;  %v7721_v44 = vld [vmem:[#allocation8 + $0x9c] ss:$24 sps:$4 sm:$0xff]  }
 0x202   : > { %3722 = vmatprep.subr.bf16.mxu1 %v7664_v46  ;;  %v7724_v46 = vld [vmem:[#allocation8 + $0x39c] ss:$24 sps:$4 sm:$0xff]  }
 0x204   : > { %3682 = vmatpush2.bf16.msra.mxu0 %v7659_v45  ;;  %v7719_v45 = vld [vmem:[#allocation8 + $0x98] ss:$24 sps:$4 sm:$0xff]  }
 0x205   : > { %3723 = vmatpush2.bf16.msra.mxu1 %v7662_v47  ;;  %3683 = vmatprep.subr.bf16.mxu0 %v7667_v48  ;;  %v7722_v47 = vld [vmem:[#allocation8 + $0x398] ss:$24 sps:$4 sm:$0xff]   ;;  %v7727_v48 = vld [vmem:[#allocation8 + $0x6c] ss:$24 sps:$4 sm:$0xff]  }
 0x206   : > { %3724 = vmatprep.subr.bf16.mxu1 %v7670_v50  ;;  %v7730_v50 = vld [vmem:[#allocation8 + $0x36c] ss:$24 sps:$4 sm:$0xff]  }
 0x208   : > { %3684 = vmatpush2.bf16.msra.mxu0 %v7665_v49  ;;  %v7725_v49 = vld [vmem:[#allocation8 + $0x68] ss:$24 sps:$4 sm:$0xff]  }
 0x209   : > { %3725 = vmatpush2.bf16.msra.mxu1 %v7668_v51  ;;  %3685 = vmatprep.subr.bf16.mxu0 %v7673_v52  ;;  %v7728_v51 = vld [vmem:[#allocation8 + $0x368] ss:$24 sps:$4 sm:$0xff]   ;;  %v7733_v52 = vld [vmem:[#allocation8 + $0x3c] ss:$24 sps:$4 sm:$0xff]  }
 0x20a   : > { %3726 = vmatprep.subr.bf16.mxu1 %v7676_v55  ;;  %v7736_v55 = vld [vmem:[#allocation8 + $0x33c] ss:$24 sps:$4 sm:$0xff]  }
 0x20c   : > { %3686 = vmatpush2.bf16.msra.mxu0 %v7671_v54  ;;  %v7731_v54 = vld [vmem:[#allocation8 + $0x38] ss:$24 sps:$4 sm:$0xff]  }
 0x20d   : > { %3727 = vmatpush2.bf16.msra.mxu1 %v7674_v57  ;;  %3687 = vmatprep.subr.bf16.mxu0 %v7679_v58  ;;  %v7739_v57 = vld [vmem:[#allocation8 + $0xc] ss:$24 sps:$4 sm:$0xff]   ;;  %v7737_v58 = vld [vmem:[#allocation8 + $0x8] ss:$24 sps:$4 sm:$0xff]  }
 0x20e   : > { %3728 = vmatprep.subr.bf16.mxu1 %v7682_v62  ;;  %v7745_v62 = vld [vmem:[#allocation8 + $0x2dc] ss:$24 sps:$4 sm:$0xff]  }
 0x210   : > { %3688 = vmatpush2.bf16.msra.mxu0 %v7677_v60  ;;  %v7740_v60 = vld [vmem:[#allocation8 + $0x308] ss:$24 sps:$4 sm:$0xff]  }
 0x211   : > { %3729 = vmatpush2.bf16.msra.mxu1 %v7680_v1  ;;  %3689 = vmatprep.subr.bf16.mxu0 %v7685_v2  ;;  %v7748_v1 = vld [vmem:[#allocation8 + $0x5dc] ss:$24 sps:$4 sm:$0xff]   ;;  %v7746_v2 = vld [vmem:[#allocation8 + $0x5d8] ss:$24 sps:$4 sm:$0xff]  }
 0x212   : > { %3730 = vmatprep.subr.bf16.mxu1 %v7688_v6  ;;  %v7754_v6 = vld [vmem:[#allocation8 + $0x5ac] ss:$24 sps:$4 sm:$0xff]  }
 0x214   : > { %3690 = vmatpush2.bf16.msra.mxu0 %v7683_v4  ;;  %v7749_v4 = vld [vmem:[#allocation8 + $0x2a8] ss:$24 sps:$4 sm:$0xff]  }
 0x215   : > { %3731 = vmatpush2.bf16.msra.mxu1 %v7686_v15  ;;  %3691 = vmatprep.subr.bf16.mxu0 %v7691_v17  ;;  %v7757_v15 = vld [vmem:[#allocation8 + $0x27c] ss:$24 sps:$4 sm:$0xff]   ;;  %v7755_v17 = vld [vmem:[#allocation8 + $0x278] ss:$24 sps:$4 sm:$0xff]  }
 0x216   : > { %3732 = vmatprep.subr.bf16.mxu1 %v7694_v19  ;;  %v7763_v19 = vld [vmem:[#allocation8 + $0x24c] ss:$24 sps:$4 sm:$0xff]  }
 0x218   : > { %3692 = vmatpush2.bf16.msra.mxu0 %v7689_v9  ;;  %v7758_v9 = vld [vmem:[#allocation8 + $0x578] ss:$24 sps:$4 sm:$0xff]  }
 0x219   : > { %3733 = vmatpush2.bf16.msra.mxu1 %v7692_v5  ;;  %3743 = vmatprep.subr.bf16.mxu0 %v7697_v21  ;;  %v7766_v5 = vld [vmem:[#allocation8 + $0x54c] ss:$24 sps:$4 sm:$0xff]   ;;  %v7764_v21 = vld [vmem:[#allocation8 + $0x548] ss:$24 sps:$4 sm:$0xff]  }
 0x21a   : > { %3784 = vmatprep.subr.bf16.mxu1 %v7700_v22  ;;  %v7769_v22 = vld [vmem:[#allocation8 + $0x21c] ss:$24 sps:$4 sm:$0xff]  }
 0x21b   : > { %3694 = vmatmul.mubr.bf16.vlgmr.msra.gmra.mxu0 %v9326_v26 }
 0x21c   : > { %3735 = vmatmul.mubr.bf16.vlgmr.msra.gmra.mxu1 %v9328_v27  ;;  %3744 = vmatpush1.bf16.msra.mxu0 %v7695_v16  ;;  %v7772_v16 = vld [vmem:[#allocation8 + $0x51c] ss:$24 sps:$4 sm:$0xff]  }
 0x21d   : > { %3775 = vmatprep.mubr.bf16.mxu0 %v9290_v39  ;;  %3785 = vmatpush1.bf16.msra.mxu1 %v7698_v24  ;;  %v7775_v24 = vld [vmem:[#allocation8 + $0x1ec] ss:$24 sps:$4 sm:$0xff]  }
 0x21e   : > { %3816 = vmatprep.mubr.bf16.mxu1 %v9294_v42  ;;  %3745 = vmatprep.subr.bf16.mxu0 %v7703_v25  ;;  %v7773_v25 = vld [vmem:[#allocation8 + $0x1e8] ss:$24 sps:$4 sm:$0xff]  }
 0x21f   : > { %3786 = vmatprep.subr.bf16.mxu1 %v7706_v29  ;;  %v7776_v29 = vld [vmem:[#allocation8 + $0x4e8] ss:$24 sps:$4 sm:$0xff]  }
 0x220   : > { %3746 = vmatpush1.bf16.msra.mxu0 %v7701_v28  ;;  %v7778_v28 = vld [vmem:[#allocation8 + $0x4ec] ss:$24 sps:$4 sm:$0xff]  }
 0x221   : > { %3787 = vmatpush1.bf16.msra.mxu1 %v7704_v30  ;;  %3747 = vmatprep.subr.bf16.mxu0 %v7709_v31  ;;  %v7781_v30 = vld [vmem:[#allocation8 + $0x1bc] ss:$24 sps:$4 sm:$0xff]   ;;  %v7779_v31 = vld [vmem:[#allocation8 + $0x1b8] ss:$24 sps:$4 sm:$0xff]  }
 0x222   : > { %3788 = vmatprep.subr.bf16.mxu1 %v7712_v32  ;;  %v7784_v32 = vld [vmem:[#allocation8 + $0x4bc] ss:$24 sps:$4 sm:$0xff]  }
 0x224   : > { %3748 = vmatpush1.bf16.msra.mxu0 %v7707_v34  ;;  %v7782_v34 = vld [vmem:[#allocation8 + $0x4b8] ss:$24 sps:$4 sm:$0xff]  }
 0x225   : > { %3789 = vmatpush1.bf16.msra.mxu1 %v7710_v35  ;;  %3749 = vmatprep.subr.bf16.mxu0 %v7715_v36  ;;  %v7787_v35 = vld [vmem:[#allocation8 + $0x18c] ss:$24 sps:$4 sm:$0xff]  }
 0x226   : > { %3790 = vmatprep.subr.bf16.mxu1 %v7718_v38  ;;  %v7790_v36 = vld [vmem:[#allocation8 + $0x48c] ss:$24 sps:$4 sm:$0xff]   ;;  %v7785_v38 = vld [vmem:[#allocation8 + $0x188] ss:$24 sps:$4 sm:$0xff]  }
 0x228   : > { %3750 = vmatpush1.bf16.msra.mxu0 %v7713_v40  ;;  %v7788_v40 = vld [vmem:[#allocation8 + $0x488] ss:$24 sps:$4 sm:$0xff]  }
 0x229   : > { %3791 = vmatpush1.bf16.msra.mxu1 %v7716_v41  ;;  %3751 = vmatprep.subr.bf16.mxu0 %v7721_v44  ;;  %v7793_v41 = vld [vmem:[#allocation8 + $0x75c] ss:$24 sps:$4 sm:$0xff]  }
 0x22a   : > { %3792 = vmatprep.subr.bf16.mxu1 %v7724_v46  ;;  %v7796_v44 = vld [vmem:[#allocation8 + $0xa5c] ss:$24 sps:$4 sm:$0xff]   ;;  %v7794_v46 = vld [vmem:[#allocation8 + $0xa58] ss:$24 sps:$4 sm:$0xff]  }
 0x22c   : > { %3752 = vmatpush1.bf16.msra.mxu0 %v7719_v45  ;;  %v7791_v45 = vld [vmem:[#allocation8 + $0x758] ss:$24 sps:$4 sm:$0xff]  }
 0x22d   : > { %3793 = vmatpush1.bf16.msra.mxu1 %v7722_v47  ;;  %3753 = vmatprep.subr.bf16.mxu0 %v7727_v48  ;;  %v7799_v47 = vld [vmem:[#allocation8 + $0x72c] ss:$24 sps:$4 sm:$0xff]  }
 0x22e   : > { %3794 = vmatprep.subr.bf16.mxu1 %v7730_v50  ;;  %v7802_v48 = vld [vmem:[#allocation8 + $0xa2c] ss:$24 sps:$4 sm:$0xff]   ;;  %v7800_v50 = vld [vmem:[#allocation8 + $0xa28] ss:$24 sps:$4 sm:$0xff]  }
 0x230   : > { %3754 = vmatpush1.bf16.msra.mxu0 %v7725_v49  ;;  %v7797_v49 = vld [vmem:[#allocation8 + $0x728] ss:$24 sps:$4 sm:$0xff]  }
 0x231   : > { %3795 = vmatpush1.bf16.msra.mxu1 %v7728_v51  ;;  %3755 = vmatprep.subr.bf16.mxu0 %v7733_v52  ;;  %v7805_v51 = vld [vmem:[#allocation8 + $0x6fc] ss:$24 sps:$4 sm:$0xff]  }
 0x232   : > { %3796 = vmatprep.subr.bf16.mxu1 %v7736_v55  ;;  %v7808_v52 = vld [vmem:[#allocation8 + $0x9fc] ss:$24 sps:$4 sm:$0xff]   ;;  %v7806_v55 = vld [vmem:[#allocation8 + $0x9f8] ss:$24 sps:$4 sm:$0xff]  }
 0x234   : > { %3756 = vmatpush1.bf16.msra.mxu0 %v7731_v54  ;;  %v7803_v54 = vld [vmem:[#allocation8 + $0x6f8] ss:$24 sps:$4 sm:$0xff]  }
 0x235   : > { %3797 = vmatpush1.bf16.msra.mxu1 %v7734_v56  ;;  %3757 = vmatprep.subr.bf16.mxu0 %v7739_v57  ;;  %v7811_v56 = vld [vmem:[#allocation8 + $0x6cc] ss:$24 sps:$4 sm:$0xff]  }
 0x236   : > { %3798 = vmatprep.subr.bf16.mxu1 %v7742_v59  ;;  %v7814_v57 = vld [vmem:[#allocation8 + $0x9cc] ss:$24 sps:$4 sm:$0xff]   ;;  %v7812_v59 = vld [vmem:[#allocation8 + $0x9c8] ss:$24 sps:$4 sm:$0xff]  }
 0x238   : > { %3758 = vmatpush1.bf16.msra.mxu0 %v7737_v58  ;;  %v7809_v58 = vld [vmem:[#allocation8 + $0x6c8] ss:$24 sps:$4 sm:$0xff]  }
 0x239   : > { %3799 = vmatpush1.bf16.msra.mxu1 %v7740_v60  ;;  %3759 = vmatprep.subr.bf16.mxu0 %v7745_v62  ;;  %v7817_v60 = vld [vmem:[#allocation8 + $0x69c] ss:$24 sps:$4 sm:$0xff]  }
 0x23a   : > { %3800 = vmatprep.subr.bf16.mxu1 %v7748_v1  ;;  %v7820_v62 = vld [vmem:[#allocation8 + $0x99c] ss:$24 sps:$4 sm:$0xff]   ;;  %v7818_v1 = vld [vmem:[#allocation8 + $0x998] ss:$24 sps:$4 sm:$0xff]  }
 0x23c   : > { %3760 = vmatpush2.bf16.msra.mxu0 %v7743_v63  ;;  %v7815_v63 = vld [vmem:[#allocation8 + $0x698] ss:$24 sps:$4 sm:$0xff]  }
 0x23d   : > { %3801 = vmatpush2.bf16.msra.mxu1 %v7746_v2  ;;  %3761 = vmatprep.subr.bf16.mxu0 %v7751_v3  ;;  %v7823_v2 = vld [vmem:[#allocation8 + $0x66c] ss:$24 sps:$4 sm:$0xff]  }
 0x23e   : > { %3802 = vmatprep.subr.bf16.mxu1 %v7754_v6  ;;  %v7826_v3 = vld [vmem:[#allocation8 + $0x96c] ss:$24 sps:$4 sm:$0xff]   ;;  %v7824_v6 = vld [vmem:[#allocation8 + $0x968] ss:$24 sps:$4 sm:$0xff]  }
 0x240   : > { %3762 = vmatpush2.bf16.msra.mxu0 %v7749_v4  ;;  %v7821_v4 = vld [vmem:[#allocation8 + $0x668] ss:$24 sps:$4 sm:$0xff]  }
 0x241   : > { %3803 = vmatpush2.bf16.msra.mxu1 %v7752_v14  ;;  %3763 = vmatprep.subr.bf16.mxu0 %v7757_v15  ;;  %v7829_v14 = vld [vmem:[#allocation8 + $0x63c] ss:$24 sps:$4 sm:$0xff]  }
 0x242   : > { %3804 = vmatprep.subr.bf16.mxu1 %v7760_v18  ;;  %v7832_v15 = vld [vmem:[#allocation8 + $0x93c] ss:$24 sps:$4 sm:$0xff]   ;;  %v7830_v18 = vld [vmem:[#allocation8 + $0x938] ss:$24 sps:$4 sm:$0xff]  }
 0x244   : > { %3764 = vmatpush2.bf16.msra.mxu0 %v7755_v17  ;;  %v7827_v17 = vld [vmem:[#allocation8 + $0x638] ss:$24 sps:$4 sm:$0xff]  }
 0x245   : > { %3805 = vmatpush2.bf16.msra.mxu1 %v7758_v9  ;;  %3765 = vmatprep.subr.bf16.mxu0 %v7763_v19  ;;  %v7835_v9 = vld [vmem:[#allocation8 + $0x60c] ss:$24 sps:$4 sm:$0xff]  }
 0x246   : > { %3806 = vmatprep.subr.bf16.mxu1 %v7766_v5  ;;  %v7838_v19 = vld [vmem:[#allocation8 + $0x90c] ss:$24 sps:$4 sm:$0xff]   ;;  %v7836_v5 = vld [vmem:[#allocation8 + $0x908] ss:$24 sps:$4 sm:$0xff]  }
 0x248   : > { %3766 = vmatpush2.bf16.msra.mxu0 %v7761_v20  ;;  %v7833_v20 = vld [vmem:[#allocation8 + $0x608] ss:$24 sps:$4 sm:$0xff]  }
 0x249   : > { %3807 = vmatpush2.bf16.msra.mxu1 %v7764_v21  ;;  %3767 = vmatprep.subr.bf16.mxu0 %v7769_v22  ;;  %v7841_v21 = vld [vmem:[#allocation8 + $0x8dc] ss:$24 sps:$4 sm:$0xff]  }
 0x24a   : > { %3808 = vmatprep.subr.bf16.mxu1 %v7772_v16  ;;  %v7844_v22 = vld [vmem:[#allocation8 + $0xbdc] ss:$24 sps:$4 sm:$0xff]   ;;  %v7842_v16 = vld [vmem:[#allocation8 + $0xbd8] ss:$24 sps:$4 sm:$0xff]  }
 0x24c   : > { %3768 = vmatpush2.bf16.msra.mxu0 %v7767_v12  ;;  %v7839_v12 = vld [vmem:[#allocation8 + $0x8d8] ss:$24 sps:$4 sm:$0xff]  }
 0x24d   : > { %3809 = vmatpush2.bf16.msra.mxu1 %v7770_v23  ;;  %3769 = vmatprep.subr.bf16.mxu0 %v7775_v24  ;;  %v7847_v23 = vld [vmem:[#allocation8 + $0x8ac] ss:$24 sps:$4 sm:$0xff]  }
 0x24e   : > { %3810 = vmatprep.subr.bf16.mxu1 %v7778_v28  ;;  %v7850_v24 = vld [vmem:[#allocation8 + $0xbac] ss:$24 sps:$4 sm:$0xff]   ;;  %v7848_v28 = vld [vmem:[#allocation8 + $0xba8] ss:$24 sps:$4 sm:$0xff]  }
 0x250   : > { %3770 = vmatpush2.bf16.msra.mxu0 %v7773_v25  ;;  %v7845_v25 = vld [vmem:[#allocation8 + $0x8a8] ss:$24 sps:$4 sm:$0xff]  }
 0x251   : > { %3811 = vmatpush2.bf16.msra.mxu1 %v7776_v29  ;;  %3771 = vmatprep.subr.bf16.mxu0 %v7781_v30  ;;  %v7853_v29 = vld [vmem:[#allocation8 + $0x87c] ss:$24 sps:$4 sm:$0xff]  }
 0x252   : > { %3812 = vmatprep.subr.bf16.mxu1 %v7784_v32  ;;  %v7856_v30 = vld [vmem:[#allocation8 + $0xb7c] ss:$24 sps:$4 sm:$0xff]   ;;  %v7854_v32 = vld [vmem:[#allocation8 + $0xb78] ss:$24 sps:$4 sm:$0xff]  }
 0x254   : > { %3772 = vmatpush2.bf16.msra.mxu0 %v7779_v31  ;;  %v7851_v31 = vld [vmem:[#allocation8 + $0x878] ss:$24 sps:$4 sm:$0xff]  }
 0x255   : > { %3813 = vmatpush2.bf16.msra.mxu1 %v7782_v34  ;;  %3773 = vmatprep.subr.bf16.mxu0 %v7787_v35  ;;  %v7859_v34 = vld [vmem:[#allocation8 + $0x84c] ss:$24 sps:$4 sm:$0xff]  }
 0x256   : > { %3814 = vmatprep.subr.bf16.mxu1 %v7790_v36  ;;  %v7862_v35 = vld [vmem:[#allocation8 + $0xb4c] ss:$24 sps:$4 sm:$0xff]   ;;  %v7857_v36 = vld [vmem:[#allocation8 + $0x848] ss:$24 sps:$4 sm:$0xff]  }
 0x258   : > { %3774 = vmatpush2.bf16.msra.mxu0 %v7785_v38  ;;  %v7860_v38 = vld [vmem:[#allocation8 + $0xb48] ss:$24 sps:$4 sm:$0xff]  }
 0x259   : > { %3815 = vmatpush2.bf16.msra.mxu1 %v7788_v40  ;;  %3825 = vmatprep.subr.bf16.mxu0 %v7793_v41  ;;  %v7865_v40 = vld [vmem:[#allocation8 + $0x81c] ss:$24 sps:$4 sm:$0xff]  }
 0x25a   : > { %3866 = vmatprep.subr.bf16.mxu1 %v7796_v44  ;;  %v7868_v41 = vld [vmem:[#allocation8 + $0xb1c] ss:$24 sps:$4 sm:$0xff]   ;;  %v7863_v44 = vld [vmem:[#allocation8 + $0x818] ss:$24 sps:$4 sm:$0xff]  }
 0x25b   : > { %3776 = vmatmul.mubr.bf16.vlgmr.msra.gmra.mxu0 %v9292_v0 }
 0x25c   : > { %3817 = vmatmul.mubr.bf16.vlgmr.msra.gmra.mxu1 %v9296_v43  ;;  %3826 = vmatpush1.bf16.msra.mxu0 %v7791_v45  ;;  %v7866_v45 = vld [vmem:[#allocation8 + $0xb18] ss:$24 sps:$4 sm:$0xff]  }
 0x25d   : > { %3857 = vmatprep.mubr.bf16.mxu0 %v9312_v33  ;;  %3867 = vmatpush1.bf16.msra.mxu1 %v7794_v46  ;;  %v7871_v46 = vld [vmem:[#allocation8 + $0x7ec] ss:$24 sps:$4 sm:$0xff]  }
 0x25e   : > { %3898 = vmatprep.mubr.bf16.mxu1 %v9314_v37  ;;  %3827 = vmatprep.subr.bf16.mxu0 %v7799_v47  ;;  %v7874_v47 = vld [vmem:[#allocation8 + $0xaec] ss:$24 sps:$4 sm:$0xff]  }
 0x25f   : > { %3868 = vmatprep.subr.bf16.mxu1 %v7802_v48  ;;  %v7869_v48 = vld [vmem:[#allocation8 + $0x7e8] ss:$24 sps:$4 sm:$0xff]  }
 0x260   : > { %3828 = vmatpush1.bf16.msra.mxu0 %v7797_v49  ;;  %v7872_v49 = vld [vmem:[#allocation8 + $0xae8] ss:$24 sps:$4 sm:$0xff]  }
 0x261   : > { %3869 = vmatpush1.bf16.msra.mxu1 %v7800_v50  ;;  %3829 = vmatprep.subr.bf16.mxu0 %v7805_v51  ;;  %v7877_v50 = vld [vmem:[#allocation8 + $0x7bc] ss:$24 sps:$4 sm:$0xff]  }
 0x262   : > { %3870 = vmatprep.subr.bf16.mxu1 %v7808_v52  ;;  %v7880_v51 = vld [vmem:[#allocation8 + $0xabc] ss:$24 sps:$4 sm:$0xff]   ;;  %v7875_v52 = vld [vmem:[#allocation8 + $0x7b8] ss:$24 sps:$4 sm:$0xff]  }
 0x264   : > { %3830 = vmatpush1.bf16.msra.mxu0 %v7803_v54  ;;  %v7878_v54 = vld [vmem:[#allocation8 + $0xab8] ss:$24 sps:$4 sm:$0xff]  }
 0x265   : > { %3871 = vmatpush1.bf16.msra.mxu1 %v7806_v55  ;;  %3831 = vmatprep.subr.bf16.mxu0 %v7811_v56  ;;  %v7883_v55 = vld [vmem:[#allocation8 + $0x78c] ss:$24 sps:$4 sm:$0xff]  }
 0x266   : > { %3872 = vmatprep.subr.bf16.mxu1 %v7814_v57  ;;  %v7886_v56 = vld [vmem:[#allocation8 + $0xa8c] ss:$24 sps:$4 sm:$0xff]   ;;  %v7881_v57 = vld [vmem:[#allocation8 + $0x788] ss:$24 sps:$4 sm:$0xff]  }
 0x268   : > { %3832 = vmatpush1.bf16.msra.mxu0 %v7809_v58  ;;  %v7884_v58 = vld [vmem:[#allocation8 + $0xa88] ss:$24 sps:$4 sm:$0xff]  }
 0x269   : > { %3873 = vmatpush1.bf16.msra.mxu1 %v7812_v59  ;;  %3833 = vmatprep.subr.bf16.mxu0 %v7817_v60  ;;  %v7889_v59 = vld [vmem:[#allocation8 + $0x164] ss:$24 sps:$4 sm:$0xff]  }
 0x26a   : > { %3874 = vmatprep.subr.bf16.mxu1 %v7820_v62  ;;  %v9338_v60 = vld [vmem:[#allocation10] sm:$0x3f] }
 0x26b   : > { %v7892_v62 = vld [vmem:[#allocation8 + $0x464] ss:$24 sps:$4 sm:$0xff]  }
 0x26c   : > { %3834 = vmatpush1.bf16.msra.mxu0 %v7815_v63  ;;  %v7887_v63 = vld [vmem:[#allocation8 + $0x160] ss:$24 sps:$4 sm:$0xff]  }
 0x26d   : > { %3875 = vmatpush1.bf16.msra.mxu1 %v7818_v1  ;;  %3835 = vmatprep.subr.bf16.mxu0 %v7823_v2  ;;  %v1632_v1 = vrot.slane %v9338_v60, %v9269_v8  ;;  %v7890_v2 = vld [vmem:[#allocation8 + $0x460] ss:$24 sps:$4 sm:$0xff]  }
 0x26e   : > { %3876 = vmatprep.subr.bf16.mxu1 %v7826_v3  ;;  %v1636_v3 = vrot.slane %v9338_v60, %v9277_v11 }
 0x270   : > { %3836 = vmatpush1.bf16.msra.mxu0 %v7821_v4  ;;  %v7895_v4 = vld [vmem:[#allocation8 + $0x134] ss:$24 sps:$4 sm:$0xff]  }
 0x271   : > { %3877 = vmatpush1.bf16.msra.mxu1 %v7824_v6  ;;  %3837 = vmatprep.subr.bf16.mxu0 %v7829_v14  ;;  %v7898_v14 = vld [vmem:[#allocation8 + $0x434] ss:$24 sps:$4 sm:$0xff]  }
 0x272   : > { %3878 = vmatprep.subr.bf16.mxu1 %v7832_v15 }
 0x274   : > { %3838 = vmatpush1.bf16.msra.mxu0 %v7827_v17 }
 0x275   : > { %3879 = vmatpush1.bf16.msra.mxu1 %v7830_v18  ;;  %3839 = vmatprep.subr.bf16.mxu0 %v7835_v9  ;;  %v7893_v18 = vld [vmem:[#allocation8 + $0x130] ss:$24 sps:$4 sm:$0xff]  }
 0x276   : > { %3880 = vmatprep.subr.bf16.mxu1 %v7838_v19  ;;  %v7896_v19 = vld [vmem:[#allocation8 + $0x430] ss:$24 sps:$4 sm:$0xff]  }
 0x278   : > { %3840 = vmatpush1.bf16.msra.mxu0 %v7833_v20  ;;  %v7901_v20 = vld [vmem:[#allocation8 + $0x104] ss:$24 sps:$4 sm:$0xff]  }
 0x279   : > { %3881 = vmatpush1.bf16.msra.mxu1 %v7836_v5  ;;  %3841 = vmatprep.subr.bf16.mxu0 %v7841_v21 }
 0x27a   : > { %3882 = vmatprep.subr.bf16.mxu1 %v7844_v22 }
 0x27c   : > { %3842 = vmatpush2.bf16.msra.mxu0 %v7839_v12  ;;  %v7904_v12 = vld [vmem:[#allocation8 + $0x404] ss:$24 sps:$4 sm:$0xff]  }
 0x27d   : > { %3883 = vmatpush2.bf16.msra.mxu1 %v7842_v16  ;;  %3843 = vmatprep.subr.bf16.mxu0 %v7847_v23 }
 0x27e   : > { %3884 = vmatprep.subr.bf16.mxu1 %v7850_v24 }
 0x280   : > { %3844 = vmatpush2.bf16.msra.mxu0 %v7845_v25  ;;  %v7899_v25 = vld [vmem:[#allocation8 + $0x100] ss:$24 sps:$4 sm:$0xff]  }
 0x281   : > { %3885 = vmatpush2.bf16.msra.mxu1 %v7848_v28  ;;  %3845 = vmatprep.subr.bf16.mxu0 %v7853_v29  ;;  %v7902_v28 = vld [vmem:[#allocation8 + $0x400] ss:$24 sps:$4 sm:$0xff]   ;;  %v7907_v29 = vld [vmem:[#allocation8 + $0xd4] ss:$24 sps:$4 sm:$0xff]  }
 0x282   : > { %3886 = vmatprep.subr.bf16.mxu1 %v7856_v30 }
 0x284   : > { %3846 = vmatpush2.bf16.msra.mxu0 %v7851_v31  ;;  %v7910_v31 = vld [vmem:[#allocation8 + $0x3d4] ss:$24 sps:$4 sm:$0xff]  }
 0x285   : > { %3887 = vmatpush2.bf16.msra.mxu1 %v7854_v32  ;;  %3847 = vmatprep.subr.bf16.mxu0 %v7859_v34  ;;  %v7908_v32 = vld [vmem:[#allocation8 + $0x3d0] ss:$24 sps:$4 sm:$0xff]   ;;  %v7913_v34 = vld [vmem:[#allocation8 + $0xa4] ss:$24 sps:$4 sm:$0xff]  }
 0x286   : > { %3888 = vmatprep.subr.bf16.mxu1 %v7862_v35  ;;  %v7916_v35 = vld [vmem:[#allocation8 + $0x3a4] ss:$24 sps:$4 sm:$0xff]  }
 0x288   : > { %3848 = vmatpush2.bf16.msra.mxu0 %v7857_v36  ;;  %v7911_v36 = vld [vmem:[#allocation8 + $0xa0] ss:$24 sps:$4 sm:$0xff]  }
 0x289   : > { %3889 = vmatpush2.bf16.msra.mxu1 %v7860_v38  ;;  %3849 = vmatprep.subr.bf16.mxu0 %v7865_v40  ;;  %v7914_v38 = vld [vmem:[#allocation8 + $0x3a0] ss:$24 sps:$4 sm:$0xff]   ;;  %v7919_v40 = vld [vmem:[#allocation8 + $0x74] ss:$24 sps:$4 sm:$0xff]  }
 0x28a   : > { %3890 = vmatprep.subr.bf16.mxu1 %v7868_v41  ;;  %v7922_v41 = vld [vmem:[#allocation8 + $0x374] ss:$24 sps:$4 sm:$0xff]  }
 0x28c   : > { %3850 = vmatpush2.bf16.msra.mxu0 %v7863_v44  ;;  %v7917_v44 = vld [vmem:[#allocation8 + $0x70] ss:$24 sps:$4 sm:$0xff]  }
 0x28d   : > { %3891 = vmatpush2.bf16.msra.mxu1 %v7866_v45  ;;  %3851 = vmatprep.subr.bf16.mxu0 %v7871_v46  ;;  %v7920_v45 = vld [vmem:[#allocation8 + $0x370] ss:$24 sps:$4 sm:$0xff]   ;;  %v7925_v46 = vld [vmem:[#allocation8 + $0x44] ss:$24 sps:$4 sm:$0xff]  }
 0x28e   : > { %3892 = vmatprep.subr.bf16.mxu1 %v7874_v47  ;;  %v7928_v47 = vld [vmem:[#allocation8 + $0x344] ss:$24 sps:$4 sm:$0xff]  }
 0x290   : > { %3852 = vmatpush2.bf16.msra.mxu0 %v7869_v48  ;;  %v7923_v48 = vld [vmem:[#allocation8 + $0x40] ss:$24 sps:$4 sm:$0xff]  }
 0x291   : > { %3893 = vmatpush2.bf16.msra.mxu1 %v7872_v49  ;;  %3853 = vmatprep.subr.bf16.mxu0 %v7877_v50  ;;  %v7926_v49 = vld [vmem:[#allocation8 + $0x340] ss:$24 sps:$4 sm:$0xff]   ;;  %v7931_v50 = vld [vmem:[#allocation8 + $0x14] ss:$24 sps:$4 sm:$0xff]  }
 0x292   : > { %3894 = vmatprep.subr.bf16.mxu1 %v7880_v51  ;;  %v7934_v51 = vld [vmem:[#allocation8 + $0x314] ss:$24 sps:$4 sm:$0xff]  }
 0x294   : > { %3854 = vmatpush2.bf16.msra.mxu0 %v7875_v52  ;;  %v7929_v52 = vld [vmem:[#allocation8 + $0x10] ss:$24 sps:$4 sm:$0xff]  }
 0x295   : > { %3895 = vmatpush2.bf16.msra.mxu1 %v7878_v54  ;;  %3855 = vmatprep.subr.bf16.mxu0 %v7883_v55  ;;  %v7932_v54 = vld [vmem:[#allocation8 + $0x310] ss:$24 sps:$4 sm:$0xff]   ;;  %v7937_v55 = vld [vmem:[#allocation8 + $0x2e4] ss:$24 sps:$4 sm:$0xff]  }
 0x296   : > { %3896 = vmatprep.subr.bf16.mxu1 %v7886_v56  ;;  %v7940_v56 = vld [vmem:[#allocation8 + $0x5e4] ss:$24 sps:$4 sm:$0xff]  }
 0x298   : > { %3856 = vmatpush2.bf16.msra.mxu0 %v7881_v57  ;;  %v7935_v57 = vld [vmem:[#allocation8 + $0x2e0] ss:$24 sps:$4 sm:$0xff]  }
 0x299   : > { %3897 = vmatpush2.bf16.msra.mxu1 %v7884_v58  ;;  %3907 = vmatprep.subr.bf16.mxu0 %v7889_v59  ;;  %v7938_v58 = vld [vmem:[#allocation8 + $0x5e0] ss:$24 sps:$4 sm:$0xff]   ;;  %v7943_v59 = vld [vmem:[#allocation8 + $0x2b4] ss:$24 sps:$4 sm:$0xff]  }
 0x29a   : > { %3948 = vmatprep.subr.bf16.mxu1 %v7892_v62  ;;  %v7946_v62 = vld [vmem:[#allocation8 + $0x5b4] ss:$24 sps:$4 sm:$0xff]  }
 0x29b   : > { %3858 = vmatmul.mubr.bf16.vlgmr.msra.gmra.mxu0 %v9326_v26  ;;  %v3613_v6 = vpop.f32.mrf.mxu0 }
 0x29c   : > { %3899 = vmatmul.mubr.bf16.vlgmr.msra.gmra.mxu1 %v9328_v27  ;;  %v3614_v15 = vadd.f32 %v3613_v6, %v1632_v1  ;;  %v3654_v17 = vpop.f32.mrf.mxu1  ;;  %3908 = vmatpush1.bf16.msra.mxu0 %v7887_v63  ;;  %v7941_v63 = vld [vmem:[#allocation8 + $0x2b0] ss:$24 sps:$4 sm:$0xff]   ;;  %v7950_v6 = vld [vmem:[#allocation8 + $0x580] ss:$24 sps:$4 sm:$0xff]  }
 0x29d   : > { %3939 = vmatprep.mubr.bf16.mxu0 %v9290_v39  ;;  %3949 = vmatpush1.bf16.msra.mxu1 %v7890_v2  ;;  %v3615_v9 = vpop.f32.mrf.mxu0  ;;  %v7944_v1 = vld [vmem:[#allocation8 + $0x5b0] ss:$24 sps:$4 sm:$0xff]   ;;  %v7949_v2 = vld [vmem:[#allocation8 + $0x284] ss:$24 sps:$4 sm:$0xff]  }
 0x29e   : > { %v9347_v5 = vadd.f32 %v3654_v17, %v3614_v15  ;;  %3980 = vmatprep.mubr.bf16.mxu1 %v9294_v42  ;;  %v3616_v21 = vadd.f32 %v3615_v9, %v1636_v3  ;;  %v3656_v22 = vpop.f32.mrf.mxu1  ;;  %3909 = vmatprep.subr.bf16.mxu0 %v7895_v4  ;;  %v7905_v42 = vld [vmem:[#allocation8 + $0xd0] ss:$24 sps:$4 sm:$0xff]   ;;  %v7952_v3 = vld [vmem:[#allocation8 + $0x584] ss:$24 sps:$4 sm:$0xff]   ;;  %v7947_v4 = vld [vmem:[#allocation8 + $0x280] ss:$24 sps:$4 sm:$0xff]  }
 0x29f   : > { %3950 = vmatprep.subr.bf16.mxu1 %v7898_v14  ;;  %v3617_v16 = vpop.f32.mrf.mxu0  ;;  %v7955_v14 = vld [vmem:[#allocation8 + $0x254] ss:$24 sps:$4 sm:$0xff]   ;;  %v7953_v17 = vld [vmem:[#allocation8 + $0x250] ss:$24 sps:$4 sm:$0xff]   ;;  %v7961_v9 = vld [vmem:[#allocation8 + $0x224] ss:$24 sps:$4 sm:$0xff]  }
 0x2a0   : > { %v9350_v23 = vadd.f32 %v3656_v22, %v3616_v21  ;;  %v3658_v24 = vpop.f32.mrf.mxu1  ;;  %3910 = vmatpush1.bf16.msra.mxu0 %v7893_v18  ;;  %v7958_v15 = vld [vmem:[#allocation8 + $0x554] ss:$24 sps:$4 sm:$0xff]   ;;  %v7956_v18 = vld [vmem:[#allocation8 + $0x550] ss:$24 sps:$4 sm:$0xff]   ;;  %v7962_v21 = vld [vmem:[#allocation8 + $0x520] ss:$24 sps:$4 sm:$0xff]  }
 0x2a1   : > { %3951 = vmatpush1.bf16.msra.mxu1 %v7896_v19  ;;  %v3618_v39 = vpop.f32.mrf.mxu0  ;;  %3911 = vmatprep.subr.bf16.mxu0 %v7901_v20  ;;  %v7964_v19 = vld [vmem:[#allocation8 + $0x524] ss:$24 sps:$4 sm:$0xff]   ;;  %v7959_v20 = vld [vmem:[#allocation8 + $0x220] ss:$24 sps:$4 sm:$0xff]   ;;  %v7967_v22 = vld [vmem:[#allocation8 + $0x1f4] ss:$24 sps:$4 sm:$0xff]  }
 0x2a2   : > { %v3659_v30 = vpop.f32.mrf.mxu1  ;;  %3952 = vmatprep.subr.bf16.mxu1 %v7904_v12  ;;  %v7970_v12 = vld [vmem:[#allocation8 + $0x4f4] ss:$24 sps:$4 sm:$0xff]   ;;  %v7965_v16 = vld [vmem:[#allocation8 + $0x1f0] ss:$24 sps:$4 sm:$0xff]   ;;  %v7976_v39 = vld [vmem:[#allocation8 + $0x4c4] ss:$24 sps:$4 sm:$0xff]  }
 0x2a3   : > { %v7968_v24 = vld [vmem:[#allocation8 + $0x4f0] ss:$24 sps:$4 sm:$0xff]   ;;  %v7979_v30 = vld [vmem:[#allocation8 + $0x194] ss:$24 sps:$4 sm:$0xff]  }
 0x2a4   : > { %3912 = vmatpush1.bf16.msra.mxu0 %v7899_v25  ;;  %v7973_v25 = vld [vmem:[#allocation8 + $0x1c4] ss:$24 sps:$4 sm:$0xff]  }
 0x2a5   : > { %3953 = vmatpush1.bf16.msra.mxu1 %v7902_v28  ;;  %3913 = vmatprep.subr.bf16.mxu0 %v7907_v29  ;;  %v7971_v28 = vld [vmem:[#allocation8 + $0x1c0] ss:$24 sps:$4 sm:$0xff]  }
 0x2a6   : > { %3954 = vmatprep.subr.bf16.mxu1 %v7910_v31  ;;  %v7974_v29 = vld [vmem:[#allocation8 + $0x4c0] ss:$24 sps:$4 sm:$0xff]   ;;  %v7982_v31 = vld [vmem:[#allocation8 + $0x494] ss:$24 sps:$4 sm:$0xff]  }
 0x2a8   : > { %3914 = vmatpush1.bf16.msra.mxu0 %v7905_v42  ;;  %v7977_v42 = vld [vmem:[#allocation8 + $0x190] ss:$24 sps:$4 sm:$0xff]  }
 0x2a9   : > { %3955 = vmatpush1.bf16.msra.mxu1 %v7908_v32  ;;  %3915 = vmatprep.subr.bf16.mxu0 %v7913_v34  ;;  %v7980_v32 = vld [vmem:[#allocation8 + $0x490] ss:$24 sps:$4 sm:$0xff]   ;;  %v7985_v34 = vld [vmem:[#allocation8 + $0x764] ss:$24 sps:$4 sm:$0xff]  }
 0x2aa   : > { %3956 = vmatprep.subr.bf16.mxu1 %v7916_v35  ;;  %v7988_v35 = vld [vmem:[#allocation8 + $0xa64] ss:$24 sps:$4 sm:$0xff]  }
 0x2ac   : > { %3916 = vmatpush1.bf16.msra.mxu0 %v7911_v36  ;;  %v7983_v36 = vld [vmem:[#allocation8 + $0x760] ss:$24 sps:$4 sm:$0xff]  }
 0x2ad   : > { %3957 = vmatpush1.bf16.msra.mxu1 %v7914_v38  ;;  %3917 = vmatprep.subr.bf16.mxu0 %v7919_v40  ;;  %v7986_v38 = vld [vmem:[#allocation8 + $0xa60] ss:$24 sps:$4 sm:$0xff]   ;;  %v7991_v40 = vld [vmem:[#allocation8 + $0x734] ss:$24 sps:$4 sm:$0xff]  }
 0x2ae   : > { %3958 = vmatprep.subr.bf16.mxu1 %v7922_v41 }
 0x2b0   : > { %3918 = vmatpush1.bf16.msra.mxu0 %v7917_v44  ;;  %v7994_v44 = vld [vmem:[#allocation8 + $0xa34] ss:$24 sps:$4 sm:$0xff]  }
 0x2b1   : > { %3959 = vmatpush1.bf16.msra.mxu1 %v7920_v45  ;;  %3919 = vmatprep.subr.bf16.mxu0 %v7925_v46 }
 0x2b2   : > { %3960 = vmatprep.subr.bf16.mxu1 %v7928_v47  ;;  %v7989_v47 = vld [vmem:[#allocation8 + $0x730] ss:$24 sps:$4 sm:$0xff]  }
 0x2b4   : > { %3920 = vmatpush1.bf16.msra.mxu0 %v7923_v48 }
 0x2b5   : > { %3961 = vmatpush1.bf16.msra.mxu1 %v7926_v49  ;;  %3921 = vmatprep.subr.bf16.mxu0 %v7931_v50  ;;  %v7992_v49 = vld [vmem:[#allocation8 + $0xa30] ss:$24 sps:$4 sm:$0xff]   ;;  %v7997_v50 = vld [vmem:[#allocation8 + $0x704] ss:$24 sps:$4 sm:$0xff]  }
 0x2b6   : > { %3962 = vmatprep.subr.bf16.mxu1 %v7934_v51 }
 0x2b8   : > { %3922 = vmatpush1.bf16.msra.mxu0 %v7929_v52 }
 0x2b9   : > { %3963 = vmatpush1.bf16.msra.mxu1 %v7932_v54  ;;  %3923 = vmatprep.subr.bf16.mxu0 %v7937_v55  ;;  %v7995_v54 = vld [vmem:[#allocation8 + $0x700] ss:$24 sps:$4 sm:$0xff]  }
 0x2ba   : > { %3964 = vmatprep.subr.bf16.mxu1 %v7940_v56  ;;  %v7998_v55 = vld [vmem:[#allocation8 + $0xa00] ss:$24 sps:$4 sm:$0xff]   ;;  %v8003_v56 = vld [vmem:[#allocation8 + $0x6d4] ss:$24 sps:$4 sm:$0xff]  }
 0x2bc   : > { %3924 = vmatpush2.bf16.msra.mxu0 %v7935_v57 }
 0x2bd   : > { %3965 = vmatpush2.bf16.msra.mxu1 %v7938_v58  ;;  %3925 = vmatprep.subr.bf16.mxu0 %v7943_v59  ;;  %v8006_v58 = vld [vmem:[#allocation8 + $0x9d4] ss:$24 sps:$4 sm:$0xff]   ;;  %v8001_v59 = vld [vmem:[#allocation8 + $0x6d0] ss:$24 sps:$4 sm:$0xff]  }
 0x2be   : > { %3966 = vmatprep.subr.bf16.mxu1 %v7946_v62  ;;  %v8009_v62 = vld [vmem:[#allocation8 + $0x6a4] ss:$24 sps:$4 sm:$0xff]  }
 0x2c0   : > { %3926 = vmatpush2.bf16.msra.mxu0 %v7941_v63  ;;  %v8012_v63 = vld [vmem:[#allocation8 + $0x9a4] ss:$24 sps:$4 sm:$0xff]  }
 0x2c1   : > { %3967 = vmatpush2.bf16.msra.mxu1 %v7944_v1  ;;  %3927 = vmatprep.subr.bf16.mxu0 %v7949_v2  ;;  %v8007_v1 = vld [vmem:[#allocation8 + $0x6a0] ss:$24 sps:$4 sm:$0xff]  }
 0x2c2   : > { %3968 = vmatprep.subr.bf16.mxu1 %v7952_v3  ;;  %v8010_v2 = vld [vmem:[#allocation8 + $0x9a0] ss:$24 sps:$4 sm:$0xff]   ;;  %v8015_v3 = vld [vmem:[#allocation8 + $0x674] ss:$24 sps:$4 sm:$0xff]  }
 0x2c4   : > { %3928 = vmatpush2.bf16.msra.mxu0 %v7947_v4  ;;  %v8018_v4 = vld [vmem:[#allocation8 + $0x974] ss:$24 sps:$4 sm:$0xff]  }
 0x2c5   : > { %3969 = vmatpush2.bf16.msra.mxu1 %v7950_v6  ;;  %3929 = vmatprep.subr.bf16.mxu0 %v7955_v14  ;;  %v8013_v6 = vld [vmem:[#allocation8 + $0x670] ss:$24 sps:$4 sm:$0xff]  }
 0x2c6   : > { %3970 = vmatprep.subr.bf16.mxu1 %v7958_v15  ;;  %v8016_v14 = vld [vmem:[#allocation8 + $0x970] ss:$24 sps:$4 sm:$0xff]   ;;  %v8021_v15 = vld [vmem:[#allocation8 + $0x644] ss:$24 sps:$4 sm:$0xff]  }
 0x2c8   : > { %3930 = vmatpush2.bf16.msra.mxu0 %v7953_v17  ;;  %v8024_v17 = vld [vmem:[#allocation8 + $0x944] ss:$24 sps:$4 sm:$0xff]  }
 0x2c9   : > { %3971 = vmatpush2.bf16.msra.mxu1 %v7956_v18  ;;  %3931 = vmatprep.subr.bf16.mxu0 %v7961_v9  ;;  %v8019_v18 = vld [vmem:[#allocation8 + $0x640] ss:$24 sps:$4 sm:$0xff]  }
 0x2ca   : > { %3972 = vmatprep.subr.bf16.mxu1 %v7964_v19  ;;  %v8022_v9 = vld [vmem:[#allocation8 + $0x940] ss:$24 sps:$4 sm:$0xff]   ;;  %v8027_v19 = vld [vmem:[#allocation8 + $0x614] ss:$24 sps:$4 sm:$0xff]  }
 0x2cc   : > { %3932 = vmatpush2.bf16.msra.mxu0 %v7959_v20  ;;  %v8030_v20 = vld [vmem:[#allocation8 + $0x914] ss:$24 sps:$4 sm:$0xff]  }
 0x2cd   : > { %3973 = vmatpush2.bf16.msra.mxu1 %v7962_v21  ;;  %3933 = vmatprep.subr.bf16.mxu0 %v7967_v22  ;;  %v8025_v21 = vld [vmem:[#allocation8 + $0x610] ss:$24 sps:$4 sm:$0xff]  }
 0x2ce   : > { %3974 = vmatprep.subr.bf16.mxu1 %v7970_v12  ;;  %v8028_v22 = vld [vmem:[#allocation8 + $0x910] ss:$24 sps:$4 sm:$0xff]   ;;  %v8033_v12 = vld [vmem:[#allocation8 + $0x8e4] ss:$24 sps:$4 sm:$0xff]  }
 0x2d0   : > { %3934 = vmatpush2.bf16.msra.mxu0 %v7965_v16  ;;  %v8036_v16 = vld [vmem:[#allocation8 + $0xbe4] ss:$24 sps:$4 sm:$0xff]  }
 0x2d1   : > { %3975 = vmatpush2.bf16.msra.mxu1 %v7968_v24  ;;  %3935 = vmatprep.subr.bf16.mxu0 %v7973_v25  ;;  %v8031_v24 = vld [vmem:[#allocation8 + $0x8e0] ss:$24 sps:$4 sm:$0xff]  }
 0x2d2   : > { %3976 = vmatprep.subr.bf16.mxu1 %v7976_v39  ;;  %v8034_v25 = vld [vmem:[#allocation8 + $0xbe0] ss:$24 sps:$4 sm:$0xff]   ;;  %v8039_v39 = vld [vmem:[#allocation8 + $0x8b4] ss:$24 sps:$4 sm:$0xff]  }
 0x2d4   : > { %3936 = vmatpush2.bf16.msra.mxu0 %v7971_v28  ;;  %v8042_v28 = vld [vmem:[#allocation8 + $0xbb4] ss:$24 sps:$4 sm:$0xff]  }
 0x2d5   : > { %3977 = vmatpush2.bf16.msra.mxu1 %v7974_v29  ;;  %3937 = vmatprep.subr.bf16.mxu0 %v7979_v30  ;;  %v8037_v29 = vld [vmem:[#allocation8 + $0x8b0] ss:$24 sps:$4 sm:$0xff]  }
 0x2d6   : > { %3978 = vmatprep.subr.bf16.mxu1 %v7982_v31  ;;  %v8040_v30 = vld [vmem:[#allocation8 + $0xbb0] ss:$24 sps:$4 sm:$0xff]   ;;  %v8045_v31 = vld [vmem:[#allocation8 + $0x884] ss:$24 sps:$4 sm:$0xff]  }
 0x2d8   : > { %3938 = vmatpush2.bf16.msra.mxu0 %v7977_v42  ;;  %v8048_v42 = vld [vmem:[#allocation8 + $0xb84] ss:$24 sps:$4 sm:$0xff]  }
 0x2d9   : > { %3979 = vmatpush2.bf16.msra.mxu1 %v7980_v32  ;;  %3989 = vmatprep.subr.bf16.mxu0 %v7985_v34  ;;  %v8043_v32 = vld [vmem:[#allocation8 + $0x880] ss:$24 sps:$4 sm:$0xff]  }
 0x2da   : > { %4030 = vmatprep.subr.bf16.mxu1 %v7988_v35  ;;  %v8046_v34 = vld [vmem:[#allocation8 + $0xb80] ss:$24 sps:$4 sm:$0xff]   ;;  %v8051_v35 = vld [vmem:[#allocation8 + $0x854] ss:$24 sps:$4 sm:$0xff]  }
 0x2db   : > { %v3695_v41 = vpop.f32.mrf.mxu0  ;;  %3940 = vmatmul.mubr.bf16.vlgmr.msra.gmra.mxu0 %v9292_v0 }
 0x2dc   : > { %v3696_v45 = vadd.f32 %v3695_v41, %v9347_v5  ;;  %v3736_v46 = vpop.f32.mrf.mxu1  ;;  %3981 = vmatmul.mubr.bf16.vlgmr.msra.gmra.mxu1 %v9296_v43  ;;  %3990 = vmatpush1.bf16.msra.mxu0 %v7983_v36  ;;  %v8000_v5 = vld [vmem:[#allocation8 + $0xa04] ss:$24 sps:$4 sm:$0xff]   ;;  %v8054_v36 = vld [vmem:[#allocation8 + $0xb54] ss:$24 sps:$4 sm:$0xff]  }
 0x2dd   : > { %4021 = vmatprep.mubr.bf16.mxu0 %v9312_v33  ;;  %4031 = vmatpush1.bf16.msra.mxu1 %v7986_v38  ;;  %v9356_v48 = vpop.f32.mrf.mxu0  ;;  %v8049_v38 = vld [vmem:[#allocation8 + $0x850] ss:$24 sps:$4 sm:$0xff]   ;;  %v8057_v41 = vld [vmem:[#allocation8 + $0x824] ss:$24 sps:$4 sm:$0xff]  }
 0x2de   : > { %v9358_v51 = vadd.f32 %v3736_v46, %v3696_v45  ;;  %4062 = vmatprep.mubr.bf16.mxu1 %v9314_v37  ;;  %v9361_v0 = vpop.f32.mrf.mxu1  ;;  %3991 = vmatprep.subr.bf16.mxu0 %v7991_v40  ;;  %v8004_v37 = vld [vmem:[#allocation8 + $0x9d0] ss:$24 sps:$4 sm:$0xff]   ;;  %v8055_v45 = vld [vmem:[#allocation8 + $0x820] ss:$24 sps:$4 sm:$0xff]  }
 0x2df   : > { %v3699_v52 = vpop.f32.mrf.mxu0  ;;  %4032 = vmatprep.subr.bf16.mxu1 %v7994_v44  ;;  %v8052_v40 = vld [vmem:[#allocation8 + $0xb50] ss:$24 sps:$4 sm:$0xff]   ;;  %v8060_v44 = vld [vmem:[#allocation8 + $0xb24] ss:$24 sps:$4 sm:$0xff]   ;;  %v8058_v46 = vld [vmem:[#allocation8 + $0xb20] ss:$24 sps:$4 sm:$0xff]  }
 0x2e0   : > { %v3740_v43 = vpop.f32.mrf.mxu1  ;;  %3992 = vmatpush1.bf16.msra.mxu0 %v7989_v47  ;;  %v8063_v47 = vld [vmem:[#allocation8 + $0x7f4] ss:$24 sps:$4 sm:$0xff]   ;;  %v8064_v52 = vld [vmem:[#allocation8 + $0xaf0] ss:$24 sps:$4 sm:$0xff]   ;;  %vm4071_vm9 = vcmp.gt.f32.partialorder %v9358_v51, 0.0 }
 0x2e1   : > { %4033 = vmatpush1.bf16.msra.mxu1 %v7992_v49  ;;  %v3700_v33 = vpop.f32.mrf.mxu0  ;;  %3993 = vmatprep.subr.bf16.mxu0 %v7997_v50  ;;  %v8066_v49 = vld [vmem:[#allocation8 + $0xaf4] ss:$24 sps:$4 sm:$0xff]   ;;  %v3698_v50 = vadd.f32 %v9356_v48, %v9350_v23  ;;  %v8069_v43 = vld [vmem:[#allocation8 + $0x7c4] ss:$24 sps:$4 sm:$0xff]   ;;  %v8073_v23 = vld [vmem:[#allocation8 + $0x790] ss:$24 sps:$4 sm:$0xff]  }
 0x2e2   : > { %v3741_v57 = vpop.f32.mrf.mxu1  ;;  %4034 = vmatprep.subr.bf16.mxu1 %v8000_v5  ;;  %v8061_v5 = vld [vmem:[#allocation8 + $0x7f0] ss:$24 sps:$4 sm:$0xff]  }
 0x2e3   : > { %v3739_v33 = vadd.f32 %v9361_v0, %v3698_v50  ;;  %v8075_v57 = vld [vmem:[#allocation8 + $0x794] ss:$24 sps:$4 sm:$0xff]   ;;  %v8076_v48 = vld [vmem:[#allocation8 + $0xa90] ss:$24 sps:$4 sm:$0xff]  }
 0x2e4   : > { %3994 = vmatpush1.bf16.msra.mxu0 %v7995_v54  ;;  %v8072_v54 = vld [vmem:[#allocation8 + $0xac4] ss:$24 sps:$4 sm:$0xff]  }
 0x2e5   : > { %4035 = vmatpush1.bf16.msra.mxu1 %v7998_v55  ;;  %3995 = vmatprep.subr.bf16.mxu0 %v8003_v56  ;;  %v8067_v55 = vld [vmem:[#allocation8 + $0x7c0] ss:$24 sps:$4 sm:$0xff]   ;;  %vm4072_vm8 = vcmp.gt.f32.partialorder %v3739_v33, 0.0 }
 0x2e6   : > { %4036 = vmatprep.subr.bf16.mxu1 %v8006_v58  ;;  %v8070_v56 = vld [vmem:[#allocation8 + $0xac0] ss:$24 sps:$4 sm:$0xff]   ;;  %v8078_v58 = vld [vmem:[#allocation8 + $0xa94] ss:$24 sps:$4 sm:$0xff]  }
 0x2e7   : > { %v8079_v0 = vld [vmem:[#allocation11 + $0xe0] ss:$16 sps:$4 sm:$0xff]  }
 0x2e8   : > { %3996 = vmatpush1.bf16.msra.mxu0 %v8001_v59  ;;  %v4078_v59 = vmul.f32 0.01, %v3739_v33  ;;  %v8133_v50 = vld [vmem:[#allocation11 + $0x200] ss:$16 sps:$4 sm:$0xff]  }
 0x2e9   : > { %4037 = vmatpush1.bf16.msra.mxu1 %v8004_v37  ;;  %3997 = vmatprep.subr.bf16.mxu0 %v8009_v62  ;;  %v8081_v37 = vld [vmem:[#allocation11 + $0xe4] ss:$16 sps:$4 sm:$0xff]  }
 0x2ea   : > { %4038 = vmatprep.subr.bf16.mxu1 %v8012_v63  ;;  %v8093_v62 = vld [vmem:[#allocation11 + $0x2e4] ss:$16 sps:$4 sm:$0xff]   ;;  %v4084_v63 = vsel %vm4072_vm8, %v3739_v33, %v4078_v59  ;;  %v8130_v59 = vld [vmem:[#allocation11 + $0x1a0] ss:$16 sps:$4 sm:$0xff]  }
 0x2eb   : > { %v8147_v33 = vld [vmem:[#allocation11 + $0x3c4] ss:$16 sps:$4 sm:$0xff]  }
 0x2ec   : > { %3998 = vmatpush1.bf16.msra.mxu0 %v8007_v1  ;;  %v8084_v1 = vld [vmem:[#allocation11 + $0xc4] ss:$16 sps:$4 sm:$0xff]  }
 0x2ed   : > { %4039 = vmatpush1.bf16.msra.mxu1 %v8010_v2  ;;  %3999 = vmatprep.subr.bf16.mxu0 %v8015_v3  ;;  %v8091_v2 = vld [vmem:[#allocation11 + $0x2e0] ss:$16 sps:$4 sm:$0xff]  }
 0x2ee   : > { %4040 = vmatprep.subr.bf16.mxu1 %v8018_v4  ;;  %v9369_v4 = vpack.c.bf16 %v4084_v63, %v4084_v63  ;;  %v8157_v63 = vld [vmem:[#allocation11 + $0x380] ss:$16 sps:$4 sm:$0xff]  }
 0x2f0   : > { %4000 = vmatpush1.bf16.msra.mxu0 %v8013_v6  ;;  %v8099_v6 = vld [vmem:[#allocation11 + $0x2c4] ss:$16 sps:$4 sm:$0xff]  }
 0x2f1   : > { %4041 = vmatpush1.bf16.msra.mxu1 %v8016_v14  ;;  %4001 = vmatprep.subr.bf16.mxu0 %v8021_v15  ;;  %v8082_v15 = vld [vmem:[#allocation11 + $0xc0] ss:$16 sps:$4 sm:$0xff]  }
 0x2f2   : > { %4042 = vmatprep.subr.bf16.mxu1 %v8024_v17 }
 0x2f4   : > { %4002 = vmatpush1.bf16.msra.mxu0 %v8019_v18  ;;  %v8087_v18 = vld [vmem:[#allocation11 + $0xa4] ss:$16 sps:$4 sm:$0xff]  }
 0x2f5   : > { %4043 = vmatpush1.bf16.msra.mxu1 %v8022_v9  ;;  %4003 = vmatprep.subr.bf16.mxu0 %v8027_v19  ;;  %v8097_v19 = vld [vmem:[#allocation11 + $0x2c0] ss:$16 sps:$4 sm:$0xff]  }
 0x2f6   : > { %4044 = vmatprep.subr.bf16.mxu1 %v8030_v20  ;;  %v8105_v20 = vld [vmem:[#allocation11 + $0x2a4] ss:$16 sps:$4 sm:$0xff]  }
 0x2f8   : > { %4004 = vmatpush1.bf16.msra.mxu0 %v8025_v21 }
 0x2f9   : > { %4045 = vmatpush1.bf16.msra.mxu1 %v8028_v22  ;;  %4005 = vmatprep.subr.bf16.mxu0 %v8033_v12  ;;  %v8085_v22 = vld [vmem:[#allocation11 + $0xa0] ss:$16 sps:$4 sm:$0xff]  }
 0x2fa   : > { %4046 = vmatprep.subr.bf16.mxu1 %v8036_v16 }
 0x2fc   : > { %4006 = vmatpush2.bf16.msra.mxu0 %v8031_v24  ;;  %v8103_v24 = vld [vmem:[#allocation11 + $0x2a0] ss:$16 sps:$4 sm:$0xff]  }
 0x2fd   : > { %4047 = vmatpush2.bf16.msra.mxu1 %v8034_v25  ;;  %4007 = vmatprep.subr.bf16.mxu0 %v8039_v39  ;;  %v8111_v25 = vld [vmem:[#allocation11 + $0x284] ss:$16 sps:$4 sm:$0xff]   ;;  %v8088_v39 = vld [vmem:[#allocation11 + $0x80] ss:$16 sps:$4 sm:$0xff]  }
 0x2fe   : > { %4048 = vmatprep.subr.bf16.mxu1 %v8042_v28  ;;  %v8096_v28 = vld [vmem:[#allocation11 + $0x64] ss:$16 sps:$4 sm:$0xff]  }
 0x300   : > { %4008 = vmatpush2.bf16.msra.mxu0 %v8037_v29  ;;  %v8109_v29 = vld [vmem:[#allocation11 + $0x280] ss:$16 sps:$4 sm:$0xff]  }
 0x301   : > { %4049 = vmatpush2.bf16.msra.mxu1 %v8040_v30  ;;  %4009 = vmatprep.subr.bf16.mxu0 %v8045_v31  ;;  %v8117_v30 = vld [vmem:[#allocation11 + $0x264] ss:$16 sps:$4 sm:$0xff]   ;;  %v8094_v31 = vld [vmem:[#allocation11 + $0x60] ss:$16 sps:$4 sm:$0xff]  }
 0x302   : > { %4050 = vmatprep.subr.bf16.mxu1 %v8048_v42  ;;  %v8102_v42 = vld [vmem:[#allocation11 + $0x44] ss:$16 sps:$4 sm:$0xff]  }
 0x304   : > { %4010 = vmatpush2.bf16.msra.mxu0 %v8043_v32  ;;  %v8115_v32 = vld [vmem:[#allocation11 + $0x260] ss:$16 sps:$4 sm:$0xff]  }
 0x305   : > { %4051 = vmatpush2.bf16.msra.mxu1 %v8046_v34  ;;  %4011 = vmatprep.subr.bf16.mxu0 %v8051_v35  ;;  %v8123_v34 = vld [vmem:[#allocation11 + $0x244] ss:$16 sps:$4 sm:$0xff]   ;;  %v8100_v35 = vld [vmem:[#allocation11 + $0x40] ss:$16 sps:$4 sm:$0xff]  }
 0x306   : > { %4052 = vmatprep.subr.bf16.mxu1 %v8054_v36  ;;  %v8108_v36 = vld [vmem:[#allocation11 + $0x24] ss:$16 sps:$4 sm:$0xff]  }
 0x308   : > { %4012 = vmatpush2.bf16.msra.mxu0 %v8049_v38  ;;  %v8121_v38 = vld [vmem:[#allocation11 + $0x240] ss:$16 sps:$4 sm:$0xff]  }
 0x309   : > { %4053 = vmatpush2.bf16.msra.mxu1 %v8052_v40  ;;  %4013 = vmatprep.subr.bf16.mxu0 %v8057_v41  ;;  %v8129_v40 = vld [vmem:[#allocation11 + $0x224] ss:$16 sps:$4 sm:$0xff]   ;;  %v8106_v41 = vld [vmem:[#allocation11 + $0x20] ss:$16 sps:$4 sm:$0xff]  }
 0x30a   : > { %4054 = vmatprep.subr.bf16.mxu1 %v8060_v44  ;;  %v8114_v44 = vld [vmem:[#allocation11 + $0x4] ss:$16 sps:$4 sm:$0xff]  }
 0x30c   : > { %4014 = vmatpush2.bf16.msra.mxu0 %v8055_v45  ;;  %v8127_v45 = vld [vmem:[#allocation11 + $0x220] ss:$16 sps:$4 sm:$0xff]  }
 0x30d   : > { %4055 = vmatpush2.bf16.msra.mxu1 %v8058_v46  ;;  %4015 = vmatprep.subr.bf16.mxu0 %v8063_v47  ;;  %v8135_v46 = vld [vmem:[#allocation11 + $0x204] ss:$16 sps:$4 sm:$0xff]   ;;  %v8112_v47 = vld [vmem:[#allocation11] ss:$16 sps:$4 sm:$0xff]  }
 0x30e   : > { %4056 = vmatprep.subr.bf16.mxu1 %v8066_v49  ;;  %v8120_v49 = vld [vmem:[#allocation11 + $0x1e4] ss:$16 sps:$4 sm:$0xff]  }
 0x310   : > { %4016 = vmatpush2.bf16.msra.mxu0 %v8061_v5  ;;  %v8141_v5 = vld [vmem:[#allocation11 + $0x3e4] ss:$16 sps:$4 sm:$0xff]  }
 0x311   : > { %4057 = vmatpush2.bf16.msra.mxu1 %v8064_v52  ;;  %4017 = vmatprep.subr.bf16.mxu0 %v8069_v43  ;;  %v8118_v52 = vld [vmem:[#allocation11 + $0x1e0] ss:$16 sps:$4 sm:$0xff]   ;;  %v8126_v43 = vld [vmem:[#allocation11 + $0x1c4] ss:$16 sps:$4 sm:$0xff]  }
 0x312   : > { %4058 = vmatprep.subr.bf16.mxu1 %v8072_v54  ;;  %v8139_v54 = vld [vmem:[#allocation11 + $0x3e0] ss:$16 sps:$4 sm:$0xff]  }
 0x314   : > { %4018 = vmatpush2.bf16.msra.mxu0 %v8067_v55  ;;  %v8124_v55 = vld [vmem:[#allocation11 + $0x1c0] ss:$16 sps:$4 sm:$0xff]  }
 0x315   : > { %4059 = vmatpush2.bf16.msra.mxu1 %v8070_v56  ;;  %4019 = vmatprep.subr.bf16.mxu0 %v8075_v57  ;;  %v8132_v56 = vld [vmem:[#allocation11 + $0x1a4] ss:$16 sps:$4 sm:$0xff]   ;;  %v8145_v57 = vld [vmem:[#allocation11 + $0x3c0] ss:$16 sps:$4 sm:$0xff]  }
 0x316   : > { %4060 = vmatprep.subr.bf16.mxu1 %v8078_v58  ;;  %v8153_v58 = vld [vmem:[#allocation11 + $0x3a4] ss:$16 sps:$4 sm:$0xff]  }
 0x318   : > { %4020 = vmatpush2.bf16.msra.mxu0 %v8073_v23  ;;  %v8138_v23 = vld [vmem:[#allocation11 + $0x184] ss:$16 sps:$4 sm:$0xff]  }
 0x319   : > { %4061 = vmatpush2.bf16.msra.mxu1 %v8076_v48  ;;  %5269 = vmatprep.subr.bf16.mxu0 %v8081_v37  ;;  %v8151_v48 = vld [vmem:[#allocation11 + $0x3a0] ss:$16 sps:$4 sm:$0xff]   ;;  %v8159_v37 = vld [vmem:[#allocation11 + $0x384] ss:$16 sps:$4 sm:$0xff]  }
 0x31a   : > { %5310 = vmatprep.subr.bf16.mxu1 %v8093_v62  ;;  %v8136_v62 = vld [vmem:[#allocation11 + $0x180] ss:$16 sps:$4 sm:$0xff]  }
 0x31b   : > { %v9366_v3 = vpop.f32.mrf.mxu0  ;;  %4022 = vmatmul.mubr.bf16.vlgmr.msra.gmra.mxu0 %v9326_v26 }
 0x31c   : > { %v9371_v14 = vpop.f32.mrf.mxu1  ;;  %4063 = vmatmul.mubr.bf16.vlgmr.msra.gmra.mxu1 %v9328_v27  ;;  %5270 = vmatpush1.bf16.msra.mxu0 %v8079_v0  ;;  %v8090_v27 = vld [vmem:[#allocation11 + $0x84] ss:$16 sps:$4 sm:$0xff]  }
 0x31d   : > { %5301 = vmatprep.mubr.bf16.mxu0 %v9369_v4  ;;  %v9375_v17 = vpop.f32.mrf.mxu0  ;;  %5271 = vmatprep.subr.bf16.mxu0 %v8084_v1  ;;  %v8144_v0 = vld [vmem:[#allocation11 + $0x164] ss:$16 sps:$4 sm:$0xff]  }
 0x31e   : > { %v9377_v9 = vpop.f32.mrf.mxu1  ;;  %5311 = vmatpush1.bf16.msra.mxu1 %v8091_v2  ;;  %v8165_v1 = vld [vmem:[#allocation11 + $0x364] ss:$16 sps:$4 sm:$0xff]   ;;  %v8142_v2 = vld [vmem:[#allocation11 + $0x160] ss:$16 sps:$4 sm:$0xff]  }
 0x31f   : > { %v3781_v26 = vpop.f32.mrf.mxu0  ;;  %5312 = vmatprep.subr.bf16.mxu1 %v8099_v6  ;;  %v8150_v6 = vld [vmem:[#allocation11 + $0x144] ss:$16 sps:$4 sm:$0xff]  }
 0x320   : > { %v3822_v21 = vpop.f32.mrf.mxu1  ;;  %5272 = vmatpush1.bf16.msra.mxu0 %v8082_v15  ;;  %v8163_v15 = vld [vmem:[#allocation11 + $0x360] ss:$16 sps:$4 sm:$0xff]   ;;  %v8156_v26 = vld [vmem:[#allocation11 + $0x124] ss:$16 sps:$4 sm:$0xff]  }
 0x321   : > { %v3782_v12 = vpop.f32.mrf.mxu0  ;;  %5273 = vmatprep.subr.bf16.mxu0 %v8087_v18  ;;  %v8168_v18 = vld [vmem:[#allocation11 + $0x344] ss:$16 sps:$4 sm:$0xff]  }
 0x322   : > { %v3823_v16 = vpop.f32.mrf.mxu1  ;;  %5313 = vmatpush1.bf16.msra.mxu1 %v8097_v19  ;;  %v8148_v19 = vld [vmem:[#allocation11 + $0x140] ss:$16 sps:$4 sm:$0xff]   ;;  %v8171_v21 = vld [vmem:[#allocation11 + $0x324] ss:$16 sps:$4 sm:$0xff]  }
 0x323   : > { %5314 = vmatprep.subr.bf16.mxu1 %v8105_v20  ;;  %v8166_v20 = vld [vmem:[#allocation11 + $0x340] ss:$16 sps:$4 sm:$0xff]   ;;  %v8162_v12 = vld [vmem:[#allocation11 + $0x104] ss:$16 sps:$4 sm:$0xff]   ;;  %v1640_v16 = vrot.slane %v9338_v60, %v9274_v10 }
 0x324   : > { %5274 = vmatpush1.bf16.msra.mxu0 %v8085_v22  ;;  %v8154_v22 = vld [vmem:[#allocation11 + $0x120] ss:$16 sps:$4 sm:$0xff]  }
 0x325   : > { %5275 = vmatprep.subr.bf16.mxu0 %v8090_v27  ;;  %v4077_v27 = vmul.f32 0.01, %v9358_v51 }
 0x326   : > { %5315 = vmatpush1.bf16.msra.mxu1 %v8103_v24  ;;  %v8169_v24 = vld [vmem:[#allocation11 + $0x320] ss:$16 sps:$4 sm:$0xff]  }
 0x327   : > { %5316 = vmatprep.subr.bf16.mxu1 %v8111_v25  ;;  %v8174_v25 = vld [vmem:[#allocation11 + $0x304] ss:$16 sps:$4 sm:$0xff]  }
 0x328   : > { %5276 = vmatpush1.bf16.msra.mxu0 %v8088_v39  ;;  %v1644_v39 = vrot.slane %v9338_v60, %v9280_v13  ;;  %v8231_v60 = vld [vmem:[#allocation11 + $0x4c4] ss:$16 sps:$4 sm:$0xff]  }
 0x329   : > { %5277 = vmatprep.subr.bf16.mxu0 %v8096_v28  ;;  %v8160_v28 = vld [vmem:[#allocation11 + $0x100] ss:$16 sps:$4 sm:$0xff]  }
 0x32a   : > { %5317 = vmatpush1.bf16.msra.mxu1 %v8109_v29  ;;  %v8225_v29 = vld [vmem:[#allocation11 + $0x4e4] ss:$16 sps:$4 sm:$0xff]  }
 0x32b   : > { %5318 = vmatprep.subr.bf16.mxu1 %v8117_v30  ;;  %v4083_v30 = vsel %vm4071_vm9, %v9358_v51, %v4077_v27  ;;  %v8273_v27 = vld [vmem:[#allocation11 + $0x5e4] ss:$16 sps:$4 sm:$0xff]  }
 0x32c   : > { %5278 = vmatpush1.bf16.msra.mxu0 %v8094_v31  ;;  %v3778_v31 = vadd.f32 %v9366_v3, %v1640_v16  ;;  %v8192_v16 = vld [vmem:[#allocation11 + $0x4c] ss:$16 sps:$4 sm:$0xff]  }
 0x32d   : > { %5279 = vmatprep.subr.bf16.mxu0 %v8102_v42  ;;  %v8172_v42 = vld [vmem:[#allocation11 + $0x300] ss:$16 sps:$4 sm:$0xff]  }
 0x32e   : > { %5319 = vmatpush1.bf16.msra.mxu1 %v8115_v32  ;;  %v8177_v32 = vld [vmem:[#allocation11 + $0xec] ss:$16 sps:$4 sm:$0xff]  }
 0x32f   : > { %5320 = vmatprep.subr.bf16.mxu1 %v8123_v34  ;;  %v3780_v34 = vadd.f32 %v9375_v17, %v1644_v39  ;;  %v8279_v39 = vld [vmem:[#allocation11 + $0x5c4] ss:$16 sps:$4 sm:$0xff]  }
 0x330   : > { %5280 = vmatpush1.bf16.msra.mxu0 %v8100_v35  ;;  %v8223_v35 = vld [vmem:[#allocation11 + $0x4e0] ss:$16 sps:$4 sm:$0xff]  }
 0x331   : > { %5281 = vmatprep.subr.bf16.mxu0 %v8108_v36  ;;  %v9388_v36 = vpack.c.bf16 %v4083_v30, %v4083_v30  ;;  %v3821_v51 = vadd.f32 %v9377_v9, %v3780_v34  ;;  %v8243_v9 = vld [vmem:[#allocation11 + $0x484] ss:$16 sps:$4 sm:$0xff]   ;;  %v8193_v30 = vld [vmem:[#allocation11 + $0x28] ss:$16 sps:$4 sm:$0xff]  }
 0x332   : > { %5321 = vmatpush1.bf16.msra.mxu1 %v8121_v38  ;;  %v3819_v38 = vadd.f32 %v9371_v14, %v3778_v31  ;;  %v8285_v31 = vld [vmem:[#allocation11 + $0x5a4] ss:$16 sps:$4 sm:$0xff]   ;;  %v8196_v34 = vld [vmem:[#allocation11 + $0x8] ss:$16 sps:$4 sm:$0xff]  }
 0x333   : > { %5322 = vmatprep.subr.bf16.mxu1 %v8129_v40 }
 0x334   : > { %5282 = vmatpush1.bf16.msra.mxu0 %v8106_v41 }
 0x335   : > { %5283 = vmatprep.subr.bf16.mxu0 %v8114_v44  ;;  %v8229_v44 = vld [vmem:[#allocation11 + $0x4c0] ss:$16 sps:$4 sm:$0xff]  }
 0x336   : > { %5323 = vmatpush1.bf16.msra.mxu1 %v8127_v45  ;;  %v8237_v45 = vld [vmem:[#allocation11 + $0x4a4] ss:$16 sps:$4 sm:$0xff]  }
 0x337   : > { %5324 = vmatprep.subr.bf16.mxu1 %v8135_v46 }
 0x338   : > { %5284 = vmatpush1.bf16.msra.mxu0 %v8112_v47 }
 0x339   : > { %5285 = vmatprep.subr.bf16.mxu0 %v8120_v49 }
 0x33a   : > { %5325 = vmatpush1.bf16.msra.mxu1 %v8133_v50 }
 0x33b   : > { %5326 = vmatprep.subr.bf16.mxu1 %v8141_v5 }
 0x33c   : > { %5286 = vmatpush2.bf16.msra.mxu0 %v8118_v52 }
 0x33d   : > { %5287 = vmatprep.subr.bf16.mxu0 %v8126_v43  ;;  %v8235_v43 = vld [vmem:[#allocation11 + $0x4a0] ss:$16 sps:$4 sm:$0xff]  }
 0x33e   : > { %5327 = vmatpush2.bf16.msra.mxu1 %v8139_v54 }
 0x33f   : > { %5328 = vmatprep.subr.bf16.mxu1 %v8147_v33 }
 0x340   : > { %5288 = vmatpush2.bf16.msra.mxu0 %v8124_v55 }
 0x341   : > { %5289 = vmatprep.subr.bf16.mxu0 %v8132_v56 }
 0x342   : > { %5329 = vmatpush2.bf16.msra.mxu1 %v8145_v57 }
 0x343   : > { %5330 = vmatprep.subr.bf16.mxu1 %v8153_v58  ;;  %v8241_v58 = vld [vmem:[#allocation11 + $0x480] ss:$16 sps:$4 sm:$0xff]  }
 0x344   : > { %5290 = vmatpush2.bf16.msra.mxu0 %v8130_v59 }
 0x345   : > { %5291 = vmatprep.subr.bf16.mxu0 %v8138_v23  ;;  %v8175_v23 = vld [vmem:[#allocation11 + $0xe8] ss:$16 sps:$4 sm:$0xff]  }
 0x346   : > { %5331 = vmatpush2.bf16.msra.mxu1 %v8151_v48 }
 0x347   : > { %5332 = vmatprep.subr.bf16.mxu1 %v8159_v37  ;;  %v8180_v37 = vld [vmem:[#allocation11 + $0xcc] ss:$16 sps:$4 sm:$0xff]  }
 0x348   : > { %5292 = vmatpush2.bf16.msra.mxu0 %v8136_v62  ;;  %v8249_v62 = vld [vmem:[#allocation11 + $0x464] ss:$16 sps:$4 sm:$0xff]  }
 0x349   : > { %5293 = vmatprep.subr.bf16.mxu0 %v8144_v0  ;;  %v8247_v0 = vld [vmem:[#allocation11 + $0x460] ss:$16 sps:$4 sm:$0xff]  }
 0x34a   : > { %5333 = vmatpush2.bf16.msra.mxu1 %v8157_v63  ;;  %v8178_v63 = vld [vmem:[#allocation11 + $0xc8] ss:$16 sps:$4 sm:$0xff]  }
 0x34b   : > { %5334 = vmatprep.subr.bf16.mxu1 %v8165_v1  ;;  %v8255_v1 = vld [vmem:[#allocation11 + $0x444] ss:$16 sps:$4 sm:$0xff]  }
 0x34c   : > { %5294 = vmatpush2.bf16.msra.mxu0 %v8142_v2  ;;  %v8183_v2 = vld [vmem:[#allocation11 + $0xac] ss:$16 sps:$4 sm:$0xff]  }
 0x34d   : > { %5295 = vmatprep.subr.bf16.mxu0 %v8150_v6  ;;  %v8253_v6 = vld [vmem:[#allocation11 + $0x440] ss:$16 sps:$4 sm:$0xff]  }
 0x34e   : > { %5335 = vmatpush2.bf16.msra.mxu1 %v8163_v15  ;;  %v8181_v15 = vld [vmem:[#allocation11 + $0xa8] ss:$16 sps:$4 sm:$0xff]  }
 0x34f   : > { %5336 = vmatprep.subr.bf16.mxu1 %v8168_v18  ;;  %v8261_v18 = vld [vmem:[#allocation11 + $0x424] ss:$16 sps:$4 sm:$0xff]  }
 0x350   : > { %5296 = vmatpush2.bf16.msra.mxu0 %v8148_v19  ;;  %v8186_v19 = vld [vmem:[#allocation11 + $0x8c] ss:$16 sps:$4 sm:$0xff]  }
 0x351   : > { %5297 = vmatprep.subr.bf16.mxu0 %v8156_v26  ;;  %v8259_v26 = vld [vmem:[#allocation11 + $0x420] ss:$16 sps:$4 sm:$0xff]  }
 0x352   : > { %5337 = vmatpush2.bf16.msra.mxu1 %v8166_v20  ;;  %v8184_v20 = vld [vmem:[#allocation11 + $0x88] ss:$16 sps:$4 sm:$0xff]  }
 0x353   : > { %5338 = vmatprep.subr.bf16.mxu1 %v8171_v21  ;;  %v8267_v21 = vld [vmem:[#allocation11 + $0x404] ss:$16 sps:$4 sm:$0xff]  }
 0x354   : > { %5298 = vmatpush2.bf16.msra.mxu0 %v8154_v22  ;;  %v8265_v22 = vld [vmem:[#allocation11 + $0x400] ss:$16 sps:$4 sm:$0xff]  }
 0x355   : > { %5299 = vmatprep.subr.bf16.mxu0 %v8162_v12  ;;  %v8187_v12 = vld [vmem:[#allocation11 + $0x68] ss:$16 sps:$4 sm:$0xff]  }
 0x356   : > { %5339 = vmatpush2.bf16.msra.mxu1 %v8169_v24  ;;  %v8271_v24 = vld [vmem:[#allocation11 + $0x5e0] ss:$16 sps:$4 sm:$0xff]  }
 0x357   : > { %5340 = vmatprep.subr.bf16.mxu1 %v8174_v25  ;;  %v8190_v25 = vld [vmem:[#allocation11 + $0x48] ss:$16 sps:$4 sm:$0xff]  }
 0x358   : > { %5300 = vmatpush2.bf16.msra.mxu0 %v8160_v28  ;;  %v8195_v28 = vld [vmem:[#allocation11 + $0x2c] ss:$16 sps:$4 sm:$0xff]  }
 0x359   : > { %5351 = vmatprep.subr.bf16.mxu0 %v8225_v29  ;;  %v8277_v29 = vld [vmem:[#allocation11 + $0x5c0] ss:$16 sps:$4 sm:$0xff]  }
 0x35a   : > { %5341 = vmatpush2.bf16.msra.mxu1 %v8172_v42  ;;  %v8198_v42 = vld [vmem:[#allocation11 + $0xc] ss:$16 sps:$4 sm:$0xff]  }
 0x35b   : > { %v3859_v40 = vpop.f32.mrf.mxu0  ;;  %5302 = vmatmul.mubr.bf16.vlgmr.msra.gmra.mxu0 %v9388_v36  ;;  %5392 = vmatprep.subr.bf16.mxu1 %v8177_v32  ;;  %v8283_v32 = vld [vmem:[#allocation11 + $0x5a0] ss:$16 sps:$4 sm:$0xff]  }
 0x35c   : > { %v3860_v3 = vadd.f32 %v3859_v40, %v3819_v38  ;;  %v3900_v41 = vpop.f32.mrf.mxu1  ;;  %5352 = vmatpush1.bf16.msra.mxu0 %v8223_v35  ;;  %v8291_v35 = vld [vmem:[#allocation11 + $0x584] ss:$16 sps:$4 sm:$0xff]   ;;  %v8289_v38 = vld [vmem:[#allocation11 + $0x580] ss:$16 sps:$4 sm:$0xff]   ;;  %v8199_v40 = vld [vmem:[#allocation11 + $0x1e8] ss:$16 sps:$4 sm:$0xff]  }
 0x35d   : > { %v3861_v17 = vpop.f32.mrf.mxu0  ;;  %5353 = vmatprep.subr.bf16.mxu0 %v8231_v60  ;;  %v8201_v60 = vld [vmem:[#allocation11 + $0x1ec] ss:$16 sps:$4 sm:$0xff]  }
 0x35e   : > { %v3901_v46 = vadd.f32 %v3900_v41, %v3860_v3  ;;  %v3862_v47 = vadd.f32 %v3861_v17, %v3821_v51  ;;  %v3902_v49 = vpop.f32.mrf.mxu1  ;;  %v8297_v51 = vld [vmem:[#allocation11 + $0x564] ss:$16 sps:$4 sm:$0xff]   ;;  %v8204_v3 = vld [vmem:[#allocation11 + $0x1cc] ss:$16 sps:$4 sm:$0xff]   ;;  %v8295_v41 = vld [vmem:[#allocation11 + $0x560] ss:$16 sps:$4 sm:$0xff]  }
 0x35f   : > { %v3863_v50 = vpop.f32.mrf.mxu0  ;;  %v8303_v17 = vld [vmem:[#allocation11 + $0x544] ss:$16 sps:$4 sm:$0xff]  }
 0x360   : > { %vm4073_vm10 = vcmp.gt.f32.partialorder %v3901_v46, 0.0  ;;  %v4079_v14 = vmul.f32 0.01, %v3901_v46  ;;  %v3903_v5 = vadd.f32 %v3902_v49, %v3862_v47  ;;  %v3904_v52 = vpop.f32.mrf.mxu1  ;;  %5354 = vmatpush1.bf16.msra.mxu0 %v8229_v44  ;;  %v8202_v44 = vld [vmem:[#allocation11 + $0x1c8] ss:$16 sps:$4 sm:$0xff]  }
 0x361   : > { %v3864_v54 = vpop.f32.mrf.mxu0  ;;  %5355 = vmatprep.subr.bf16.mxu0 %v8237_v45  ;;  %v8207_v45 = vld [vmem:[#allocation11 + $0x1ac] ss:$16 sps:$4 sm:$0xff]   ;;  %v8205_v47 = vld [vmem:[#allocation11 + $0x1a8] ss:$16 sps:$4 sm:$0xff]   ;;  %v8309_v49 = vld [vmem:[#allocation11 + $0x524] ss:$16 sps:$4 sm:$0xff]  }
 0x362   : > { %vm4074_vm11 = vcmp.gt.f32.partialorder %v3903_v5, 0.0  ;;  %v4080_v33 = vmul.f32 0.01, %v3903_v5  ;;  %v3905_v55 = vpop.f32.mrf.mxu1  ;;  %v4085_v56 = vsel %vm4073_vm10, %v3901_v46, %v4079_v14  ;;  %v8301_v46 = vld [vmem:[#allocation11 + $0x540] ss:$16 sps:$4 sm:$0xff]  }
 0x363   : > { %v9395_v48 = vpack.c.bf16 %v4085_v56, %v4085_v56  ;;  %v8210_v50 = vld [vmem:[#allocation11 + $0x18c] ss:$16 sps:$4 sm:$0xff]   ;;  %v8307_v14 = vld [vmem:[#allocation11 + $0x520] ss:$16 sps:$4 sm:$0xff]   ;;  %v8315_v52 = vld [vmem:[#allocation11 + $0x504] ss:$16 sps:$4 sm:$0xff]  }
 0x364   : > { %v4086_v57 = vsel %vm4074_vm11, %v3903_v5, %v4080_v33  ;;  %5356 = vmatpush1.bf16.msra.mxu0 %v8235_v43  ;;  %v8208_v5 = vld [vmem:[#allocation11 + $0x188] ss:$16 sps:$4 sm:$0xff]   ;;  %v8213_v43 = vld [vmem:[#allocation11 + $0x16c] ss:$16 sps:$4 sm:$0xff]   ;;  %v8313_v54 = vld [vmem:[#allocation11 + $0x500] ss:$16 sps:$4 sm:$0xff]  }
 0x365   : > { %v9393_v59 = vpack.c.bf16 %v4086_v57, %v4086_v57  ;;  %5357 = vmatprep.subr.bf16.mxu0 %v8243_v9  ;;  %v8211_v9 = vld [vmem:[#allocation11 + $0x168] ss:$16 sps:$4 sm:$0xff]   ;;  %v8321_v33 = vld [vmem:[#allocation11 + $0x2ec] ss:$16 sps:$4 sm:$0xff]  }
 0x366   : > { %v8216_v55 = vld [vmem:[#allocation11 + $0x14c] ss:$16 sps:$4 sm:$0xff]   ;;  %v8214_v56 = vld [vmem:[#allocation11 + $0x148] ss:$16 sps:$4 sm:$0xff]  }
 0x367   : > { %5342 = vmatprep.mubr.bf16.mxu1 %v9393_v59  ;;  %v8219_v57 = vld [vmem:[#allocation11 + $0x12c] ss:$16 sps:$4 sm:$0xff]  }
 0x368   : > { %5343 = vmatmul.mubr.bf16.vlgmr.msra.gmra.mxu1 %v9395_v48  ;;  %5358 = vmatpush1.bf16.msra.mxu0 %v8241_v58 }
 0x369   : > { %5393 = vmatpush1.bf16.msra.mxu1 %v8175_v23  ;;  %5424 = vmatprep.mubr.bf16.mxu1 %v9369_v4  ;;  %v8189_v4 = vld [vmem:[#allocation11 + $0x6c] ss:$16 sps:$4 sm:$0xff]  }
 0x36a   : > { %5394 = vmatprep.subr.bf16.mxu1 %v8180_v37  ;;  %5359 = vmatprep.subr.bf16.mxu0 %v8249_v62  ;;  %v8217_v62 = vld [vmem:[#allocation11 + $0x128] ss:$16 sps:$4 sm:$0xff]  }
 0x36c   : > { %5360 = vmatpush1.bf16.msra.mxu0 %v8247_v0 }
 0x36d   : > { %5395 = vmatpush1.bf16.msra.mxu1 %v8178_v63  ;;  %5361 = vmatprep.subr.bf16.mxu0 %v8255_v1  ;;  %v8222_v63 = vld [vmem:[#allocation11 + $0x10c] ss:$16 sps:$4 sm:$0xff]  }
 0x36e   : > { %5396 = vmatprep.subr.bf16.mxu1 %v8183_v2 }
 0x370   : > { %5362 = vmatpush1.bf16.msra.mxu0 %v8253_v6 }
 0x371   : > { %5397 = vmatpush1.bf16.msra.mxu1 %v8181_v15  ;;  %5363 = vmatprep.subr.bf16.mxu0 %v8261_v18  ;;  %v8220_v15 = vld [vmem:[#allocation11 + $0x108] ss:$16 sps:$4 sm:$0xff]  }
 0x372   : > { %5398 = vmatprep.subr.bf16.mxu1 %v8186_v19  ;;  %v8228_v19 = vld [vmem:[#allocation11 + $0x4ec] ss:$16 sps:$4 sm:$0xff]  }
 0x374   : > { %5364 = vmatpush1.bf16.msra.mxu0 %v8259_v26  ;;  %v8226_v26 = vld [vmem:[#allocation11 + $0x4e8] ss:$16 sps:$4 sm:$0xff]  }
 0x375   : > { %5399 = vmatpush1.bf16.msra.mxu1 %v8184_v20  ;;  %5365 = vmatprep.subr.bf16.mxu0 %v8267_v21  ;;  %v8234_v20 = vld [vmem:[#allocation11 + $0x4cc] ss:$16 sps:$4 sm:$0xff]   ;;  %v8232_v21 = vld [vmem:[#allocation11 + $0x4c8] ss:$16 sps:$4 sm:$0xff]  }
 0x376   : > { %5400 = vmatprep.subr.bf16.mxu1 %v8189_v4  ;;  %v8240_v4 = vld [vmem:[#allocation11 + $0x4ac] ss:$16 sps:$4 sm:$0xff]  }
 0x378   : > { %5366 = vmatpush1.bf16.msra.mxu0 %v8265_v22  ;;  %v8238_v22 = vld [vmem:[#allocation11 + $0x4a8] ss:$16 sps:$4 sm:$0xff]  }
 0x379   : > { %5401 = vmatpush1.bf16.msra.mxu1 %v8187_v12  ;;  %5367 = vmatprep.subr.bf16.mxu0 %v8273_v27  ;;  %v8246_v12 = vld [vmem:[#allocation11 + $0x48c] ss:$16 sps:$4 sm:$0xff]   ;;  %v8244_v27 = vld [vmem:[#allocation11 + $0x488] ss:$16 sps:$4 sm:$0xff]  }
 0x37a   : > { %5402 = vmatprep.subr.bf16.mxu1 %v8192_v16  ;;  %v8252_v16 = vld [vmem:[#allocation11 + $0x46c] ss:$16 sps:$4 sm:$0xff]  }
 0x37c   : > { %5368 = vmatpush2.bf16.msra.mxu0 %v8271_v24  ;;  %v8250_v24 = vld [vmem:[#allocation11 + $0x468] ss:$16 sps:$4 sm:$0xff]  }
 0x37d   : > { %5403 = vmatpush1.bf16.msra.mxu1 %v8190_v25  ;;  %5369 = vmatprep.subr.bf16.mxu0 %v8279_v39  ;;  %v8258_v25 = vld [vmem:[#allocation11 + $0x44c] ss:$16 sps:$4 sm:$0xff]   ;;  %v8256_v39 = vld [vmem:[#allocation11 + $0x448] ss:$16 sps:$4 sm:$0xff]  }
 0x37e   : > { %5404 = vmatprep.subr.bf16.mxu1 %v8195_v28  ;;  %v8262_v28 = vld [vmem:[#allocation11 + $0x428] ss:$16 sps:$4 sm:$0xff]  }
 0x380   : > { %5370 = vmatpush2.bf16.msra.mxu0 %v8277_v29  ;;  %v8270_v29 = vld [vmem:[#allocation11 + $0x40c] ss:$16 sps:$4 sm:$0xff]  }
 0x381   : > { %5405 = vmatpush1.bf16.msra.mxu1 %v8193_v30  ;;  %5371 = vmatprep.subr.bf16.mxu0 %v8285_v31  ;;  %v8268_v30 = vld [vmem:[#allocation11 + $0x408] ss:$16 sps:$4 sm:$0xff]   ;;  %v8276_v31 = vld [vmem:[#allocation11 + $0x5ec] ss:$16 sps:$4 sm:$0xff]  }
 0x382   : > { %5406 = vmatprep.subr.bf16.mxu1 %v8198_v42  ;;  %v8274_v42 = vld [vmem:[#allocation11 + $0x5e8] ss:$16 sps:$4 sm:$0xff]  }
 0x384   : > { %5372 = vmatpush2.bf16.msra.mxu0 %v8283_v32  ;;  %v8282_v32 = vld [vmem:[#allocation11 + $0x5cc] ss:$16 sps:$4 sm:$0xff]  }
 0x385   : > { %5407 = vmatpush1.bf16.msra.mxu1 %v8196_v34  ;;  %5373 = vmatprep.subr.bf16.mxu0 %v8291_v35  ;;  %v8280_v34 = vld [vmem:[#allocation11 + $0x5c8] ss:$16 sps:$4 sm:$0xff]   ;;  %v8288_v35 = vld [vmem:[#allocation11 + $0x5ac] ss:$16 sps:$4 sm:$0xff]  }
 0x386   : > { %5408 = vmatprep.subr.bf16.mxu1 %v8201_v60  ;;  %v8286_v60 = vld [vmem:[#allocation11 + $0x5a8] ss:$16 sps:$4 sm:$0xff]  }
 0x388   : > { %5374 = vmatpush2.bf16.msra.mxu0 %v8289_v38  ;;  %v8294_v38 = vld [vmem:[#allocation11 + $0x58c] ss:$16 sps:$4 sm:$0xff]  }
 0x389   : > { %5409 = vmatpush2.bf16.msra.mxu1 %v8199_v40  ;;  %5375 = vmatprep.subr.bf16.mxu0 %v8297_v51  ;;  %v8292_v40 = vld [vmem:[#allocation11 + $0x588] ss:$16 sps:$4 sm:$0xff]  }
 0x38a   : > { %5410 = vmatprep.subr.bf16.mxu1 %v8204_v3  ;;  %v8487_v51 = vld [vmem:[#allocation10] sm:$0x3f] }
 0x38b   : > { %v1648_v3 = vrot.slane %v8487_v51, %v705_v53 }
 0x38c   : > { %5376 = vmatpush2.bf16.msra.mxu0 %v8295_v41  ;;  %v8300_v41 = vld [vmem:[#allocation11 + $0x56c] ss:$16 sps:$4 sm:$0xff]  }
 0x38d   : > { %5411 = vmatpush2.bf16.msra.mxu1 %v8202_v44  ;;  %5377 = vmatprep.subr.bf16.mxu0 %v8303_v17  ;;  %v1652_v44 = vrot.slane %v8487_v51, %v709_v61  ;;  %v8298_v17 = vld [vmem:[#allocation11 + $0x568] ss:$16 sps:$4 sm:$0xff]  }
 0x38e   : > { %5412 = vmatprep.subr.bf16.mxu1 %v8207_v45  ;;  %v8358_v51 = vld [vmem:[#allocation11 + $0x348] ss:$16 sps:$4 sm:$0xff]  }
 0x390   : > { %5378 = vmatpush2.bf16.msra.mxu0 %v8301_v46  ;;  %v8306_v46 = vld [vmem:[#allocation11 + $0x54c] ss:$16 sps:$4 sm:$0xff]  }
 0x391   : > { %5413 = vmatpush2.bf16.msra.mxu1 %v8205_v47  ;;  %5379 = vmatprep.subr.bf16.mxu0 %v8309_v49  ;;  %v8304_v49 = vld [vmem:[#allocation11 + $0x548] ss:$16 sps:$4 sm:$0xff]  }
 0x392   : > { %5414 = vmatprep.subr.bf16.mxu1 %v8210_v50 }
 0x394   : > { %5380 = vmatpush2.bf16.msra.mxu0 %v8307_v14  ;;  %v8312_v14 = vld [vmem:[#allocation11 + $0x52c] ss:$16 sps:$4 sm:$0xff]  }
 0x395   : > { %5415 = vmatpush2.bf16.msra.mxu1 %v8208_v5  ;;  %5381 = vmatprep.subr.bf16.mxu0 %v8315_v52 }
 0x396   : > { %5416 = vmatprep.subr.bf16.mxu1 %v8213_v43  ;;  %v8310_v43 = vld [vmem:[#allocation11 + $0x528] ss:$16 sps:$4 sm:$0xff]  }
 0x398   : > { %5382 = vmatpush2.bf16.msra.mxu0 %v8313_v54 }
 0x399   : > { %5417 = vmatpush2.bf16.msra.mxu1 %v8211_v9  ;;  %5433 = vmatprep.subr.bf16.mxu0 %v8321_v33 }
 0x39a   : > { %5418 = vmatprep.subr.bf16.mxu1 %v8216_v55  ;;  %v8318_v55 = vld [vmem:[#allocation11 + $0x50c] ss:$16 sps:$4 sm:$0xff]  }
 0x39b   : > { %v9400_v58 = vpop.f32.mrf.mxu0 }
 0x39c   : > { %v9402_v23 = vpop.f32.mrf.mxu1  ;;  %v3942_v45 = vadd.f32 %v9400_v58, %v1648_v3  ;;  %v8363_v3 = vld [vmem:[#allocation11 + $0x32c] ss:$16 sps:$4 sm:$0xff]  }
 0x39d   : > { %5419 = vmatpush2.bf16.msra.mxu1 %v8214_v56  ;;  %v9404_v37 = vpop.f32.mrf.mxu0 }
 0x39e   : > { %v9406_v0 = vpop.f32.mrf.mxu1  ;;  %5420 = vmatprep.subr.bf16.mxu1 %v8219_v57  ;;  %v3944_v47 = vadd.f32 %v9404_v37, %v1652_v44  ;;  %v3983_v50 = vadd.f32 %v9402_v23, %v3942_v45  ;;  %v8366_v45 = vld [vmem:[#allocation11 + $0x30c] ss:$16 sps:$4 sm:$0xff]  }
 0x39f   : > { %v3945_v1 = vpop.f32.mrf.mxu0 }
 0x3a0   : > { %v3986_v2 = vpop.f32.mrf.mxu1  ;;  %v3985_v5 = vadd.f32 %v9406_v0, %v3944_v47  ;;  %v9418_v47 = vld [vmem:[#allocation13] sm:$0xf] }
 0x3a1   : > { %5421 = vmatpush2.bf16.msra.mxu1 %v8217_v62  ;;  %v3946_v6 = vpop.f32.mrf.mxu0  ;;  %v8316_v62 = vld [vmem:[#allocation11 + $0x508] ss:$16 sps:$4 sm:$0xff]  }
 0x3a2   : > { %v3987_v18 = vpop.f32.mrf.mxu1  ;;  %5422 = vmatprep.subr.bf16.mxu1 %v8222_v63 }
 0x3a5   : > { %5423 = vmatpush2.bf16.msra.mxu1 %v8220_v15  ;;  %v8319_v15 = vld [vmem:[#allocation11 + $0x2e8] ss:$16 sps:$4 sm:$0xff]  }
 0x3a6   : > { %5474 = vmatprep.subr.bf16.mxu1 %v8228_v19  ;;  %v8324_v19 = vld [vmem:[#allocation11 + $0x2cc] ss:$16 sps:$4 sm:$0xff]  }
 0x3a8   : > { %5425 = vmatmul.mubr.bf16.vlgmr.msra.gmra.mxu1 %v9388_v36  ;;  %v8264_v36 = vld [vmem:[#allocation11 + $0x42c] ss:$16 sps:$4 sm:$0xff]  }
 0x3a9   : > { %5475 = vmatpush1.bf16.msra.mxu1 %v8226_v26  ;;  %v8322_v26 = vld [vmem:[#allocation11 + $0x2c8] ss:$16 sps:$4 sm:$0xff]  }
 0x3aa   : > { %5476 = vmatprep.subr.bf16.mxu1 %v8234_v20  ;;  %v8327_v20 = vld [vmem:[#allocation11 + $0x2ac] ss:$16 sps:$4 sm:$0xff]  }
 0x3ad   : > { %5477 = vmatpush1.bf16.msra.mxu1 %v8232_v21  ;;  %v8325_v21 = vld [vmem:[#allocation11 + $0x2a8] ss:$16 sps:$4 sm:$0xff]  }
 0x3ae   : > { %5478 = vmatprep.subr.bf16.mxu1 %v8240_v4  ;;  %v8330_v4 = vld [vmem:[#allocation11 + $0x28c] ss:$16 sps:$4 sm:$0xff]  }
 0x3b1   : > { %5479 = vmatpush1.bf16.msra.mxu1 %v8238_v22  ;;  %v8328_v22 = vld [vmem:[#allocation11 + $0x288] ss:$16 sps:$4 sm:$0xff]  }
 0x3b2   : > { %5480 = vmatprep.subr.bf16.mxu1 %v8246_v12  ;;  %v8333_v12 = vld [vmem:[#allocation11 + $0x26c] ss:$16 sps:$4 sm:$0xff]  }
 0x3b5   : > { %5481 = vmatpush1.bf16.msra.mxu1 %v8244_v27  ;;  %v8331_v27 = vld [vmem:[#allocation11 + $0x268] ss:$16 sps:$4 sm:$0xff]  }
 0x3b6   : > { %5482 = vmatprep.subr.bf16.mxu1 %v8252_v16  ;;  %v8336_v16 = vld [vmem:[#allocation11 + $0x24c] ss:$16 sps:$4 sm:$0xff]  }
 0x3b9   : > { %5483 = vmatpush1.bf16.msra.mxu1 %v8250_v24  ;;  %v8334_v24 = vld [vmem:[#allocation11 + $0x248] ss:$16 sps:$4 sm:$0xff]  }
 0x3ba   : > { %5484 = vmatprep.subr.bf16.mxu1 %v8258_v25  ;;  %v8339_v25 = vld [vmem:[#allocation11 + $0x22c] ss:$16 sps:$4 sm:$0xff]  }
 0x3bd   : > { %5485 = vmatpush1.bf16.msra.mxu1 %v8256_v39  ;;  %v8342_v39 = vld [vmem:[#allocation11 + $0x20c] ss:$16 sps:$4 sm:$0xff]  }
 0x3be   : > { %5486 = vmatprep.subr.bf16.mxu1 %v8264_v36  ;;  %v8340_v36 = vld [vmem:[#allocation11 + $0x208] ss:$16 sps:$4 sm:$0xff]  }
 0x3c1   : > { %5487 = vmatpush1.bf16.msra.mxu1 %v8262_v28  ;;  %v8345_v28 = vld [vmem:[#allocation11 + $0x3ec] ss:$16 sps:$4 sm:$0xff]  }
 0x3c2   : > { %5488 = vmatprep.subr.bf16.mxu1 %v8270_v29  ;;  %v8343_v29 = vld [vmem:[#allocation11 + $0x3e8] ss:$16 sps:$4 sm:$0xff]  }
 0x3c5   : > { %5489 = vmatpush1.bf16.msra.mxu1 %v8268_v30  ;;  %v8348_v30 = vld [vmem:[#allocation11 + $0x3cc] ss:$16 sps:$4 sm:$0xff]  }
 0x3c6   : > { %5490 = vmatprep.subr.bf16.mxu1 %v8276_v31  ;;  %v8346_v31 = vld [vmem:[#allocation11 + $0x3c8] ss:$16 sps:$4 sm:$0xff]  }
 0x3c9   : > { %5491 = vmatpush2.bf16.msra.mxu1 %v8274_v42  ;;  %v8351_v42 = vld [vmem:[#allocation11 + $0x3ac] ss:$16 sps:$4 sm:$0xff]  }
 0x3ca   : > { %5492 = vmatprep.subr.bf16.mxu1 %v8282_v32  ;;  %v8349_v32 = vld [vmem:[#allocation11 + $0x3a8] ss:$16 sps:$4 sm:$0xff]  }
 0x3cd   : > { %5493 = vmatpush2.bf16.msra.mxu1 %v8280_v34  ;;  %v8354_v34 = vld [vmem:[#allocation11 + $0x38c] ss:$16 sps:$4 sm:$0xff]  }
 0x3ce   : > { %5494 = vmatprep.subr.bf16.mxu1 %v8288_v35  ;;  %v8352_v35 = vld [vmem:[#allocation11 + $0x388] ss:$16 sps:$4 sm:$0xff]  }
 0x3d1   : > { %5495 = vmatpush2.bf16.msra.mxu1 %v8286_v60  ;;  %v8357_v60 = vld [vmem:[#allocation11 + $0x36c] ss:$16 sps:$4 sm:$0xff]  }
 0x3d2   : > { %5496 = vmatprep.subr.bf16.mxu1 %v8294_v38  ;;  %v8355_v38 = vld [vmem:[#allocation11 + $0x368] ss:$16 sps:$4 sm:$0xff]  }
 0x3d5   : > { %5497 = vmatpush2.bf16.msra.mxu1 %v8292_v40  ;;  %v8360_v40 = vld [vmem:[#allocation11 + $0x34c] ss:$16 sps:$4 sm:$0xff]  }
 0x3d6   : > { %5498 = vmatprep.subr.bf16.mxu1 %v8300_v41 }
 0x3d9   : > { %5499 = vmatpush2.bf16.msra.mxu1 %v8298_v17  ;;  %v8361_v17 = vld [vmem:[#allocation11 + $0x328] ss:$16 sps:$4 sm:$0xff]  }
 0x3da   : > { %5500 = vmatprep.subr.bf16.mxu1 %v8306_v46 }
 0x3db   : > { %v4023_v53 = vpop.f32.mrf.mxu0 }
 0x3dc   : > { %v4024_v52 = vadd.f32 %v4023_v53, %v3983_v50  ;;  %v4064_v7 = vpop.f32.mrf.mxu1  ;;  %v8364_v50 = vld [vmem:[#allocation11 + $0x308] ss:$16 sps:$4 sm:$0xff]   ;;  %v4292_v53 = vrot.slane %v9418_v47, %v9269_v8 }
 0x3dd   : > { %v4025_v61 = vpop.f32.mrf.mxu0  ;;  %5501 = vmatpush2.bf16.msra.mxu1 %v8304_v49 }
 0x3de   : > { %v4065_v54 = vadd.f32 %v4064_v7, %v4024_v52  ;;  %v4026_v9 = vadd.f32 %v4025_v61, %v3985_v5  ;;  %v4066_v33 = vpop.f32.mrf.mxu1  ;;  %5502 = vmatprep.subr.bf16.mxu1 %v8312_v14  ;;  %v8369_v14 = vld [vmem:[#allocation14 + $0x74] ss:$8 sps:$4 sm:$0xff]   ;;  %v4296_v5 = vrot.slane %v9418_v47, %v9277_v11  ;;  %v8367_v52 = vld [vmem:[#allocation14 + $0x70] ss:$8 sps:$4 sm:$0xff]   ;;  %v8372_v7 = vld [vmem:[#allocation14 + $0x64] ss:$8 sps:$4 sm:$0xff]  }
 0x3df   : > { %v4027_v56 = vpop.f32.mrf.mxu0 }
 0x3e0   : > { %vm4075_vm12 = vcmp.gt.f32.partialorder %v4065_v54, 0.0  ;;  %v4081_v57 = vmul.f32 0.01, %v4065_v54  ;;  %v4067_v58 = vadd.f32 %v4066_v33, %v4026_v9  ;;  %v4068_v23 = vpop.f32.mrf.mxu1  ;;  %v8370_v33 = vld [vmem:[#allocation14 + $0x60] ss:$8 sps:$4 sm:$0xff]  }
 0x3e1   : > { %v4028_v37 = vpop.f32.mrf.mxu0  ;;  %5503 = vmatpush2.bf16.msra.mxu1 %v8310_v43  ;;  %v8375_v56 = vld [vmem:[#allocation14 + $0x54] ss:$8 sps:$4 sm:$0xff]   ;;  %v8373_v23 = vld [vmem:[#allocation14 + $0x50] ss:$8 sps:$4 sm:$0xff]  }
 0x3e2   : > { %vm4076_vm13 = vcmp.gt.f32.partialorder %v4067_v58, 0.0  ;;  %v4082_v0 = vmul.f32 0.01, %v4067_v58  ;;  %v4069_v63 = vpop.f32.mrf.mxu1  ;;  %5504 = vmatprep.subr.bf16.mxu1 %v8318_v55  ;;  %v4087_v1 = vsel %vm4075_vm12, %v4065_v54, %v4081_v57 }
 0x3e3   : > { %v4093_v18 = vpack.c.bf16 %v4087_v1, %v4087_v1  ;;  %v8415_v63 = vld [vmem:[#allocation14 + $0x170] ss:$8 sps:$4 sm:$0xff]   ;;  %v8417_v1 = vld [vmem:[#allocation14 + $0x174] ss:$8 sps:$4 sm:$0xff]  }
 0x3e4   : > { %v4088_v2 = vsel %vm4076_vm13, %v4067_v58, %v4082_v0  ;;  %v8376_v0 = vld [vmem:[#allocation14 + $0x40] ss:$8 sps:$4 sm:$0xff]  }
 0x3e5   : > { %5505 = vmatpush2.bf16.msra.mxu1 %v8316_v62  ;;  %v4094_v6 = vpack.c.bf16 %v4088_v2, %v4088_v2  ;;  %v8378_v62 = vld [vmem:[#allocation14 + $0x44] ss:$8 sps:$4 sm:$0xff]  }
 0x3e6   : > { %v8420_v2 = vld [vmem:[#allocation14 + $0x164] ss:$8 sps:$4 sm:$0xff]   ;;  %5968 = vmatprep.subr.bf16.mxu1 %v8417_v1 }
 0x3e7   : > { %5383 = vmatprep.mubr.bf16.mxu0 %v4094_v6  ;;  %5506 = vmatprep.mubr.bf16.mxu1 %v4094_v6  ;;  %v8379_v6 = vld [vmem:[#allocation14 + $0x30] ss:$8 sps:$4 sm:$0xff]   ;;  %v8462_v1 = vld [vmem:[#allocation14 + $0x184] ss:$8 sps:$4 sm:$0xff]  }
 0x3e8   : > { %5384 = vmatmul.mubr.bf16.vlgmr.msra.gmra.mxu0 %v4093_v18  ;;  %5507 = vmatmul.mubr.bf16.vlgmr.msra.gmra.mxu1 %v4093_v18  ;;  %v8418_v18 = vld [vmem:[#allocation14 + $0x160] ss:$8 sps:$4 sm:$0xff]  }
 0x3e9   : > { %5434 = vmatpush1.bf16.msra.mxu0 %v8319_v15  ;;  %5465 = vmatprep.mubr.bf16.mxu0 %v9393_v59  ;;  %v8337_v59 = vld [vmem:[#allocation11 + $0x228] ss:$16 sps:$4 sm:$0xff]  }
 0x3ea   : > { %5435 = vmatprep.subr.bf16.mxu0 %v8324_v19  ;;  %v8384_v15 = vld [vmem:[#allocation14 + $0x24] ss:$8 sps:$4 sm:$0xff]   ;;  %5969 = vmatpush1.bf16.msra.mxu1 %v8415_v63  ;;  %v8423_v19 = vld [vmem:[#allocation14 + $0x154] ss:$8 sps:$4 sm:$0xff]   ;;  %v8460_v63 = vld [vmem:[#allocation14 + $0x180] ss:$8 sps:$4 sm:$0xff]  }
 0x3eb   : > { %5970 = vmatprep.subr.bf16.mxu1 %v8420_v2 }
 0x3ed   : > { %5436 = vmatpush1.bf16.msra.mxu0 %v8322_v26  ;;  %v8382_v26 = vld [vmem:[#allocation14 + $0x20] ss:$8 sps:$4 sm:$0xff]  }
 0x3ee   : > { %5437 = vmatprep.subr.bf16.mxu0 %v8327_v20  ;;  %v8387_v20 = vld [vmem:[#allocation14 + $0x14] ss:$8 sps:$4 sm:$0xff]   ;;  %5971 = vmatpush1.bf16.msra.mxu1 %v8418_v18 }
 0x3ef   : > { %5972 = vmatprep.subr.bf16.mxu1 %v8423_v19 }
 0x3f1   : > { %5438 = vmatpush1.bf16.msra.mxu0 %v8325_v21  ;;  %v8421_v21 = vld [vmem:[#allocation14 + $0x150] ss:$8 sps:$4 sm:$0xff]  }
 0x3f2   : > { %5439 = vmatprep.subr.bf16.mxu0 %v8330_v4  ;;  %v8426_v4 = vld [vmem:[#allocation14 + $0x144] ss:$8 sps:$4 sm:$0xff]   ;;  %5973 = vmatpush1.bf16.msra.mxu1 %v8421_v21 }
 0x3f3   : > { %5974 = vmatprep.subr.bf16.mxu1 %v8426_v4 }
 0x3f5   : > { %5440 = vmatpush1.bf16.msra.mxu0 %v8328_v22  ;;  %v8385_v22 = vld [vmem:[#allocation14 + $0x10] ss:$8 sps:$4 sm:$0xff]  }
 0x3f6   : > { %5441 = vmatprep.subr.bf16.mxu0 %v8333_v12  ;;  %v8390_v12 = vld [vmem:[#allocation14 + $0x4] ss:$8 sps:$4 sm:$0xff]  }
 0x3f9   : > { %5442 = vmatpush1.bf16.msra.mxu0 %v8331_v27  ;;  %v8424_v27 = vld [vmem:[#allocation14 + $0x140] ss:$8 sps:$4 sm:$0xff]  }
 0x3fa   : > { %5443 = vmatprep.subr.bf16.mxu0 %v8336_v16  ;;  %v8429_v16 = vld [vmem:[#allocation14 + $0x134] ss:$8 sps:$4 sm:$0xff]   ;;  %5975 = vmatpush1.bf16.msra.mxu1 %v8424_v27 }
 0x3fb   : > { %5976 = vmatprep.subr.bf16.mxu1 %v8429_v16 }
 0x3fd   : > { %5444 = vmatpush1.bf16.msra.mxu0 %v8334_v24  ;;  %v8388_v24 = vld [vmem:[#allocation14] ss:$8 sps:$4 sm:$0xff]  }
 0x3fe   : > { %5445 = vmatprep.subr.bf16.mxu0 %v8339_v25  ;;  %v8393_v25 = vld [vmem:[#allocation14 + $0xf4] ss:$8 sps:$4 sm:$0xff]  }
 0x401   : > { %5446 = vmatpush1.bf16.msra.mxu0 %v8337_v59  ;;  %v8427_v59 = vld [vmem:[#allocation14 + $0x130] ss:$8 sps:$4 sm:$0xff]  }
 0x402   : > { %5447 = vmatprep.subr.bf16.mxu0 %v8342_v39  ;;  %v8432_v39 = vld [vmem:[#allocation14 + $0x124] ss:$8 sps:$4 sm:$0xff]   ;;  %5977 = vmatpush1.bf16.msra.mxu1 %v8427_v59 }
 0x403   : > { %5978 = vmatprep.subr.bf16.mxu1 %v8432_v39  ;;  %v4304_v39 = vrot.slane %v9418_v47, %v9280_v13  ;;  %v8463_v13 = vld [vmem:[#allocation17 + $0x78] sm:$0xff]  }
 0x405   : > { %5448 = vmatpush1.bf16.msra.mxu0 %v8340_v36  ;;  %v8391_v36 = vld [vmem:[#allocation14 + $0xf0] ss:$8 sps:$4 sm:$0xff]  }
 0x406   : > { %5449 = vmatprep.subr.bf16.mxu0 %v8345_v28  ;;  %v8396_v28 = vld [vmem:[#allocation14 + $0xe4] ss:$8 sps:$4 sm:$0xff]  }
 0x409   : > { %5450 = vmatpush2.bf16.msra.mxu0 %v8343_v29  ;;  %v8430_v29 = vld [vmem:[#allocation14 + $0x120] ss:$8 sps:$4 sm:$0xff]  }
 0x40a   : > { %5451 = vmatprep.subr.bf16.mxu0 %v8348_v30  ;;  %v8435_v30 = vld [vmem:[#allocation14 + $0x114] ss:$8 sps:$4 sm:$0xff]   ;;  %5979 = vmatpush1.bf16.msra.mxu1 %v8430_v29 }
 0x40b   : > { %5980 = vmatprep.subr.bf16.mxu1 %v8435_v30 }
 0x40d   : > { %5452 = vmatpush2.bf16.msra.mxu0 %v8346_v31  ;;  %v8394_v31 = vld [vmem:[#allocation14 + $0xe0] ss:$8 sps:$4 sm:$0xff]  }
 0x40e   : > { %5453 = vmatprep.subr.bf16.mxu0 %v8351_v42  ;;  %v8399_v42 = vld [vmem:[#allocation14 + $0xd4] ss:$8 sps:$4 sm:$0xff]  }
 0x411   : > { %5454 = vmatpush2.bf16.msra.mxu0 %v8349_v32  ;;  %v8433_v32 = vld [vmem:[#allocation14 + $0x110] ss:$8 sps:$4 sm:$0xff]  }
 0x412   : > { %5455 = vmatprep.subr.bf16.mxu0 %v8354_v34  ;;  %v8438_v34 = vld [vmem:[#allocation14 + $0x104] ss:$8 sps:$4 sm:$0xff]   ;;  %5981 = vmatpush1.bf16.msra.mxu1 %v8433_v32 }
 0x413   : > { %5982 = vmatprep.subr.bf16.mxu1 %v8438_v34 }
 0x415   : > { %5456 = vmatpush2.bf16.msra.mxu0 %v8352_v35  ;;  %v8397_v35 = vld [vmem:[#allocation14 + $0xd0] ss:$8 sps:$4 sm:$0xff]  }
 0x416   : > { %5457 = vmatprep.subr.bf16.mxu0 %v8357_v60  ;;  %v8402_v60 = vld [vmem:[#allocation14 + $0xc4] ss:$8 sps:$4 sm:$0xff]  }
 0x419   : > { %5458 = vmatpush2.bf16.msra.mxu0 %v8355_v38  ;;  %v8436_v38 = vld [vmem:[#allocation14 + $0x100] ss:$8 sps:$4 sm:$0xff]  }
 0x41a   : > { %5459 = vmatprep.subr.bf16.mxu0 %v8360_v40  ;;  %v8441_v40 = vld [vmem:[#allocation14 + $0x1f4] ss:$8 sps:$4 sm:$0xff]   ;;  %5983 = vmatpush1.bf16.msra.mxu1 %v8436_v38 }
 0x41b   : > { %v5303_v41 = vpop.f32.mrf.mxu0  ;;  %5984 = vmatprep.subr.bf16.mxu1 %v8441_v40 }
 0x41c   : > { %v5304_v61 = vadd.f32 %v5303_v41, %v4292_v53  ;;  %v8439_v41 = vld [vmem:[#allocation14 + $0x1f0] ss:$8 sps:$4 sm:$0xff]  }
 0x41d   : > { %5460 = vmatpush2.bf16.msra.mxu0 %v8358_v51  ;;  %v5305_v44 = vpop.f32.mrf.mxu0  ;;  %v8400_v51 = vld [vmem:[#allocation14 + $0xc0] ss:$8 sps:$4 sm:$0xff]   ;;  %v8445_v53 = vld [vmem:[#allocation14 + $0x1d0] ss:$8 sps:$4 sm:$0xff]  }
 0x41e   : > { %5461 = vmatprep.subr.bf16.mxu0 %v8363_v3  ;;  %v5306_v54 = vadd.f32 %v5305_v44, %v4296_v5  ;;  %v8405_v3 = vld [vmem:[#allocation14 + $0xb4] ss:$8 sps:$4 sm:$0xff]   ;;  %v8444_v44 = vld [vmem:[#allocation14 + $0x1e4] ss:$8 sps:$4 sm:$0xff]   ;;  %5985 = vmatpush2.bf16.msra.mxu1 %v8439_v41 }
 0x41f   : > { %v5307_v46 = vpop.f32.mrf.mxu0  ;;  %5986 = vmatprep.subr.bf16.mxu1 %v8444_v44  ;;  %v8450_v5 = vld [vmem:[#allocation14 + $0x1c4] ss:$8 sps:$4 sm:$0xff]   ;;  %v8465_v41 = vld [vmem:[#allocation17 + $0x70] sm:$0xff]  }
 0x420   : > { %v8442_v46 = vld [vmem:[#allocation14 + $0x1e0] ss:$8 sps:$4 sm:$0xff]   ;;  %v8466_v44 = vld [vmem:[#allocation17 + $0x30] sm:$0xff]  }
 0x421   : > { %5462 = vmatpush2.bf16.msra.mxu0 %v8361_v17  ;;  %v5308_v49 = vpop.f32.mrf.mxu0  ;;  %v8403_v17 = vld [vmem:[#allocation14 + $0xb0] ss:$8 sps:$4 sm:$0xff]  }
 0x422   : > { %5463 = vmatprep.subr.bf16.mxu0 %v8366_v45  ;;  %v8408_v45 = vld [vmem:[#allocation14 + $0xa4] ss:$8 sps:$4 sm:$0xff]   ;;  %v8447_v49 = vld [vmem:[#allocation14 + $0x1d4] ss:$8 sps:$4 sm:$0xff]   ;;  %5987 = vmatpush2.bf16.msra.mxu1 %v8442_v46 }
 0x423   : > { %5988 = vmatprep.subr.bf16.mxu1 %v8447_v49  ;;  %v8469_v46 = vld [vmem:[#allocation17 + $0x60] sm:$0xff]  }
 0x424   : > { %v8470_v49 = vld [vmem:[#allocation17 + $0x20] sm:$0xff]  }
 0x425   : > { %5464 = vmatpush2.bf16.msra.mxu0 %v8364_v50  ;;  %v8406_v50 = vld [vmem:[#allocation14 + $0xa0] ss:$8 sps:$4 sm:$0xff]  }
 0x426   : > { %5927 = vmatprep.subr.bf16.mxu0 %v8369_v14  ;;  %v8411_v14 = vld [vmem:[#allocation14 + $0x94] ss:$8 sps:$4 sm:$0xff]   ;;  %5989 = vmatpush2.bf16.msra.mxu1 %v8445_v53 }
 0x427   : > { %5990 = vmatprep.subr.bf16.mxu1 %v8450_v5  ;;  %v8473_v53 = vld [vmem:[#allocation17 + $0x50] sm:$0xff]  }
 0x428   : > { %5466 = vmatmul.mubr.bf16.vlgmr.msra.gmra.mxu0 %v9395_v48  ;;  %v5344_v43 = vpop.f32.mrf.mxu1  ;;  %v8381_v48 = vld [vmem:[#allocation14 + $0x34] ss:$8 sps:$4 sm:$0xff]  }
 0x429   : > { %v9425_v9 = vadd.f32 %v5344_v43, %v5304_v61  ;;  %5928 = vmatpush1.bf16.msra.mxu0 %v8367_v52  ;;  %v8409_v52 = vld [vmem:[#allocation14 + $0x90] ss:$8 sps:$4 sm:$0xff]   ;;  %v8448_v61 = vld [vmem:[#allocation14 + $0x1c0] ss:$8 sps:$4 sm:$0xff]   ;;  %v8453_v43 = vld [vmem:[#allocation14 + $0x1b4] ss:$8 sps:$4 sm:$0xff]  }
 0x42a   : > { %v5346_v55 = vpop.f32.mrf.mxu1  ;;  %5929 = vmatprep.subr.bf16.mxu0 %v8372_v7  ;;  %v8414_v7 = vld [vmem:[#allocation14 + $0x84] ss:$8 sps:$4 sm:$0xff]   ;;  %5991 = vmatpush2.bf16.msra.mxu1 %v8448_v61  ;;  %v8474_v5 = vld [vmem:[#allocation17 + $0x10] sm:$0xff]  }
 0x42b   : > { %v9427_v57 = vadd.f32 %v5346_v55, %v5306_v54  ;;  %v8412_v54 = vld [vmem:[#allocation14 + $0x80] ss:$8 sps:$4 sm:$0xff]   ;;  %5992 = vmatprep.subr.bf16.mxu1 %v8453_v43 }
 0x42c   : > { %v5348_v58 = vpop.f32.mrf.mxu1  ;;  %v8477_v61 = vld [vmem:[#allocation17 + $0x40] sm:$0xff]  }
 0x42d   : > { %5930 = vmatpush1.bf16.msra.mxu0 %v8370_v33  ;;  %v8451_v33 = vld [vmem:[#allocation14 + $0x1b0] ss:$8 sps:$4 sm:$0xff]   ;;  %v8454_v58 = vld [vmem:[#allocation14 + $0x1a0] ss:$8 sps:$4 sm:$0xff]  }
 0x42e   : > { %v5349_v37 = vpop.f32.mrf.mxu1  ;;  %5931 = vmatprep.subr.bf16.mxu0 %v8375_v56  ;;  %5993 = vmatpush2.bf16.msra.mxu1 %v8451_v33  ;;  %v8456_v56 = vld [vmem:[#allocation14 + $0x1a4] ss:$8 sps:$4 sm:$0xff]   ;;  %v8942_v33 = vmov 0.0  }
 0x42f   : > { %5994 = vmatprep.subr.bf16.mxu1 %v8456_v56  ;;  %v8478_v43 = vld [vmem:[#allocation17] sm:$0xff]   ;;  %v8481_v56 = vld [vmem:[#allocation20 + $0x28] sm:$0xff]  }
 0x431   : > { %5932 = vmatpush1.bf16.msra.mxu0 %v8373_v23 }
 0x432   : > { %5933 = vmatprep.subr.bf16.mxu0 %v8378_v62  ;;  %5995 = vmatpush2.bf16.msra.mxu1 %v8454_v58  ;;  %v8459_v62 = vld [vmem:[#allocation14 + $0x194] ss:$8 sps:$4 sm:$0xff]   ;;  %v8482_v58 = vld [vmem:[#allocation20 + $0x20] sm:$0xff]  }
 0x433   : > { %5996 = vmatprep.subr.bf16.mxu1 %v8459_v62 }
 0x435   : > { %5934 = vmatpush1.bf16.msra.mxu0 %v8376_v0  ;;  %v8457_v0 = vld [vmem:[#allocation14 + $0x190] ss:$8 sps:$4 sm:$0xff]  }
 0x436   : > { %5935 = vmatprep.subr.bf16.mxu0 %v8381_v48  ;;  %5997 = vmatpush2.bf16.msra.mxu1 %v8457_v0 }
 0x437   : > { %5998 = vmatprep.subr.bf16.mxu1 %v8462_v1 }
 0x439   : > { %5936 = vmatpush1.bf16.msra.mxu0 %v8379_v6 }
 0x43a   : > { %5937 = vmatprep.subr.bf16.mxu0 %v8384_v15  ;;  %5999 = vmatpush2.bf16.msra.mxu1 %v8460_v63  ;;  %v5595_v63 = vld [vmem:[#allocation16] sm:$0x3] }
 0x43b   : > { %7303 = vmatprep.subr.bf16.mxu1 %v8942_v33  ;;  %v5600_v1 = vrot.slane %v5595_v63, %v9269_v8  ;;  %v8484_v8 = vld [vmem:[#allocation20 + $0x10] sm:$0xff]  }
 0x43d   : > { %5938 = vmatpush1.bf16.msra.mxu0 %v8382_v26 }
 0x43e   : > { %5939 = vmatprep.subr.bf16.mxu0 %v8387_v20 }
 0x441   : > { %5940 = vmatpush1.bf16.msra.mxu0 %v8385_v22 }
 0x442   : > { %5941 = vmatprep.subr.bf16.mxu0 %v8390_v12 }
 0x445   : > { %5942 = vmatpush1.bf16.msra.mxu0 %v8388_v24 }
 0x446   : > { %5943 = vmatprep.subr.bf16.mxu0 %v8393_v25 }
 0x449   : > { %5944 = vmatpush2.bf16.msra.mxu0 %v8391_v36 }
 0x44a   : > { %5945 = vmatprep.subr.bf16.mxu0 %v8396_v28 }
 0x44d   : > { %5946 = vmatpush2.bf16.msra.mxu0 %v8394_v31 }
 0x44e   : > { %5947 = vmatprep.subr.bf16.mxu0 %v8399_v42 }
 0x451   : > { %5948 = vmatpush2.bf16.msra.mxu0 %v8397_v35 }
 0x452   : > { %5949 = vmatprep.subr.bf16.mxu0 %v8402_v60 }
 0x455   : > { %5950 = vmatpush2.bf16.msra.mxu0 %v8400_v51 }
 0x456   : > { %5951 = vmatprep.subr.bf16.mxu0 %v8405_v3 }
 0x459   : > { %5952 = vmatpush2.bf16.msra.mxu0 %v8403_v17  ;;  %v8467_v17 = vld [vmem:[#allocation17 + $0x68] sm:$0xff]  }
 0x45a   : > { %5953 = vmatprep.subr.bf16.mxu0 %v8408_v45  ;;  %v8468_v45 = vld [vmem:[#allocation17 + $0x28] sm:$0xff]  }
 0x45d   : > { %5954 = vmatpush2.bf16.msra.mxu0 %v8406_v50  ;;  %v8471_v50 = vld [vmem:[#allocation17 + $0x58] sm:$0xff]  }
 0x45e   : > { %5955 = vmatprep.subr.bf16.mxu0 %v8411_v14  ;;  %v8472_v14 = vld [vmem:[#allocation17 + $0x18] sm:$0xff]  }
 0x461   : > { %5956 = vmatpush2.bf16.msra.mxu0 %v8409_v52  ;;  %v8475_v52 = vld [vmem:[#allocation17 + $0x48] sm:$0xff]  }
 0x462   : > { %5957 = vmatprep.subr.bf16.mxu0 %v8414_v7  ;;  %v8476_v7 = vld [vmem:[#allocation17 + $0x8] sm:$0xff]  }
 0x465   : > { %5958 = vmatpush2.bf16.msra.mxu0 %v8412_v54  ;;  %v8479_v54 = vld [vmem:[#allocation20 + $0x38] sm:$0xff]  }
 0x466   : > { %7272 = vmatprep.subr.bf16.mxu0 %v8463_v13 }
 0x468   : > { %v5426_v55 = vpop.f32.mrf.mxu1 }
 0x46a   : > { %v5428_v23 = vpop.f32.mrf.mxu1 }
 0x46b   : > { %v5429_v28 = vadd.f32 %v5428_v23, %v4304_v39  ;;  %v8483_v23 = vld [vmem:[#allocation20 + $0x18] sm:$0xff]  }
 0x46c   : > { %v5430_v37 = vpop.f32.mrf.mxu1  ;;  %v7242_v39 = vld [vmem:[#allocation19] ss:$0 sm:$0xff] }
 0x46e   : > { %v5431_v48 = vpop.f32.mrf.mxu1 }
 0x4a8   : > { %v5385_v2 = vpop.f32.mrf.mxu0  ;;  %v5508_v6 = vpop.f32.mrf.mxu1 }
 0x4a9   : > { %v5386_v15 = vadd.f32 %v5385_v2, %v9425_v9  ;;  %v4300_v9 = vrot.slane %v9418_v47, %v9274_v10  ;;  %v8464_v47 = vld [vmem:[#allocation17 + $0x38] sm:$0xff]   ;;  %v5604_v2 = vrot.slane %v5595_v63, %v9277_v11  ;;  %v8485_v11 = vld [vmem:[#allocation20 + $0x8] sm:$0xff]  }
 0x4aa   : > { %v5387_v18 = vpop.f32.mrf.mxu0  ;;  %v5510_v19 = vpop.f32.mrf.mxu1 }
 0x4ab   : > { %vm5515_vm14 = vcmp.gt.f32.partialorder %v5386_v15, 0.0  ;;  %v5519_v26 = vmul.f32 0.01, %v5386_v15  ;;  %v5388_v20 = vadd.f32 %v5387_v18, %v9427_v57  ;;  %v5427_v36 = vadd.f32 %v5426_v55, %v4300_v9  ;;  %v8480_v55 = vld [vmem:[#allocation20 + $0x30] sm:$0xff]  }
 0x4ac   : > { %v5389_v21 = vpop.f32.mrf.mxu0  ;;  %v5512_v4 = vpop.f32.mrf.mxu1 }
 0x4ad   : > { %vm5516_vm15 = vcmp.gt.f32.partialorder %v5388_v20, 0.0  ;;  %v5520_v22 = vmul.f32 0.01, %v5388_v20  ;;  %v5523_v12 = vsel %vm5515_vm14, %v5386_v15, %v5519_v26 }
 0x4ae   : > { %v5390_v27 = vpop.f32.mrf.mxu0  ;;  %v5513_v16 = vpop.f32.mrf.mxu1  ;;  %v5527_v59 = vpack.c.bf16 %v5523_v12, %v5523_v12 }
 0x4af   : > { %v5524_v24 = vsel %vm5516_vm15, %v5388_v20, %v5520_v22 }
 0x4b0   : > { %v5528_v25 = vpack.c.bf16 %v5524_v24, %v5524_v24 }
 0x4b2   : > { %5959 = vmatprep.mubr.bf16.mxu0 %v5528_v25 }
 0x4b3   : > { %5960 = vmatmul.mubr.bf16.vlgmr.msra.gmra.mxu0 %v5527_v59  ;;  %v8486_v59 = vld [vmem:[#allocation20] sm:$0xff]  }
 0x4b4   : > { %7273 = vmatpush3.bf16.msra.mxu0 %v8464_v47 }
 0x4b5   : > { %7274 = vmatprep.subr.bf16.mxu0 %v8465_v41 }
 0x4b8   : > { %7275 = vmatpush3.bf16.msra.mxu0 %v8466_v44 }
 0x4b9   : > { %7276 = vmatprep.subr.bf16.mxu0 %v8467_v17 }
 0x4bc   : > { %7277 = vmatpush3.bf16.msra.mxu0 %v8468_v45 }
 0x4bd   : > { %7278 = vmatprep.subr.bf16.mxu0 %v8469_v46 }
 0x4c0   : > { %7279 = vmatpush3.bf16.msra.mxu0 %v8470_v49 }
 0x4c1   : > { %7280 = vmatprep.subr.bf16.mxu0 %v8471_v50 }
 0x4c4   : > { %7281 = vmatpush3.bf16.msra.mxu0 %v8472_v14 }
 0x4c5   : > { %7282 = vmatprep.subr.bf16.mxu0 %v8473_v53 }
 0x4c8   : > { %7283 = vmatpush3.bf16.msra.mxu0 %v8474_v5 }
 0x4c9   : > { %7284 = vmatprep.subr.bf16.mxu0 %v8475_v52 }
 0x4cc   : > { %7285 = vmatpush3.bf16.msra.mxu0 %v8476_v7 }
 0x4cd   : > { %7286 = vmatprep.subr.bf16.mxu0 %v8477_v61 }
 0x4d0   : > { %7287 = vmatpush3.bf16.msra.mxu0 %v8478_v43 }
 0x4e8   : > { %v5467_v57 = vpop.f32.mrf.mxu0 }
 0x4e9   : > { %v5468_v29 = vadd.f32 %v5467_v57, %v5427_v36 }
 0x4ea   : > { %v5469_v30 = vpop.f32.mrf.mxu0 }
 0x4eb   : > { %v5509_v31 = vadd.f32 %v5508_v6, %v5468_v29  ;;  %v5470_v42 = vadd.f32 %v5469_v30, %v5429_v28 }
 0x4ec   : > { %v5471_v32 = vpop.f32.mrf.mxu0 }
 0x4ed   : > { %vm5517_vm0 = vcmp.gt.f32.partialorder %v5509_v31, 0.0  ;;  %v5521_v34 = vmul.f32 0.01, %v5509_v31  ;;  %v5511_v35 = vadd.f32 %v5510_v19, %v5470_v42 }
 0x4ee   : > { %v5472_v60 = vpop.f32.mrf.mxu0 }
 0x4ef   : > { %v5522_v38 = vmul.f32 0.01, %v5511_v35  ;;  %vm5518_vm1 = vcmp.gt.f32.partialorder %v5511_v35, 0.0  ;;  %v5525_v40 = vsel %vm5517_vm0, %v5509_v31, %v5521_v34  ;;  %v7259_v34 = vld [vmem:[#allocation22] ss:$0 sm:$0xff] }
 0x4f0   : > { %v5529_v3 = vpack.c.bf16 %v5525_v40, %v5525_v40 }
 0x4f1   : > { %v5526_v51 = vsel %vm5518_vm1, %v5511_v35, %v5522_v38 }
 0x4f2   : > { %v5530_v10 = vpack.c.bf16 %v5526_v51, %v5526_v51 }
 0x4f4   : > { %6000 = vmatprep.mubr.bf16.mxu1 %v5530_v10 }
 0x4f5   : > { %6001 = vmatmul.mubr.bf16.vlgmr.msra.gmra.mxu1 %v5529_v3 }
 0x4f6   : > { %7304 = vmatpush3.bf16.msra.mxu1 %v8479_v54  ;;  %7319 = vmatprep.mubr.msk.bf16.mxu1 %vm8943_vm4, %v8942_v33 }
 0x4f7   : > { %7305 = vmatprep.subr.bf16.mxu1 %v8942_v33 }
 0x4fa   : > { %7306 = vmatpush3.bf16.msra.mxu1 %v8480_v55 }
 0x4fb   : > { %7307 = vmatprep.subr.bf16.mxu1 %v8942_v33 }
 0x4fe   : > { %7308 = vmatpush3.bf16.msra.mxu1 %v8481_v56 }
 0x4ff   : > { %7309 = vmatprep.subr.bf16.mxu1 %v8942_v33 }
 0x502   : > { %7310 = vmatpush3.bf16.msra.mxu1 %v8482_v58 }
 0x503   : > { %7311 = vmatprep.subr.bf16.mxu1 %v8942_v33 }
 0x506   : > { %7312 = vmatpush3.bf16.msra.mxu1 %v8483_v23 }
 0x507   : > { %7313 = vmatprep.subr.bf16.mxu1 %v8942_v33 }
 0x50a   : > { %7314 = vmatpush3.bf16.msra.mxu1 %v8484_v8 }
 0x50b   : > { %7315 = vmatprep.subr.bf16.mxu1 %v8942_v33 }
 0x50e   : > { %7316 = vmatpush3.bf16.msra.mxu1 %v8485_v11 }
 0x50f   : > { %7317 = vmatprep.subr.bf16.mxu1 %v8942_v33 }
 0x512   : > { %7318 = vmatpush3.bf16.msra.mxu1 %v8486_v59 }
 0x573   : > { %v5961_v37 = vpop.f32.mrf.mxu0 }
 0x574   : > { %v5962_v6 = vadd.f32 %v5961_v37, %v5600_v1 }
 0x575   : > { %v5963_v62 = vpop.f32.mrf.mxu0 }
 0x576   : > { %v5964_v18 = vadd.f32 %v5963_v62, %v5604_v2 }
 0x577   : > { %v5965_v0 = vpop.f32.mrf.mxu0 }
 0x579   : > { %v5966_v48 = vpop.f32.mrf.mxu0 }
 0x5b5   : > { %v6002_v15 = vpop.f32.mrf.mxu1 }
 0x5b6   : > { %v6003_v19 = vadd.f32 %v6002_v15, %v5962_v6 }
 0x5b7   : > { %v6004_v26 = vpop.f32.mrf.mxu1 }
 0x5b8   : > { %vm6009_vm2 = vcmp.gt.f32.partialorder %v6003_v19, 0.0  ;;  %v6011_v20 = vmul.f32 0.01, %v6003_v19  ;;  %v6005_v21 = vadd.f32 %v6004_v26, %v5964_v18 }
 0x5b9   : > { %v6006_v4 = vpop.f32.mrf.mxu1 }
 0x5ba   : > { %vm6010_vm3 = vcmp.gt.f32.partialorder %v6005_v21, 0.0  ;;  %v6012_v22 = vmul.f32 0.01, %v6005_v21  ;;  %v6013_v12 = vsel %vm6009_vm2, %v6003_v19, %v6011_v20 }
 0x5bb   : > { %v6007_v27 = vpop.f32.mrf.mxu1  ;;  %v6015_v25 = vpack.c.bf16 %v6013_v12, %v6013_v12 }
 0x5bc   : > { %v6014_v16 = vsel %vm6010_vm3, %v6005_v21, %v6012_v22 }
 0x5bd   : > { %v6016_v24 = vpack.c.bf16 %v6014_v16, %v6014_v16 }
 0x5bf   : > { %6184 = vmatprep.mubr.bf16.mxu0 %v6016_v24 }
 0x5c0   : > { %6185 = vmatmul.mubr.bf16.vlgmr.msra.gmra.mxu0 %v6015_v25 }
 0x680   : > { %v7288_v9 = vpop.f32.mrf.mxu0 }
 0x682   : > { %v7289_v36 = vpop.f32.mrf.mxu0 }
 0x683   : > { %v7290_v57 = vadd.f32 %v7289_v36, %v7288_v9 }
 0x684   : > { %v7291_v28 = vpop.f32.mrf.mxu0 }
 0x685   : > { %v6187_v29 = vadd.f32 %v7290_v57, %v7242_v39 }
 0x686   : > { %v7292_v30 = vpop.f32.mrf.mxu0 }
 0x687   : > { %vm6192_vm5 = vcmp.gt.f32.partialorder %v6187_v29, 0.0  ;;  %v6193_v31 = vmul.f32 0.01, %v6187_v29 }
 0x689   : > { %v6194_v42 = vsel %vm6192_vm5, %v6187_v29, %v6193_v31 }
 0x68a   : > { %v6195_v32 = vpack.c.bf16 %v6194_v42, %v6194_v42 }
 0x68c   : > { %7320 = vmatmul.mubr.bf16.vlgmr.msra.gmra.mxu1 %v6195_v32 }
 0x74c   : > { %v6301_v35 = vpop.f32.mrf.mxu1 }
 0x74d   : > { %v6302_v60 = vadd.f32 %v7259_v34, %v6301_v35 }
 0x74e   : > { %v7321_v38 = vpop.f32.mrf.mxu1 }
 0x74f   : > { %6307 = vst [vmem:[%s617_s3] sm:$0xff] %v6302_v60 }
 0x750   : > { %v6304_v40 = vpop.f32.mrf.mxu1 }
 0x751   : > { %8841 = shalt.err (!%p8838_p11)
}
 0x752   : > { %s8842_s29 = scalar_lea.hbm %s9443_s22, 128  ;;  %s8846_s6 = scalar_lea.hbm %s9543_s30, 256 }
 0x753   : > { %p8843_p12 = scmp.ne.s32.totalorder %s9443_s22, %s8842_s29  ;;  %p8847_p4 = scmp.lt.s32.totalorder %s9443_s22, %s9543_s30 }
 0x754   : > { %p8848_p5 = scmp.lt.s32.totalorder %s8846_s6, %s8842_s29 }
 0x755   : > { %p8844_p1 = pnand %p8843_p12, %p9544_p6 }
 0x756   : > { %p8849_p8 = por %p8848_p5, %p8847_p4 }
 0x757   : > { %p8845_p3 = pneg %p8844_p1 }
 0x759   : > { %p8850_p9 = pnand %p8849_p8, %p8845_p3 }
 0x75b   : > { %8853 = shalt.err (!%p8850_p9)
}
 0x75c   : > { %7373 = dma.vmem_to_hbm [thread:$0]  (%p9544_p6), %s9445_s4, 128, %s9443_s22, %s6309_s13   ;;  %v7322_v51 = vpop.f32.mrf.mxu1 }
 0x75d PF: > { %s6334_s3 = sand.u32 1, %s8904_s25   ;;  %p9545_p13 = scmp.ne.s32.totalorder %s9527_s19, 0 }
 0x75e   : > { %p9546_p0 = scmp.ge.s32.totalorder %s8916_s28, 2  ;;  %s6335_s15 = scalar_lea.sflag [#allocation4], %s6334_s3 }
 0x760   : > { %p7417_p2 = pnand %p9546_p0, %p9545_p13 }
 0x762   : > { %p7418_p7 = pneg %p7417_p2 }
 0x764   : > { %8899 = dma.done.wait (%p7418_p7), %s6335_s15, 128  }
 0x765   : > { %8901 = vsyncadd (%p7418_p7), %s6335_s15, 4294967168  ;;  %p32_p10 = scmp.ge.s32.totalorder %s9156_s18, 4   ;;  %s9547_s25 = smov %s8908_s26 }
 0x766   : > { %s9548_s26 = smov %s8912_s27  ;;  %s9549_s27 = smov %s9167_s20 }
 0x767   : > { %s9550_s28 = smov %s9156_s18  ;;  %34 = sbr.rel (!%p32_p10) target bundleno = 20 (0x14), region = 165 }
 0x76c   :  { %6340 = vsyncpa [#allocation3], 1 }
 0x76d   :  { %6342 = vsyncpa [#allocation3 + $0x1], 1 }
 0x76e   :  { %6343 = vsyncpa [#allocation6], 1 }
 0x76f   :  { %6344 = vsyncpa [#allocation9], 1 }
 0x770   :  { %6345 = vsyncpa [#allocation12], 1 }
 0x771   :  { %6346 = vsyncpa [#allocation15], 1 }
 0x772   :  { %6347 = vsyncpa [#allocation18], 1 }
 0x773   :  { %6348 = vsyncpa [#allocation21], 1 }
 0x774   :  { %6349 = vsyncpa [#allocation4], 1 }
 0x775   :  { %6351 = vsyncpa [#allocation4 + $0x1], 1 }

</bundles_post_ra>
